<compile_context>
chip_gen: v6e
topology: v6e:2x2x1
jax: 0.10.0
libtpu: 0.0.40
codegen_flags: <defaults>
</compile_context>

<pallas_src>
import functools
import math

import jax
import jax.numpy as jnp
from jax import lax
from jax.experimental import pallas as pl
from jax.experimental.pallas import tpu as pltpu


# -----------------------------------------------------------------------------
# tiling helpers
# -----------------------------------------------------------------------------
def _pick(dim, candidates):
    """Largest candidate that evenly divides dim, else the full dim (one block)."""
    for c in candidates:
        if dim >= c and dim % c == 0:
            return c
    return dim


def _pad128(n):
    return ((n + 127) // 128) * 128


_NEG_BIG = -1e30   # finite "−inf" for masked logits (safe in fp32 exp/log)


# -----------------------------------------------------------------------------
# Pallas kernels
# -----------------------------------------------------------------------------
def _linear_kernel(x_ref, w_ref, b_ref, *rest, act, has_res):
    """Tiled matmul: bf16 operands, fp32 accumulation, fused bias/act/residual."""
    if has_res:
        r_ref, o_ref, acc_ref = rest
    else:
        o_ref, acc_ref = rest

    k = pl.program_id(2)

    @pl.when(k == 0)
    def _():
        acc_ref[...] = jnp.zeros_like(acc_ref)

    acc_ref[...] += jnp.dot(
        x_ref[...].astype(jnp.bfloat16),
        w_ref[...].astype(jnp.bfloat16),
        preferred_element_type=jnp.float32,
    )

    @pl.when(k == pl.num_programs(2) - 1)
    def _():
        y = acc_ref[...] + b_ref[...].astype(jnp.float32)
        if act == "gelu":       # exact erf-gelu (BERT)
            y = 0.5 * y * (1.0 + lax.erf(y * (1.0 / math.sqrt(2.0))))
        elif act == "relu":
            y = jnp.maximum(y, 0.0)
        if has_res:
            y = y + r_ref[...].astype(jnp.float32)
        o_ref[...] = y.astype(o_ref.dtype)


def linear(x, w, b, act="none", residual=None):
    """x: [M, K] fp32, w: [K, N] bf16, b: [N] fp32 -> [M, N] fp32 (+ optional residual)."""
    M, K = x.shape
    N = w.shape[1]
    tm = _pick(M, (256, 128, 64, 32, 16, 8))
    tn = _pick(N, (512, 256, 128))
    tk = _pick(K, (512, 256, 128))
    grid = (M // tm, N // tn, K // tk)

    in_specs = [
        pl.BlockSpec((tm, tk), lambda i, j, k: (i, k)),
        pl.BlockSpec((tk, tn), lambda i, j, k: (k, j)),
        pl.BlockSpec((1, tn), lambda i, j, k: (0, j)),
    ]
    args = [x, w, b.reshape(1, N)]
    if residual is not None:
        in_specs.append(pl.BlockSpec((tm, tn), lambda i, j, k: (i, j)))
        args.append(residual)

    return pl.pallas_call(
        functools.partial(_linear_kernel, act=act, has_res=residual is not None),
        grid=grid,
        in_specs=in_specs,
        out_specs=pl.BlockSpec((tm, tn), lambda i, j, k: (i, j)),
        out_shape=jax.ShapeDtypeStruct((M, N), jnp.float32),
        scratch_shapes=[pltpu.VMEM((tm, tn), jnp.float32)],
        compiler_params=pltpu.CompilerParams(
            dimension_semantics=("parallel", "parallel", "arbitrary")),
    )(*args)


def _layernorm_kernel(x_ref, g_ref, b_ref, o_ref, *, eps):
    x = x_ref[...].astype(jnp.float32)
    mu = jnp.mean(x, axis=-1, keepdims=True)
    var = jnp.mean((x - mu) * (x - mu), axis=-1, keepdims=True)
    y = (x - mu) * lax.rsqrt(var + eps)
    o_ref[...] = (y * g_ref[...] + b_ref[...]).astype(o_ref.dtype)


def layernorm(x, g, b, eps):
    """x: [M, H]; g, b: [H]. Tiled over M, parallel grid."""
    M, H = x.shape
    tm = _pick(M, (512, 256, 128, 64, 32, 16, 8))
    return pl.pallas_call(
        functools.partial(_layernorm_kernel, eps=eps),
        grid=(M // tm,),
        in_specs=[pl.BlockSpec((tm, H), lambda i: (i, 0)),
                  pl.BlockSpec((1, H), lambda i: (0, 0)),
                  pl.BlockSpec((1, H), lambda i: (0, 0))],
        out_specs=pl.BlockSpec((tm, H), lambda i: (i, 0)),
        out_shape=jax.ShapeDtypeStruct((M, H), x.dtype),
        compiler_params=pltpu.CompilerParams(dimension_semantics=("parallel",)),
    )(x, g.reshape(1, H), b.reshape(1, H))


def _attn_kernel(q_ref, k_ref, v_ref, o_ref, *, scale, causal):
    """All heads of one batch element per grid step; in-kernel causal bias."""
    q = q_ref[0]          # (nH, Sq, D) fp32
    k = k_ref[0]          # (nH, Sk, D)
    v = v_ref[0]          # (nH, Sk, D)

    s = jnp.einsum('hqd,hkd->hqk',
                   q.astype(jnp.bfloat16), k.astype(jnp.bfloat16),
                   preferred_element_type=jnp.float32) * scale
    if causal:
        row = lax.broadcasted_iota(jnp.int32, s.shape, 1)
        col = lax.broadcasted_iota(jnp.int32, s.shape, 2)
        s = jnp.where(row >= col, s, -1e9)

    m = jnp.max(s, axis=-1, keepdims=True)
    p = jnp.exp(s - m)
    denom = jnp.sum(p, axis=-1, keepdims=True)
    p = p * pl.reciprocal(denom, approx=True)

    ctx = jnp.einsum('hqk,hkd->hqd',
                     p.astype(jnp.bfloat16), v.astype(jnp.bfloat16),
                     preferred_element_type=jnp.float32)
    o_ref[0] = ctx.astype(o_ref.dtype)


def attention_core(q, k, v, *, scale, causal):
    """q: [B, nH, Sq, D], k/v: [B, nH, Sk, D] -> [B, nH, Sq, D]."""
    B, nH, Sq, D = q.shape
    Sk = k.shape[2]
    return pl.pallas_call(
        functools.partial(_attn_kernel, scale=scale, causal=causal),
        grid=(B,),
        in_specs=[pl.BlockSpec((1, nH, Sq, D), lambda b: (b, 0, 0, 0)),
                  pl.BlockSpec((1, nH, Sk, D), lambda b: (b, 0, 0, 0)),
                  pl.BlockSpec((1, nH, Sk, D), lambda b: (b, 0, 0, 0))],
        out_specs=pl.BlockSpec((1, nH, Sq, D), lambda b: (b, 0, 0, 0)),
        out_shape=jax.ShapeDtypeStruct((B, nH, Sq, D), q.dtype),
        compiler_params=pltpu.CompilerParams(dimension_semantics=("parallel",)),
    )(q, k, v)


def _adaptive_head_kernel(x_ref, w_ref, o_ref, *, n_valid):
    """Fused head matmul + log_softmax; padded columns masked out."""
    logits = jnp.dot(x_ref[...].astype(jnp.bfloat16),
                     w_ref[...].astype(jnp.bfloat16),
                     preferred_element_type=jnp.float32)
    col = lax.broadcasted_iota(jnp.int32, logits.shape, 1)
    logits = jnp.where(col < n_valid, logits, _NEG_BIG)
    m = jnp.max(logits, axis=-1, keepdims=True)
    z = logits - m
    lse = jnp.log(jnp.sum(jnp.exp(z), axis=-1, keepdims=True))
    o_ref[...] = (z - lse).astype(o_ref.dtype)


def adaptive_head_logprob(x, w_head, n_valid):
    M, H = x.shape
    Np = w_head.shape[1]
    tm = _pick(M, (256, 128, 64, 32, 16, 8))
    # TODO(synk): for very large heads tile N with a two-pass (max, sum) logsumexp.
    return pl.pallas_call(
        functools.partial(_adaptive_head_kernel, n_valid=n_valid),
        grid=(M // tm,),
        in_specs=[pl.BlockSpec((tm, H), lambda i: (i, 0)),
                  pl.BlockSpec((H, Np), lambda i: (0, 0))],
        out_specs=pl.BlockSpec((tm, Np), lambda i: (i, 0)),
        out_shape=jax.ShapeDtypeStruct((M, Np), jnp.float32),
        compiler_params=pltpu.CompilerParams(dimension_semantics=("parallel",)),
    )(x, w_head)


def _adaptive_tail_kernel(x_ref, wp_ref, wt_ref, cl_ref, o_ref, *, n_valid):
    """Fused tail: projection -> tail matmul -> log_softmax -> + cluster log-prob."""
    proj = jnp.dot(x_ref[...].astype(jnp.bfloat16),
                   wp_ref[...].astype(jnp.bfloat16),
                   preferred_element_type=jnp.float32)
    logits = jnp.dot(proj.astype(jnp.bfloat16),
                     wt_ref[...].astype(jnp.bfloat16),
                     preferred_element_type=jnp.float32)
    col = lax.broadcasted_iota(jnp.int32, logits.shape, 1)
    logits = jnp.where(col < n_valid, logits, _NEG_BIG)
    m = jnp.max(logits, axis=-1, keepdims=True)
    z = logits - m
    lse = jnp.log(jnp.sum(jnp.exp(z), axis=-1, keepdims=True))
    o_ref[...] = (z - lse + cl_ref[...].astype(jnp.float32)).astype(o_ref.dtype)


def adaptive_tail_logprob(x, w_proj, w_tail, cluster_lp, n_valid):
    M, H = x.shape
    P = w_proj.shape[1]
    Np = w_tail.shape[1]
    tm = _pick(M, (256, 128, 64, 32, 16, 8))
    return pl.pallas_call(
        functools.partial(_adaptive_tail_kernel, n_valid=n_valid),
        grid=(M // tm,),
        in_specs=[pl.BlockSpec((tm, H), lambda i: (i, 0)),
                  pl.BlockSpec((H, P), lambda i: (0, 0)),
                  pl.BlockSpec((P, Np), lambda i: (0, 0)),
                  pl.BlockSpec((tm, 1), lambda i: (i, 0))],
        out_specs=pl.BlockSpec((tm, Np), lambda i: (i, 0)),
        out_shape=jax.ShapeDtypeStruct((M, Np), jnp.float32),
        compiler_params=pltpu.CompilerParams(dimension_semantics=("parallel",)),
    )(x, w_proj, w_tail, cluster_lp)


# -----------------------------------------------------------------------------
# Model blocks (JAX glue calling the Pallas kernels)
# -----------------------------------------------------------------------------
def multi_head_attention(x_q, x_kv, p, num_heads, *, causal=False, cross=False,
                         residual=None):
    """Returns [B*Sq, H]; output projection fuses the optional residual add."""
    B, Sq, H = x_q.shape
    Sk = x_kv.shape[1]
    D = H // num_heads
    xq = x_q.reshape(B * Sq, H)
    xkv = x_kv.reshape(B * Sk, H)

    if cross:
        q = linear(xq, p["wq"], p["bq"])
        kv = linear(xkv, p["wkv"], p["bkv"])              # fused K|V
        k, v = kv[:, :H], kv[:, H:]
    else:
        qkv = linear(xq, p["wqkv"], p["bqkv"])            # fused Q|K|V
        q, k, v = qkv[:, :H], qkv[:, H:2 * H], qkv[:, 2 * H:]

    def split(t, S):
        return t.reshape(B, S, num_heads, D).transpose(0, 2, 1, 3)

    ctx = attention_core(split(q, Sq), split(k, Sk), split(v, Sk),
                         scale=1.0 / math.sqrt(D), causal=causal)
    ctx = ctx.transpose(0, 2, 1, 3).reshape(B * Sq, H)
    return linear(ctx, p["wo"], p["bo"], residual=residual)


def bert_layer(x, p, num_heads):
    """Post-LN BERT encoder layer (no attention mask: BertModel default = all ones)."""
    B, S, H = x.shape
    x_flat = x.reshape(B * S, H)
    attn = multi_head_attention(x, x, p["attn"], num_heads, residual=x_flat)
    h1 = layernorm(attn, p["ln1_g"], p["ln1_b"], eps=1e-12)
    inter = linear(h1, p["w_inter"], p["b_inter"], act="gelu")
    ffn = linear(inter, p["w_out"], p["b_out"], residual=h1)
    h2 = layernorm(ffn, p["ln2_g"], p["ln2_b"], eps=1e-12)
    return h2.reshape(B, S, H)


def decoder_layer(x, memory, p, num_heads):
    """Pre-LN decoder layer: masked self-attn, cross-attn, relu FFN; residuals fused."""
    B, S, H = x.shape
    x_flat = x.reshape(B * S, H)

    xn = layernorm(x_flat, p["ln1_g"], p["ln1_b"], eps=1e-6).reshape(B, S, H)
    x_flat = multi_head_attention(xn, xn, p["self_attn"], num_heads,
                                  causal=True, residual=x_flat)

    xn = layernorm(x_flat, p["ln2_g"], p["ln2_b"], eps=1e-6).reshape(B, S, H)
    x_flat = multi_head_attention(xn, memory, p["src_attn"], num_heads,
                                  cross=True, residual=x_flat)

    xn = layernorm(x_flat, p["ln3_g"], p["ln3_b"], eps=1e-6)
    ff = linear(linear(xn, p["w_ff1"], p["b_ff1"], act="relu"),
                p["w_ff2"], p["b_ff2"], residual=x_flat)
    return ff.reshape(B, S, H)


def adaptive_log_prob(h, p, cutoff, vocab):
    """nn.AdaptiveLogSoftmaxWithLoss.log_prob, cutoffs=[cutoff], div_value=4, no bias."""
    n_tail = vocab - cutoff
    head_lp = adaptive_head_logprob(h, p["w_head"], n_valid=cutoff + 1)
    cluster = head_lp[:, cutoff:cutoff + 1]
    tail_lp = adaptive_tail_logprob(h, p["w_proj"], p["w_tail"], cluster,
                                    n_valid=n_tail)
    return jnp.concatenate([head_lp[:, :cutoff], tail_lp[:, :n_tail]], axis=-1)


def transformer_no_embed_forward(params, x, tgt, *, num_heads, cutoff, vocab):
    B, S_dec, H = tgt.shape

    # encoder: take the last layer's hidden states.
    enc = x
    for p in params["encoder"]:
        enc = bert_layer(enc, p, num_heads)

    # decoder (causal self-attn mask generated inside the attention kernel).
    dec = tgt
    for p in params["decoder"]:
        dec = decoder_layer(dec, enc, p, num_heads)
    dec = layernorm(dec.reshape(B * S_dec, H),
                    params["dec_ln_g"], params["dec_ln_b"], eps=1e-6)

    # adaptive log-softmax over the whole vocabulary.
    return adaptive_log_prob(dec, params["adaptive"], cutoff, vocab)  # [B*S_dec, vocab]


# -----------------------------------------------------------------------------
# Deterministic parameter init (matmul weights stored bf16, everything else fp32)
# -----------------------------------------------------------------------------
class _Rng:
    def __init__(self, key):
        self.key = key

    def normal(self, shape, std=0.02, dtype=jnp.bfloat16):
        self.key, sub = jax.random.split(self.key)
        return (std * jax.random.normal(sub, shape, dtype=jnp.float32)).astype(dtype)


def _self_attn_params(rng, H):
    return {
        "wqkv": rng.normal((H, 3 * H)), "bqkv": jnp.zeros((3 * H,), jnp.float32),
        "wo": rng.normal((H, H)), "bo": jnp.zeros((H,), jnp.float32),
    }


def _cross_attn_params(rng, H):
    return {
        "wq": rng.normal((H, H)), "bq": jnp.zeros((H,), jnp.float32),
        "wkv": rng.normal((H, 2 * H)), "bkv": jnp.zeros((2 * H,), jnp.float32),
        "wo": rng.normal((H, H)), "bo": jnp.zeros((H,), jnp.float32),
    }


def init_params(key, vocab, hidden, enc_layers, dec_layers, *, enc_inter=3072,
                cutoff=1000):
    rng = _Rng(key)
    H = hidden
    dec_ff = 4 * H
    ones, zeros = jnp.ones((H,), jnp.float32), jnp.zeros((H,), jnp.float32)

    encoder = []
    for _ in range(enc_layers):
        encoder.append({
            "attn": _self_attn_params(rng, H),
            "ln1_g": ones, "ln1_b": zeros,
            "w_inter": rng.normal((H, enc_inter)),
            "b_inter": jnp.zeros((enc_inter,), jnp.float32),
            "w_out": rng.normal((enc_inter, H)), "b_out": zeros,
            "ln2_g": ones, "ln2_b": zeros,
        })

    decoder = []
    for _ in range(dec_layers):
        decoder.append({
            "self_attn": _self_attn_params(rng, H),
            "src_attn": _cross_attn_params(rng, H),
            "ln1_g": ones, "ln1_b": zeros,
            "ln2_g": ones, "ln2_b": zeros,
            "ln3_g": ones, "ln3_b": zeros,
            "w_ff1": rng.normal((H, dec_ff)),
            "b_ff1": jnp.zeros((dec_ff,), jnp.float32),
            "w_ff2": rng.normal((dec_ff, H)), "b_ff2": zeros,
        })

    # Adaptive softmax weights, zero-padded along N to multiples of 128 so the
    # fused kernels write lane-dense tiles; padded columns are masked in-kernel.
    n_head = cutoff + 1
    n_tail = vocab - cutoff
    proj_dim = H // 4                                   # div_value = 4.0
    w_head = rng.normal((H, n_head))
    w_tail = rng.normal((proj_dim, n_tail))
    w_head = jnp.pad(w_head, ((0, 0), (0, _pad128(n_head) - n_head)))
    w_tail = jnp.pad(w_tail, ((0, 0), (0, _pad128(n_tail) - n_tail)))
    adaptive = {
        "w_head": w_head,                               # [H, pad128(cutoff+1)]
        "w_proj": rng.normal((H, proj_dim)),            # [H, H//4]
        "w_tail": w_tail,                               # [H//4, pad128(vocab-cutoff)]
    }

    return {
        "encoder": encoder,
        "decoder": decoder,
        "dec_ln_g": ones, "dec_ln_b": zeros,
        "adaptive": adaptive,
    }


# -----------------------------------------------------------------------------
if __name__ == "__main__":
    VOCAB = 1500          # > 1000 so the cutoffs=[1000] adaptive structure is valid
    HIDDEN = 32
    ENC_LAYERS = 2
    DEC_LAYERS = 2
    HEADS = 8
    CUTOFF = 1000
    B, S_ENC, S_DEC = 2, 8, 8

    key = jax.random.PRNGKey(0)
    k_param, k_x, k_tgt = jax.random.split(key, 3)

    params = init_params(k_param, VOCAB, HIDDEN, ENC_LAYERS, DEC_LAYERS, cutoff=CUTOFF)

    # "NoEmbed": encoder/decoder inputs are already word vectors, shape [B, S, H].
    x = jax.random.normal(k_x, (B, S_ENC, HIDDEN), dtype=jnp.float32)
    tgt = jax.random.normal(k_tgt, (B, S_DEC, HIDDEN), dtype=jnp.float32)

    fwd = jax.jit(functools.partial(transformer_no_embed_forward,
                                    num_heads=HEADS, cutoff=CUTOFF, vocab=VOCAB))
    out = fwd(params, x, tgt)
    out = jax.block_until_ready(out)

    assert out.shape == (B * S_DEC, VOCAB), out.shape
    # log-probs must normalize to 1 over the vocab.
    row_sums = jnp.exp(jax.scipy.special.logsumexp(out, axis=-1))
    assert bool(jnp.all(jnp.abs(row_sums - 1.0) < 1e-3)), row_sums

    print("KERNEL_OK")
</pallas_src>

<mosaic_0001>
module attributes {stable_mosaic.version = 11 : i64} {
  func.func @_linear_kernel(%arg0: i32, %arg1: i32, %arg2: i32, %arg3: memref<16x32xf32, #tpu.memory_space<vmem>>, %arg4: memref<32x96xbf16, #tpu.memory_space<vmem>>, %arg5: memref<1x96xf32, #tpu.memory_space<vmem>>, %arg6: memref<16x96xf32, #tpu.memory_space<vmem>>, %arg7: memref<16x96xf32, #tpu.memory_space<vmem>>) attributes {dimension_semantics = [#tpu.dimension_semantics<parallel>, #tpu.dimension_semantics<parallel>, #tpu.dimension_semantics<arbitrary>], iteration_bounds = array<i64: 1, 1, 1>, scalar_prefetch = 0 : i64, scratch_operands = 1 : i64, tpu.core_type = #tpu.core_type<tc>, window_params = [{transform_indices = @transform_0, window_bounds = array<i64: 16, 32>}, {transform_indices = @transform_1, window_bounds = array<i64: 32, 96>}, {transform_indices = @transform_2, window_bounds = array<i64: 1, 96>}, {transform_indices = @transform_3, window_bounds = array<i64: 16, 96>}]} {
    %c0_i32 = arith.constant 0 : i32
    %0 = arith.cmpi eq, %arg2, %c0_i32 : i32
    %1 = arith.extui %0 : i1 to i32
    %c0_i32_0 = arith.constant 0 : i32
    %2 = arith.cmpi ne, %1, %c0_i32_0 : i32
    scf.if %2 {
      %cst_10 = arith.constant 0.000000e+00 : f32
      %13 = vector.broadcast %cst_10 : f32 to vector<16x96xf32>
      %c0_11 = arith.constant 0 : index
      %c0_12 = arith.constant 0 : index
      %14 = vector.load %arg7[%c0_11, %c0_12] : memref<16x96xf32, #tpu.memory_space<vmem>>, vector<16x96xf32>
      tpu.vector_store %arg7[%c0_11, %c0_12], %13 {strides = array<i32>} : memref<16x96xf32, #tpu.memory_space<vmem>>, vector<16x96xf32>,
    } else {
    }
    %c0 = arith.constant 0 : index
    %c0_1 = arith.constant 0 : index
    %3 = vector.load %arg7[%c0, %c0_1] : memref<16x96xf32, #tpu.memory_space<vmem>>, vector<16x96xf32>
    %c0_2 = arith.constant 0 : index
    %c0_3 = arith.constant 0 : index
    %4 = vector.load %arg3[%c0_2, %c0_3] : memref<16x32xf32, #tpu.memory_space<vmem>>, vector<16x32xf32>
    %5 = arith.truncf %4 : vector<16x32xf32> to vector<16x32xbf16>
    %c0_4 = arith.constant 0 : index
    %c0_5 = arith.constant 0 : index
    %6 = vector.load %arg4[%c0_4, %c0_5] : memref<32x96xbf16, #tpu.memory_space<vmem>>, vector<32x96xbf16>
    %cst = arith.constant dense<0.000000e+00> : vector<16x96xf32>
    %7 = tpu.matmul %5, %6, %cst {dimension_numbers = #tpu.dot_dimension_numbers<[1], [0], [0], [1], [0, 0, 1, 1], [], []>} : vector<16x32xbf16>, vector<32x96xbf16>, vector<16x96xf32> -> vector<16x96xf32>
    %8 = arith.addf %3, %7 : vector<16x96xf32>
    %c0_6 = arith.constant 0 : index
    %c0_7 = arith.constant 0 : index
    %9 = vector.load %arg7[%c0_6, %c0_7] : memref<16x96xf32, #tpu.memory_space<vmem>>, vector<16x96xf32>
    tpu.vector_store %arg7[%c0_6, %c0_7], %8 {strides = array<i32>} : memref<16x96xf32, #tpu.memory_space<vmem>>, vector<16x96xf32>,
    %c0_i32_8 = arith.constant 0 : i32
    %10 = arith.cmpi eq, %arg2, %c0_i32_8 : i32
    %11 = arith.extui %10 : i1 to i32
    %c0_i32_9 = arith.constant 0 : i32
    %12 = arith.cmpi ne, %11, %c0_i32_9 : i32
    scf.if %12 {
      %c0_10 = arith.constant 0 : index
      %c0_11 = arith.constant 0 : index
      %13 = vector.load %arg7[%c0_10, %c0_11] : memref<16x96xf32, #tpu.memory_space<vmem>>, vector<16x96xf32>
      %c0_12 = arith.constant 0 : index
      %c0_13 = arith.constant 0 : index
      %14 = vector.load %arg5[%c0_12, %c0_13] : memref<1x96xf32, #tpu.memory_space<vmem>>, vector<1x96xf32>
      %15 = vector.broadcast %14 : vector<1x96xf32> to vector<16x96xf32>
      %16 = arith.addf %13, %15 : vector<16x96xf32>
      %c0_14 = arith.constant 0 : index
      %c0_15 = arith.constant 0 : index
      %17 = vector.load %arg6[%c0_14, %c0_15] : memref<16x96xf32, #tpu.memory_space<vmem>>, vector<16x96xf32>
      tpu.vector_store %arg6[%c0_14, %c0_15], %16 {strides = array<i32>} : memref<16x96xf32, #tpu.memory_space<vmem>>, vector<16x96xf32>,
    } else {
    }
    return
  }
  func.func @transform_0(%arg0: i32, %arg1: i32, %arg2: i32) -> (i32, i32) {
    %c0_i32 = arith.constant 0 : i32
    return %arg0, %arg2 : i32, i32
  }
  func.func @transform_1(%arg0: i32, %arg1: i32, %arg2: i32) -> (i32, i32) {
    %c0_i32 = arith.constant 0 : i32
    return %arg2, %arg1 : i32, i32
  }
  func.func @transform_2(%arg0: i32, %arg1: i32, %arg2: i32) -> (i32, i32) {
    %c0_i32 = arith.constant 0 : i32
    %c0_i32_0 = arith.constant 0 : i32
    return %c0_i32, %arg1 : i32, i32
  }
  func.func @transform_3(%arg0: i32, %arg1: i32, %arg2: i32) -> (i32, i32) {
    %c0_i32 = arith.constant 0 : i32
    return %arg0, %arg1 : i32, i32
  }
}

module attributes {stable_mosaic.version = 11 : i64} {
  func.func @_attn_kernel(%arg0: i32, %arg1: memref<1x8x8x4xf32, #tpu.memory_space<vmem>>, %arg2: memref<1x8x8x4xf32, #tpu.memory_space<vmem>>, %arg3: memref<1x8x8x4xf32, #tpu.memory_space<vmem>>, %arg4: memref<1x8x8x4xf32, #tpu.memory_space<vmem>>) attributes {dimension_semantics = [#tpu.dimension_semantics<parallel>], iteration_bounds = array<i64: 2>, scalar_prefetch = 0 : i64, scratch_operands = 0 : i64, tpu.core_type = #tpu.core_type<tc>, window_params = [{transform_indices = @transform_0, window_bounds = array<i64: 1, 8, 8, 4>}, {transform_indices = @transform_1, window_bounds = array<i64: 1, 8, 8, 4>}, {transform_indices = @transform_2, window_bounds = array<i64: 1, 8, 8, 4>}, {transform_indices = @transform_3, window_bounds = array<i64: 1, 8, 8, 4>}]} {
    %c0 = arith.constant 0 : index
    %c0_0 = arith.constant 0 : index
    %c0_1 = arith.constant 0 : index
    %c0_2 = arith.constant 0 : index
    %0 = vector.load %arg1[%c0, %c0_0, %c0_1, %c0_2] : memref<1x8x8x4xf32, #tpu.memory_space<vmem>>, vector<1x8x8x4xf32>
    %1 = vector.shape_cast %0 : vector<1x8x8x4xf32> to vector<8x8x4xf32>
    %c0_3 = arith.constant 0 : index
    %c0_4 = arith.constant 0 : index
    %c0_5 = arith.constant 0 : index
    %c0_6 = arith.constant 0 : index
    %2 = vector.load %arg2[%c0_3, %c0_4, %c0_5, %c0_6] : memref<1x8x8x4xf32, #tpu.memory_space<vmem>>, vector<1x8x8x4xf32>
    %3 = vector.shape_cast %2 : vector<1x8x8x4xf32> to vector<8x8x4xf32>
    %c0_7 = arith.constant 0 : index
    %c0_8 = arith.constant 0 : index
    %c0_9 = arith.constant 0 : index
    %c0_10 = arith.constant 0 : index
    %4 = vector.load %arg3[%c0_7, %c0_8, %c0_9, %c0_10] : memref<1x8x8x4xf32, #tpu.memory_space<vmem>>, vector<1x8x8x4xf32>
    %5 = vector.shape_cast %4 : vector<1x8x8x4xf32> to vector<8x8x4xf32>
    %6 = arith.truncf %1 : vector<8x8x4xf32> to vector<8x8x4xbf16>
    %7 = arith.truncf %3 : vector<8x8x4xf32> to vector<8x8x4xbf16>
    "tpu.trace_start"() <{level = 10 : i32, message = "hqd,hkd->hqk"}> : () -> ()
    %cst = arith.constant dense<0.000000e+00> : vector<8x8x8xf32>
    %8 = tpu.matmul %6, %7, %cst {dimension_numbers = #tpu.dot_dimension_numbers<[2], [2], [1], [1], [0, 0, 0, 1, 1, 1], [0], [0]>} : vector<8x8x4xbf16>, vector<8x8x4xbf16>, vector<8x8x8xf32> -> vector<8x8x8xf32>
    "tpu.trace_stop"() : () -> ()
    %cst_11 = arith.constant 5.000000e-01 : f32
    %9 = vector.broadcast %cst_11 : f32 to vector<8x8x8xf32>
    %10 = arith.mulf %8, %9 : vector<8x8x8xf32>
    %cst_12 = arith.constant dense<0xFF800000> : vector<8x8xf32>
    %11 = vector.multi_reduction <maximumf>, %10, %cst_12 [2] : vector<8x8x8xf32> to vector<8x8xf32>
    %12 = vector.shape_cast %11 : vector<8x8xf32> to vector<8x8x1xf32>
    %13 = vector.broadcast %12 : vector<8x8x1xf32> to vector<8x8x8xf32>
    %14 = arith.subf %10, %13 : vector<8x8x8xf32>
    %15 = math.exp %14 : vector<8x8x8xf32>
    %cst_13 = arith.constant dense<0.000000e+00> : vector<8x8xf32>
    %16 = vector.multi_reduction <add>, %15, %cst_13 [2] : vector<8x8x8xf32> to vector<8x8xf32>
    %17 = vector.shape_cast %16 : vector<8x8xf32> to vector<8x8x1xf32>
    %18 = tpu.reciprocal %17 {approx = true} : vector<8x8x1xf32> -> vector<8x8x1xf32>
    %19 = vector.broadcast %18 : vector<8x8x1xf32> to vector<8x8x8xf32>
    %20 = arith.mulf %15, %19 : vector<8x8x8xf32>
    %21 = arith.truncf %20 : vector<8x8x8xf32> to vector<8x8x8xbf16>
    %22 = arith.truncf %5 : vector<8x8x4xf32> to vector<8x8x4xbf16>
    "tpu.trace_start"() <{level = 10 : i32, message = "hqk,hkd->hqd"}> : () -> ()
    %cst_14 = arith.constant dense<0.000000e+00> : vector<8x8x4xf32>
    %23 = tpu.matmul %21, %22, %cst_14 {dimension_numbers = #tpu.dot_dimension_numbers<[2], [1], [1], [2], [0, 0, 0, 1, 1, 2], [0], [0]>} : vector<8x8x8xbf16>, vector<8x8x4xbf16>, vector<8x8x4xf32> -> vector<8x8x4xf32>
    "tpu.trace_stop"() : () -> ()
    %c0_15 = arith.constant 0 : index
    %c0_16 = arith.constant 0 : index
    %c0_17 = arith.constant 0 : index
    %c0_18 = arith.constant 0 : index
    %24 = vector.load %arg4[%c0_15, %c0_16, %c0_17, %c0_18] : memref<1x8x8x4xf32, #tpu.memory_space<vmem>>, vector<1x8x8x4xf32>
    %25 = vector.shape_cast %24 : vector<1x8x8x4xf32> to vector<8x8x4xf32>
    %26 = vector.shape_cast %23 : vector<8x8x4xf32> to vector<1x8x8x4xf32>
    tpu.vector_store %arg4[%c0_15, %c0_16, %c0_17, %c0_18], %26 {strides = array<i32>} : memref<1x8x8x4xf32, #tpu.memory_space<vmem>>, vector<1x8x8x4xf32>,
    return
  }
  func.func @transform_0(%arg0: i32) -> (i32, i32, i32, i32) {
    %c0_i32 = arith.constant 0 : i32
    %c0_i32_0 = arith.constant 0 : i32
    %c0_i32_1 = arith.constant 0 : i32
    %c0_i32_2 = arith.constant 0 : i32
    return %arg0, %c0_i32, %c0_i32_0, %c0_i32_1 : i32, i32, i32, i32
  }
  func.func @transform_1(%arg0: i32) -> (i32, i32, i32, i32) {
    %c0_i32 = arith.constant 0 : i32
    %c0_i32_0 = arith.constant 0 : i32
    %c0_i32_1 = arith.constant 0 : i32
    %c0_i32_2 = arith.constant 0 : i32
    return %arg0, %c0_i32, %c0_i32_0, %c0_i32_1 : i32, i32, i32, i32
  }
  func.func @transform_2(%arg0: i32) -> (i32, i32, i32, i32) {
    %c0_i32 = arith.constant 0 : i32
    %c0_i32_0 = arith.constant 0 : i32
    %c0_i32_1 = arith.constant 0 : i32
    %c0_i32_2 = arith.constant 0 : i32
    return %arg0, %c0_i32, %c0_i32_0, %c0_i32_1 : i32, i32, i32, i32
  }
  func.func @transform_3(%arg0: i32) -> (i32, i32, i32, i32) {
    %c0_i32 = arith.constant 0 : i32
    %c0_i32_0 = arith.constant 0 : i32
    %c0_i32_1 = arith.constant 0 : i32
    %c0_i32_2 = arith.constant 0 : i32
    return %arg0, %c0_i32, %c0_i32_0, %c0_i32_1 : i32, i32, i32, i32
  }
}

module attributes {stable_mosaic.version = 11 : i64} {
  func.func @_linear_kernel(%arg0: i32, %arg1: i32, %arg2: i32, %arg3: memref<16x32xf32, #tpu.memory_space<vmem>>, %arg4: memref<32x32xbf16, #tpu.memory_space<vmem>>, %arg5: memref<1x32xf32, #tpu.memory_space<vmem>>, %arg6: memref<16x32xf32, #tpu.memory_space<vmem>>, %arg7: memref<16x32xf32, #tpu.memory_space<vmem>>, %arg8: memref<16x32xf32, #tpu.memory_space<vmem>>) attributes {dimension_semantics = [#tpu.dimension_semantics<parallel>, #tpu.dimension_semantics<parallel>, #tpu.dimension_semantics<arbitrary>], iteration_bounds = array<i64: 1, 1, 1>, scalar_prefetch = 0 : i64, scratch_operands = 1 : i64, tpu.core_type = #tpu.core_type<tc>, window_params = [{transform_indices = @transform_0, window_bounds = array<i64: 16, 32>}, {transform_indices = @transform_1, window_bounds = array<i64: 32, 32>}, {transform_indices = @transform_2, window_bounds = array<i64: 1, 32>}, {transform_indices = @transform_3, window_bounds = array<i64: 16, 32>}, {transform_indices = @transform_4, window_bounds = array<i64: 16, 32>}]} {
    %c0_i32 = arith.constant 0 : i32
    %0 = arith.cmpi eq, %arg2, %c0_i32 : i32
    %1 = arith.extui %0 : i1 to i32
    %c0_i32_0 = arith.constant 0 : i32
    %2 = arith.cmpi ne, %1, %c0_i32_0 : i32
    scf.if %2 {
      %cst_10 = arith.constant 0.000000e+00 : f32
      %13 = vector.broadcast %cst_10 : f32 to vector<16x32xf32>
      %c0_11 = arith.constant 0 : index
      %c0_12 = arith.constant 0 : index
      %14 = vector.load %arg8[%c0_11, %c0_12] : memref<16x32xf32, #tpu.memory_space<vmem>>, vector<16x32xf32>
      tpu.vector_store %arg8[%c0_11, %c0_12], %13 {strides = array<i32>} : memref<16x32xf32, #tpu.memory_space<vmem>>, vector<16x32xf32>,
    } else {
    }
    %c0 = arith.constant 0 : index
    %c0_1 = arith.constant 0 : index
    %3 = vector.load %arg8[%c0, %c0_1] : memref<16x32xf32, #tpu.memory_space<vmem>>, vector<16x32xf32>
    %c0_2 = arith.constant 0 : index
    %c0_3 = arith.constant 0 : index
    %4 = vector.load %arg3[%c0_2, %c0_3] : memref<16x32xf32, #tpu.memory_space<vmem>>, vector<16x32xf32>
    %5 = arith.truncf %4 : vector<16x32xf32> to vector<16x32xbf16>
    %c0_4 = arith.constant 0 : index
    %c0_5 = arith.constant 0 : index
    %6 = vector.load %arg4[%c0_4, %c0_5] : memref<32x32xbf16, #tpu.memory_space<vmem>>, vector<32x32xbf16>
    %cst = arith.constant dense<0.000000e+00> : vector<16x32xf32>
    %7 = tpu.matmul %5, %6, %cst {dimension_numbers = #tpu.dot_dimension_numbers<[1], [0], [0], [1], [0, 0, 1, 1], [], []>} : vector<16x32xbf16>, vector<32x32xbf16>, vector<16x32xf32> -> vector<16x32xf32>
    %8 = arith.addf %3, %7 : vector<16x32xf32>
    %c0_6 = arith.constant 0 : index
    %c0_7 = arith.constant 0 : index
    %9 = vector.load %arg8[%c0_6, %c0_7] : memref<16x32xf32, #tpu.memory_space<vmem>>, vector<16x32xf32>
    tpu.vector_store %arg8[%c0_6, %c0_7], %8 {strides = array<i32>} : memref<16x32xf32, #tpu.memory_space<vmem>>, vector<16x32xf32>,
    %c0_i32_8 = arith.constant 0 : i32
    %10 = arith.cmpi eq, %arg2, %c0_i32_8 : i32
    %11 = arith.extui %10 : i1 to i32
    %c0_i32_9 = arith.constant 0 : i32
    %12 = arith.cmpi ne, %11, %c0_i32_9 : i32
    scf.if %12 {
      %c0_10 = arith.constant 0 : index
      %c0_11 = arith.constant 0 : index
      %13 = vector.load %arg8[%c0_10, %c0_11] : memref<16x32xf32, #tpu.memory_space<vmem>>, vector<16x32xf32>
      %c0_12 = arith.constant 0 : index
      %c0_13 = arith.constant 0 : index
      %14 = vector.load %arg5[%c0_12, %c0_13] : memref<1x32xf32, #tpu.memory_space<vmem>>, vector<1x32xf32>
      %15 = vector.broadcast %14 : vector<1x32xf32> to vector<16x32xf32>
      %16 = arith.addf %13, %15 : vector<16x32xf32>
      %c0_14 = arith.constant 0 : index
      %c0_15 = arith.constant 0 : index
      %17 = vector.load %arg6[%c0_14, %c0_15] : memref<16x32xf32, #tpu.memory_space<vmem>>, vector<16x32xf32>
      %18 = arith.addf %16, %17 : vector<16x32xf32>
      %c0_16 = arith.constant 0 : index
      %c0_17 = arith.constant 0 : index
      %19 = vector.load %arg7[%c0_16, %c0_17] : memref<16x32xf32, #tpu.memory_space<vmem>>, vector<16x32xf32>
      tpu.vector_store %arg7[%c0_16, %c0_17], %18 {strides = array<i32>} : memref<16x32xf32, #tpu.memory_space<vmem>>, vector<16x32xf32>,
    } else {
    }
    return
  }
  func.func @transform_0(%arg0: i32, %arg1: i32, %arg2: i32) -> (i32, i32) {
    %c0_i32 = arith.constant 0 : i32
    return %arg0, %arg2 : i32, i32
  }
  func.func @transform_1(%arg0: i32, %arg1: i32, %arg2: i32) -> (i32, i32) {
    %c0_i32 = arith.constant 0 : i32
    return %arg2, %arg1 : i32, i32
  }
  func.func @transform_2(%arg0: i32, %arg1: i32, %arg2: i32) -> (i32, i32) {
    %c0_i32 = arith.constant 0 : i32
    %c0_i32_0 = arith.constant 0 : i32
    return %c0_i32, %arg1 : i32, i32
  }
  func.func @transform_3(%arg0: i32, %arg1: i32, %arg2: i32) -> (i32, i32) {
    %c0_i32 = arith.constant 0 : i32
    return %arg0, %arg1 : i32, i32
  }
  func.func @transform_4(%arg0: i32, %arg1: i32, %arg2: i32) -> (i32, i32) {
    %c0_i32 = arith.constant 0 : i32
    return %arg0, %arg1 : i32, i32
  }
}

module attributes {stable_mosaic.version = 11 : i64} {
  func.func @_layernorm_kernel(%arg0: i32, %arg1: memref<16x32xf32, #tpu.memory_space<vmem>>, %arg2: memref<1x32xf32, #tpu.memory_space<vmem>>, %arg3: memref<1x32xf32, #tpu.memory_space<vmem>>, %arg4: memref<16x32xf32, #tpu.memory_space<vmem>>) attributes {dimension_semantics = [#tpu.dimension_semantics<parallel>], iteration_bounds = array<i64: 1>, scalar_prefetch = 0 : i64, scratch_operands = 0 : i64, tpu.core_type = #tpu.core_type<tc>, window_params = [{transform_indices = @transform_0, window_bounds = array<i64: 16, 32>}, {pipeline_mode = #tpu.pipeline_mode<synchronous>, transform_indices = @transform_1, window_bounds = array<i64: 1, 32>}, {pipeline_mode = #tpu.pipeline_mode<synchronous>, transform_indices = @transform_2, window_bounds = array<i64: 1, 32>}, {transform_indices = @transform_3, window_bounds = array<i64: 16, 32>}]} {
    %c0 = arith.constant 0 : index
    %c0_0 = arith.constant 0 : index
    %0 = vector.load %arg1[%c0, %c0_0] : memref<16x32xf32, #tpu.memory_space<vmem>>, vector<16x32xf32>
    %cst = arith.constant dense<0.000000e+00> : vector<16xf32>
    %1 = vector.multi_reduction <add>, %0, %cst [1] : vector<16x32xf32> to vector<16xf32>
    %2 = vector.shape_cast %1 : vector<16xf32> to vector<16x1xf32>
    %cst_1 = arith.constant 3.200000e+01 : f32
    %3 = vector.broadcast %cst_1 : f32 to vector<16x1xf32>
    %4 = arith.divf %2, %3 : vector<16x1xf32>
    %5 = vector.broadcast %4 : vector<16x1xf32> to vector<16x32xf32>
    %6 = arith.subf %0, %5 : vector<16x32xf32>
    %7 = vector.broadcast %4 : vector<16x1xf32> to vector<16x32xf32>
    %8 = arith.subf %0, %7 : vector<16x32xf32>
    %9 = arith.mulf %6, %8 : vector<16x32xf32>
    %cst_2 = arith.constant dense<0.000000e+00> : vector<16xf32>
    %10 = vector.multi_reduction <add>, %9, %cst_2 [1] : vector<16x32xf32> to vector<16xf32>
    %11 = vector.shape_cast %10 : vector<16xf32> to vector<16x1xf32>
    %cst_3 = arith.constant 3.200000e+01 : f32
    %12 = vector.broadcast %cst_3 : f32 to vector<16x1xf32>
    %13 = arith.divf %11, %12 : vector<16x1xf32>
    %14 = vector.broadcast %4 : vector<16x1xf32> to vector<16x32xf32>
    %15 = arith.subf %0, %14 : vector<16x32xf32>
    %cst_4 = arith.constant 9.99999996E-13 : f32
    %16 = vector.broadcast %cst_4 : f32 to vector<16x1xf32>
    %17 = arith.addf %13, %16 : vector<16x1xf32>
    %18 = math.rsqrt %17 : vector<16x1xf32>
    %19 = vector.broadcast %18 : vector<16x1xf32> to vector<16x32xf32>
    %20 = arith.mulf %15, %19 : vector<16x32xf32>
    %c0_5 = arith.constant 0 : index
    %c0_6 = arith.constant 0 : index
    %21 = vector.load %arg2[%c0_5, %c0_6] : memref<1x32xf32, #tpu.memory_space<vmem>>, vector<1x32xf32>
    %22 = vector.broadcast %21 : vector<1x32xf32> to vector<16x32xf32>
    %23 = arith.mulf %20, %22 : vector<16x32xf32>
    %c0_7 = arith.constant 0 : index
    %c0_8 = arith.constant 0 : index
    %24 = vector.load %arg3[%c0_7, %c0_8] : memref<1x32xf32, #tpu.memory_space<vmem>>, vector<1x32xf32>
    %25 = vector.broadcast %24 : vector<1x32xf32> to vector<16x32xf32>
    %26 = arith.addf %23, %25 : vector<16x32xf32>
    %c0_9 = arith.constant 0 : index
    %c0_10 = arith.constant 0 : index
    %27 = vector.load %arg4[%c0_9, %c0_10] : memref<16x32xf32, #tpu.memory_space<vmem>>, vector<16x32xf32>
    tpu.vector_store %arg4[%c0_9, %c0_10], %26 {strides = array<i32>} : memref<16x32xf32, #tpu.memory_space<vmem>>, vector<16x32xf32>,
    return
  }
  func.func @transform_0(%arg0: i32) -> (i32, i32) {
    %c0_i32 = arith.constant 0 : i32
    %c0_i32_0 = arith.constant 0 : i32
    return %arg0, %c0_i32 : i32, i32
  }
  func.func @transform_1(%arg0: i32) -> (i32, i32) {
    %c0_i32 = arith.constant 0 : i32
    %c0_i32_0 = arith.constant 0 : i32
    %c0_i32_1 = arith.constant 0 : i32
    return %c0_i32, %c0_i32_0 : i32, i32
  }
  func.func @transform_2(%arg0: i32) -> (i32, i32) {
    %c0_i32 = arith.constant 0 : i32
    %c0_i32_0 = arith.constant 0 : i32
    %c0_i32_1 = arith.constant 0 : i32
    return %c0_i32, %c0_i32_0 : i32, i32
  }
  func.func @transform_3(%arg0: i32) -> (i32, i32) {
    %c0_i32 = arith.constant 0 : i32
    %c0_i32_0 = arith.constant 0 : i32
    return %arg0, %c0_i32 : i32, i32
  }
}

module attributes {stable_mosaic.version = 11 : i64} {
  func.func @_linear_kernel(%arg0: i32, %arg1: i32, %arg2: i32, %arg3: memref<16x32xf32, #tpu.memory_space<vmem>>, %arg4: memref<32x512xbf16, #tpu.memory_space<vmem>>, %arg5: memref<1x512xf32, #tpu.memory_space<vmem>>, %arg6: memref<16x512xf32, #tpu.memory_space<vmem>>, %arg7: memref<16x512xf32, #tpu.memory_space<vmem>>) attributes {dimension_semantics = [#tpu.dimension_semantics<parallel>, #tpu.dimension_semantics<parallel>, #tpu.dimension_semantics<arbitrary>], iteration_bounds = array<i64: 1, 6, 1>, scalar_prefetch = 0 : i64, scratch_operands = 1 : i64, tpu.core_type = #tpu.core_type<tc>, window_params = [{transform_indices = @transform_0, window_bounds = array<i64: 16, 32>}, {transform_indices = @transform_1, window_bounds = array<i64: 32, 512>}, {transform_indices = @transform_2, window_bounds = array<i64: 1, 512>}, {transform_indices = @transform_3, window_bounds = array<i64: 16, 512>}]} {
    %c0_i32 = arith.constant 0 : i32
    %0 = arith.cmpi eq, %arg2, %c0_i32 : i32
    %1 = arith.extui %0 : i1 to i32
    %c0_i32_0 = arith.constant 0 : i32
    %2 = arith.cmpi ne, %1, %c0_i32_0 : i32
    scf.if %2 {
      %cst_10 = arith.constant 0.000000e+00 : f32
      %13 = vector.broadcast %cst_10 : f32 to vector<16x512xf32>
      %c0_11 = arith.constant 0 : index
      %c0_12 = arith.constant 0 : index
      %14 = vector.load %arg7[%c0_11, %c0_12] : memref<16x512xf32, #tpu.memory_space<vmem>>, vector<16x512xf32>
      tpu.vector_store %arg7[%c0_11, %c0_12], %13 {strides = array<i32>} : memref<16x512xf32, #tpu.memory_space<vmem>>, vector<16x512xf32>,
    } else {
    }
    %c0 = arith.constant 0 : index
    %c0_1 = arith.constant 0 : index
    %3 = vector.load %arg7[%c0, %c0_1] : memref<16x512xf32, #tpu.memory_space<vmem>>, vector<16x512xf32>
    %c0_2 = arith.constant 0 : index
    %c0_3 = arith.constant 0 : index
    %4 = vector.load %arg3[%c0_2, %c0_3] : memref<16x32xf32, #tpu.memory_space<vmem>>, vector<16x32xf32>
    %5 = arith.truncf %4 : vector<16x32xf32> to vector<16x32xbf16>
    %c0_4 = arith.constant 0 : index
    %c0_5 = arith.constant 0 : index
    %6 = vector.load %arg4[%c0_4, %c0_5] : memref<32x512xbf16, #tpu.memory_space<vmem>>, vector<32x512xbf16>
    %cst = arith.constant dense<0.000000e+00> : vector<16x512xf32>
    %7 = tpu.matmul %5, %6, %cst {dimension_numbers = #tpu.dot_dimension_numbers<[1], [0], [0], [1], [0, 0, 1, 1], [], []>} : vector<16x32xbf16>, vector<32x512xbf16>, vector<16x512xf32> -> vector<16x512xf32>
    %8 = arith.addf %3, %7 : vector<16x512xf32>
    %c0_6 = arith.constant 0 : index
    %c0_7 = arith.constant 0 : index
    %9 = vector.load %arg7[%c0_6, %c0_7] : memref<16x512xf32, #tpu.memory_space<vmem>>, vector<16x512xf32>
    tpu.vector_store %arg7[%c0_6, %c0_7], %8 {strides = array<i32>} : memref<16x512xf32, #tpu.memory_space<vmem>>, vector<16x512xf32>,
    %c0_i32_8 = arith.constant 0 : i32
    %10 = arith.cmpi eq, %arg2, %c0_i32_8 : i32
    %11 = arith.extui %10 : i1 to i32
    %c0_i32_9 = arith.constant 0 : i32
    %12 = arith.cmpi ne, %11, %c0_i32_9 : i32
    scf.if %12 {
      %c0_10 = arith.constant 0 : index
      %c0_11 = arith.constant 0 : index
      %13 = vector.load %arg7[%c0_10, %c0_11] : memref<16x512xf32, #tpu.memory_space<vmem>>, vector<16x512xf32>
      %c0_12 = arith.constant 0 : index
      %c0_13 = arith.constant 0 : index
      %14 = vector.load %arg5[%c0_12, %c0_13] : memref<1x512xf32, #tpu.memory_space<vmem>>, vector<1x512xf32>
      %15 = vector.broadcast %14 : vector<1x512xf32> to vector<16x512xf32>
      %16 = arith.addf %13, %15 : vector<16x512xf32>
      %cst_14 = arith.constant 5.000000e-01 : f32
      %17 = vector.broadcast %cst_14 : f32 to vector<16x512xf32>
      %18 = arith.mulf %17, %16 : vector<16x512xf32>
      %cst_15 = arith.constant 0.707106769 : f32
      %19 = vector.broadcast %cst_15 : f32 to vector<16x512xf32>
      %20 = arith.mulf %16, %19 : vector<16x512xf32>
      %21 = math.erf %20 : vector<16x512xf32>
      %cst_16 = arith.constant 1.000000e+00 : f32
      %22 = vector.broadcast %cst_16 : f32 to vector<16x512xf32>
      %23 = arith.addf %22, %21 : vector<16x512xf32>
      %24 = arith.mulf %18, %23 : vector<16x512xf32>
      %c0_17 = arith.constant 0 : index
      %c0_18 = arith.constant 0 : index
      %25 = vector.load %arg6[%c0_17, %c0_18] : memref<16x512xf32, #tpu.memory_space<vmem>>, vector<16x512xf32>
      tpu.vector_store %arg6[%c0_17, %c0_18], %24 {strides = array<i32>} : memref<16x512xf32, #tpu.memory_space<vmem>>, vector<16x512xf32>,
    } else {
    }
    return
  }
  func.func @transform_0(%arg0: i32, %arg1: i32, %arg2: i32) -> (i32, i32) {
    %c0_i32 = arith.constant 0 : i32
    return %arg0, %arg2 : i32, i32
  }
  func.func @transform_1(%arg0: i32, %arg1: i32, %arg2: i32) -> (i32, i32) {
    %c0_i32 = arith.constant 0 : i32
    return %arg2, %arg1 : i32, i32
  }
  func.func @transform_2(%arg0: i32, %arg1: i32, %arg2: i32) -> (i32, i32) {
    %c0_i32 = arith.constant 0 : i32
    %c0_i32_0 = arith.constant 0 : i32
    return %c0_i32, %arg1 : i32, i32
  }
  func.func @transform_3(%arg0: i32, %arg1: i32, %arg2: i32) -> (i32, i32) {
    %c0_i32 = arith.constant 0 : i32
    return %arg0, %arg1 : i32, i32
  }
}

module attributes {stable_mosaic.version = 11 : i64} {
  func.func @_linear_kernel(%arg0: i32, %arg1: i32, %arg2: i32, %arg3: memref<16x512xf32, #tpu.memory_space<vmem>>, %arg4: memref<512x32xbf16, #tpu.memory_space<vmem>>, %arg5: memref<1x32xf32, #tpu.memory_space<vmem>>, %arg6: memref<16x32xf32, #tpu.memory_space<vmem>>, %arg7: memref<16x32xf32, #tpu.memory_space<vmem>>, %arg8: memref<16x32xf32, #tpu.memory_space<vmem>>) attributes {dimension_semantics = [#tpu.dimension_semantics<parallel>, #tpu.dimension_semantics<parallel>, #tpu.dimension_semantics<arbitrary>], iteration_bounds = array<i64: 1, 1, 6>, scalar_prefetch = 0 : i64, scratch_operands = 1 : i64, tpu.core_type = #tpu.core_type<tc>, window_params = [{transform_indices = @transform_0, window_bounds = array<i64: 16, 512>}, {transform_indices = @transform_1, window_bounds = array<i64: 512, 32>}, {transform_indices = @transform_2, window_bounds = array<i64: 1, 32>}, {transform_indices = @transform_3, window_bounds = array<i64: 16, 32>}, {transform_indices = @transform_4, window_bounds = array<i64: 16, 32>}]} {
    %c0_i32 = arith.constant 0 : i32
    %0 = arith.cmpi eq, %arg2, %c0_i32 : i32
    %1 = arith.extui %0 : i1 to i32
    %c0_i32_0 = arith.constant 0 : i32
    %2 = arith.cmpi ne, %1, %c0_i32_0 : i32
    scf.if %2 {
      %cst_9 = arith.constant 0.000000e+00 : f32
      %13 = vector.broadcast %cst_9 : f32 to vector<16x32xf32>
      %c0_10 = arith.constant 0 : index
      %c0_11 = arith.constant 0 : index
      %14 = vector.load %arg8[%c0_10, %c0_11] : memref<16x32xf32, #tpu.memory_space<vmem>>, vector<16x32xf32>
      tpu.vector_store %arg8[%c0_10, %c0_11], %13 {strides = array<i32>} : memref<16x32xf32, #tpu.memory_space<vmem>>, vector<16x32xf32>,
    } else {
    }
    %c0 = arith.constant 0 : index
    %c0_1 = arith.constant 0 : index
    %3 = vector.load %arg8[%c0, %c0_1] : memref<16x32xf32, #tpu.memory_space<vmem>>, vector<16x32xf32>
    %c0_2 = arith.constant 0 : index
    %c0_3 = arith.constant 0 : index
    %4 = vector.load %arg3[%c0_2, %c0_3] : memref<16x512xf32, #tpu.memory_space<vmem>>, vector<16x512xf32>
    %5 = arith.truncf %4 : vector<16x512xf32> to vector<16x512xbf16>
    %c0_4 = arith.constant 0 : index
    %c0_5 = arith.constant 0 : index
    %6 = vector.load %arg4[%c0_4, %c0_5] : memref<512x32xbf16, #tpu.memory_space<vmem>>, vector<512x32xbf16>
    %cst = arith.constant dense<0.000000e+00> : vector<16x32xf32>
    %7 = tpu.matmul %5, %6, %cst {dimension_numbers = #tpu.dot_dimension_numbers<[1], [0], [0], [1], [0, 0, 1, 1], [], []>} : vector<16x512xbf16>, vector<512x32xbf16>, vector<16x32xf32> -> vector<16x32xf32>
    %8 = arith.addf %3, %7 : vector<16x32xf32>
    %c0_6 = arith.constant 0 : index
    %c0_7 = arith.constant 0 : index
    %9 = vector.load %arg8[%c0_6, %c0_7] : memref<16x32xf32, #tpu.memory_space<vmem>>, vector<16x32xf32>
    tpu.vector_store %arg8[%c0_6, %c0_7], %8 {strides = array<i32>} : memref<16x32xf32, #tpu.memory_space<vmem>>, vector<16x32xf32>,
    %c5_i32 = arith.constant 5 : i32
    %10 = arith.cmpi eq, %arg2, %c5_i32 : i32
    %11 = arith.extui %10 : i1 to i32
    %c0_i32_8 = arith.constant 0 : i32
    %12 = arith.cmpi ne, %11, %c0_i32_8 : i32
    scf.if %12 {
      %c0_9 = arith.constant 0 : index
      %c0_10 = arith.constant 0 : index
      %13 = vector.load %arg8[%c0_9, %c0_10] : memref<16x32xf32, #tpu.memory_space<vmem>>, vector<16x32xf32>
      %c0_11 = arith.constant 0 : index
      %c0_12 = arith.constant 0 : index
      %14 = vector.load %arg5[%c0_11, %c0_12] : memref<1x32xf32, #tpu.memory_space<vmem>>, vector<1x32xf32>
      %15 = vector.broadcast %14 : vector<1x32xf32> to vector<16x32xf32>
      %16 = arith.addf %13, %15 : vector<16x32xf32>
      %c0_13 = arith.constant 0 : index
      %c0_14 = arith.constant 0 : index
      %17 = vector.load %arg6[%c0_13, %c0_14] : memref<16x32xf32, #tpu.memory_space<vmem>>, vector<16x32xf32>
      %18 = arith.addf %16, %17 : vector<16x32xf32>
      %c0_15 = arith.constant 0 : index
      %c0_16 = arith.constant 0 : index
      %19 = vector.load %arg7[%c0_15, %c0_16] : memref<16x32xf32, #tpu.memory_space<vmem>>, vector<16x32xf32>
      tpu.vector_store %arg7[%c0_15, %c0_16], %18 {strides = array<i32>} : memref<16x32xf32, #tpu.memory_space<vmem>>, vector<16x32xf32>,
    } else {
    }
    return
  }
  func.func @transform_0(%arg0: i32, %arg1: i32, %arg2: i32) -> (i32, i32) {
    %c0_i32 = arith.constant 0 : i32
    return %arg0, %arg2 : i32, i32
  }
  func.func @transform_1(%arg0: i32, %arg1: i32, %arg2: i32) -> (i32, i32) {
    %c0_i32 = arith.constant 0 : i32
    return %arg2, %arg1 : i32, i32
  }
  func.func @transform_2(%arg0: i32, %arg1: i32, %arg2: i32) -> (i32, i32) {
    %c0_i32 = arith.constant 0 : i32
    %c0_i32_0 = arith.constant 0 : i32
    return %c0_i32, %arg1 : i32, i32
  }
  func.func @transform_3(%arg0: i32, %arg1: i32, %arg2: i32) -> (i32, i32) {
    %c0_i32 = arith.constant 0 : i32
    return %arg0, %arg1 : i32, i32
  }
  func.func @transform_4(%arg0: i32, %arg1: i32, %arg2: i32) -> (i32, i32) {
    %c0_i32 = arith.constant 0 : i32
    return %arg0, %arg1 : i32, i32
  }
}

module attributes {stable_mosaic.version = 11 : i64} {
  func.func @_linear_kernel(%arg0: i32, %arg1: i32, %arg2: i32, %arg3: memref<16x32xf32, #tpu.memory_space<vmem>>, %arg4: memref<32x64xbf16, #tpu.memory_space<vmem>>, %arg5: memref<1x64xf32, #tpu.memory_space<vmem>>, %arg6: memref<16x64xf32, #tpu.memory_space<vmem>>, %arg7: memref<16x64xf32, #tpu.memory_space<vmem>>) attributes {dimension_semantics = [#tpu.dimension_semantics<parallel>, #tpu.dimension_semantics<parallel>, #tpu.dimension_semantics<arbitrary>], iteration_bounds = array<i64: 1, 1, 1>, scalar_prefetch = 0 : i64, scratch_operands = 1 : i64, tpu.core_type = #tpu.core_type<tc>, window_params = [{transform_indices = @transform_0, window_bounds = array<i64: 16, 32>}, {transform_indices = @transform_1, window_bounds = array<i64: 32, 64>}, {transform_indices = @transform_2, window_bounds = array<i64: 1, 64>}, {transform_indices = @transform_3, window_bounds = array<i64: 16, 64>}]} {
    %c0_i32 = arith.constant 0 : i32
    %0 = arith.cmpi eq, %arg2, %c0_i32 : i32
    %1 = arith.extui %0 : i1 to i32
    %c0_i32_0 = arith.constant 0 : i32
    %2 = arith.cmpi ne, %1, %c0_i32_0 : i32
    scf.if %2 {
      %cst_10 = arith.constant 0.000000e+00 : f32
      %13 = vector.broadcast %cst_10 : f32 to vector<16x64xf32>
      %c0_11 = arith.constant 0 : index
      %c0_12 = arith.constant 0 : index
      %14 = vector.load %arg7[%c0_11, %c0_12] : memref<16x64xf32, #tpu.memory_space<vmem>>, vector<16x64xf32>
      tpu.vector_store %arg7[%c0_11, %c0_12], %13 {strides = array<i32>} : memref<16x64xf32, #tpu.memory_space<vmem>>, vector<16x64xf32>,
    } else {
    }
    %c0 = arith.constant 0 : index
    %c0_1 = arith.constant 0 : index
    %3 = vector.load %arg7[%c0, %c0_1] : memref<16x64xf32, #tpu.memory_space<vmem>>, vector<16x64xf32>
    %c0_2 = arith.constant 0 : index
    %c0_3 = arith.constant 0 : index
    %4 = vector.load %arg3[%c0_2, %c0_3] : memref<16x32xf32, #tpu.memory_space<vmem>>, vector<16x32xf32>
    %5 = arith.truncf %4 : vector<16x32xf32> to vector<16x32xbf16>
    %c0_4 = arith.constant 0 : index
    %c0_5 = arith.constant 0 : index
    %6 = vector.load %arg4[%c0_4, %c0_5] : memref<32x64xbf16, #tpu.memory_space<vmem>>, vector<32x64xbf16>
    %cst = arith.constant dense<0.000000e+00> : vector<16x64xf32>
    %7 = tpu.matmul %5, %6, %cst {dimension_numbers = #tpu.dot_dimension_numbers<[1], [0], [0], [1], [0, 0, 1, 1], [], []>} : vector<16x32xbf16>, vector<32x64xbf16>, vector<16x64xf32> -> vector<16x64xf32>
    %8 = arith.addf %3, %7 : vector<16x64xf32>
    %c0_6 = arith.constant 0 : index
    %c0_7 = arith.constant 0 : index
    %9 = vector.load %arg7[%c0_6, %c0_7] : memref<16x64xf32, #tpu.memory_space<vmem>>, vector<16x64xf32>
    tpu.vector_store %arg7[%c0_6, %c0_7], %8 {strides = array<i32>} : memref<16x64xf32, #tpu.memory_space<vmem>>, vector<16x64xf32>,
    %c0_i32_8 = arith.constant 0 : i32
    %10 = arith.cmpi eq, %arg2, %c0_i32_8 : i32
    %11 = arith.extui %10 : i1 to i32
    %c0_i32_9 = arith.constant 0 : i32
    %12 = arith.cmpi ne, %11, %c0_i32_9 : i32
    scf.if %12 {
      %c0_10 = arith.constant 0 : index
      %c0_11 = arith.constant 0 : index
      %13 = vector.load %arg7[%c0_10, %c0_11] : memref<16x64xf32, #tpu.memory_space<vmem>>, vector<16x64xf32>
      %c0_12 = arith.constant 0 : index
      %c0_13 = arith.constant 0 : index
      %14 = vector.load %arg5[%c0_12, %c0_13] : memref<1x64xf32, #tpu.memory_space<vmem>>, vector<1x64xf32>
      %15 = vector.broadcast %14 : vector<1x64xf32> to vector<16x64xf32>
      %16 = arith.addf %13, %15 : vector<16x64xf32>
      %c0_14 = arith.constant 0 : index
      %c0_15 = arith.constant 0 : index
      %17 = vector.load %arg6[%c0_14, %c0_15] : memref<16x64xf32, #tpu.memory_space<vmem>>, vector<16x64xf32>
      tpu.vector_store %arg6[%c0_14, %c0_15], %16 {strides = array<i32>} : memref<16x64xf32, #tpu.memory_space<vmem>>, vector<16x64xf32>,
    } else {
    }
    return
  }
  func.func @transform_0(%arg0: i32, %arg1: i32, %arg2: i32) -> (i32, i32) {
    %c0_i32 = arith.constant 0 : i32
    return %arg0, %arg2 : i32, i32
  }
  func.func @transform_1(%arg0: i32, %arg1: i32, %arg2: i32) -> (i32, i32) {
    %c0_i32 = arith.constant 0 : i32
    return %arg2, %arg1 : i32, i32
  }
  func.func @transform_2(%arg0: i32, %arg1: i32, %arg2: i32) -> (i32, i32) {
    %c0_i32 = arith.constant 0 : i32
    %c0_i32_0 = arith.constant 0 : i32
    return %c0_i32, %arg1 : i32, i32
  }
  func.func @transform_3(%arg0: i32, %arg1: i32, %arg2: i32) -> (i32, i32) {
    %c0_i32 = arith.constant 0 : i32
    return %arg0, %arg1 : i32, i32
  }
}

module attributes {stable_mosaic.version = 11 : i64} {
  func.func @_layernorm_kernel(%arg0: i32, %arg1: memref<16x32xf32, #tpu.memory_space<vmem>>, %arg2: memref<1x32xf32, #tpu.memory_space<vmem>>, %arg3: memref<1x32xf32, #tpu.memory_space<vmem>>, %arg4: memref<16x32xf32, #tpu.memory_space<vmem>>) attributes {dimension_semantics = [#tpu.dimension_semantics<parallel>], iteration_bounds = array<i64: 1>, scalar_prefetch = 0 : i64, scratch_operands = 0 : i64, tpu.core_type = #tpu.core_type<tc>, window_params = [{transform_indices = @transform_0, window_bounds = array<i64: 16, 32>}, {pipeline_mode = #tpu.pipeline_mode<synchronous>, transform_indices = @transform_1, window_bounds = array<i64: 1, 32>}, {pipeline_mode = #tpu.pipeline_mode<synchronous>, transform_indices = @transform_2, window_bounds = array<i64: 1, 32>}, {transform_indices = @transform_3, window_bounds = array<i64: 16, 32>}]} {
    %c0 = arith.constant 0 : index
    %c0_0 = arith.constant 0 : index
    %0 = vector.load %arg1[%c0, %c0_0] : memref<16x32xf32, #tpu.memory_space<vmem>>, vector<16x32xf32>
    %cst = arith.constant dense<0.000000e+00> : vector<16xf32>
    %1 = vector.multi_reduction <add>, %0, %cst [1] : vector<16x32xf32> to vector<16xf32>
    %2 = vector.shape_cast %1 : vector<16xf32> to vector<16x1xf32>
    %cst_1 = arith.constant 3.200000e+01 : f32
    %3 = vector.broadcast %cst_1 : f32 to vector<16x1xf32>
    %4 = arith.divf %2, %3 : vector<16x1xf32>
    %5 = vector.broadcast %4 : vector<16x1xf32> to vector<16x32xf32>
    %6 = arith.subf %0, %5 : vector<16x32xf32>
    %7 = vector.broadcast %4 : vector<16x1xf32> to vector<16x32xf32>
    %8 = arith.subf %0, %7 : vector<16x32xf32>
    %9 = arith.mulf %6, %8 : vector<16x32xf32>
    %cst_2 = arith.constant dense<0.000000e+00> : vector<16xf32>
    %10 = vector.multi_reduction <add>, %9, %cst_2 [1] : vector<16x32xf32> to vector<16xf32>
    %11 = vector.shape_cast %10 : vector<16xf32> to vector<16x1xf32>
    %cst_3 = arith.constant 3.200000e+01 : f32
    %12 = vector.broadcast %cst_3 : f32 to vector<16x1xf32>
    %13 = arith.divf %11, %12 : vector<16x1xf32>
    %14 = vector.broadcast %4 : vector<16x1xf32> to vector<16x32xf32>
    %15 = arith.subf %0, %14 : vector<16x32xf32>
    %cst_4 = arith.constant 9.99999997E-7 : f32
    %16 = vector.broadcast %cst_4 : f32 to vector<16x1xf32>
    %17 = arith.addf %13, %16 : vector<16x1xf32>
    %18 = math.rsqrt %17 : vector<16x1xf32>
    %19 = vector.broadcast %18 : vector<16x1xf32> to vector<16x32xf32>
    %20 = arith.mulf %15, %19 : vector<16x32xf32>
    %c0_5 = arith.constant 0 : index
    %c0_6 = arith.constant 0 : index
    %21 = vector.load %arg2[%c0_5, %c0_6] : memref<1x32xf32, #tpu.memory_space<vmem>>, vector<1x32xf32>
    %22 = vector.broadcast %21 : vector<1x32xf32> to vector<16x32xf32>
    %23 = arith.mulf %20, %22 : vector<16x32xf32>
    %c0_7 = arith.constant 0 : index
    %c0_8 = arith.constant 0 : index
    %24 = vector.load %arg3[%c0_7, %c0_8] : memref<1x32xf32, #tpu.memory_space<vmem>>, vector<1x32xf32>
    %25 = vector.broadcast %24 : vector<1x32xf32> to vector<16x32xf32>
    %26 = arith.addf %23, %25 : vector<16x32xf32>
    %c0_9 = arith.constant 0 : index
    %c0_10 = arith.constant 0 : index
    %27 = vector.load %arg4[%c0_9, %c0_10] : memref<16x32xf32, #tpu.memory_space<vmem>>, vector<16x32xf32>
    tpu.vector_store %arg4[%c0_9, %c0_10], %26 {strides = array<i32>} : memref<16x32xf32, #tpu.memory_space<vmem>>, vector<16x32xf32>,
    return
  }
  func.func @transform_0(%arg0: i32) -> (i32, i32) {
    %c0_i32 = arith.constant 0 : i32
    %c0_i32_0 = arith.constant 0 : i32
    return %arg0, %c0_i32 : i32, i32
  }
  func.func @transform_1(%arg0: i32) -> (i32, i32) {
    %c0_i32 = arith.constant 0 : i32
    %c0_i32_0 = arith.constant 0 : i32
    %c0_i32_1 = arith.constant 0 : i32
    return %c0_i32, %c0_i32_0 : i32, i32
  }
  func.func @transform_2(%arg0: i32) -> (i32, i32) {
    %c0_i32 = arith.constant 0 : i32
    %c0_i32_0 = arith.constant 0 : i32
    %c0_i32_1 = arith.constant 0 : i32
    return %c0_i32, %c0_i32_0 : i32, i32
  }
  func.func @transform_3(%arg0: i32) -> (i32, i32) {
    %c0_i32 = arith.constant 0 : i32
    %c0_i32_0 = arith.constant 0 : i32
    return %arg0, %c0_i32 : i32, i32
  }
}

module attributes {stable_mosaic.version = 11 : i64} {
  func.func @_attn_kernel(%arg0: i32, %arg1: memref<1x8x8x4xf32, #tpu.memory_space<vmem>>, %arg2: memref<1x8x8x4xf32, #tpu.memory_space<vmem>>, %arg3: memref<1x8x8x4xf32, #tpu.memory_space<vmem>>, %arg4: memref<1x8x8x4xf32, #tpu.memory_space<vmem>>) attributes {dimension_semantics = [#tpu.dimension_semantics<parallel>], iteration_bounds = array<i64: 2>, scalar_prefetch = 0 : i64, scratch_operands = 0 : i64, tpu.core_type = #tpu.core_type<tc>, window_params = [{transform_indices = @transform_0, window_bounds = array<i64: 1, 8, 8, 4>}, {transform_indices = @transform_1, window_bounds = array<i64: 1, 8, 8, 4>}, {transform_indices = @transform_2, window_bounds = array<i64: 1, 8, 8, 4>}, {transform_indices = @transform_3, window_bounds = array<i64: 1, 8, 8, 4>}]} {
    %c0 = arith.constant 0 : index
    %c0_0 = arith.constant 0 : index
    %c0_1 = arith.constant 0 : index
    %c0_2 = arith.constant 0 : index
    %0 = vector.load %arg1[%c0, %c0_0, %c0_1, %c0_2] : memref<1x8x8x4xf32, #tpu.memory_space<vmem>>, vector<1x8x8x4xf32>
    %1 = vector.shape_cast %0 : vector<1x8x8x4xf32> to vector<8x8x4xf32>
    %c0_3 = arith.constant 0 : index
    %c0_4 = arith.constant 0 : index
    %c0_5 = arith.constant 0 : index
    %c0_6 = arith.constant 0 : index
    %2 = vector.load %arg2[%c0_3, %c0_4, %c0_5, %c0_6] : memref<1x8x8x4xf32, #tpu.memory_space<vmem>>, vector<1x8x8x4xf32>
    %3 = vector.shape_cast %2 : vector<1x8x8x4xf32> to vector<8x8x4xf32>
    %c0_7 = arith.constant 0 : index
    %c0_8 = arith.constant 0 : index
    %c0_9 = arith.constant 0 : index
    %c0_10 = arith.constant 0 : index
    %4 = vector.load %arg3[%c0_7, %c0_8, %c0_9, %c0_10] : memref<1x8x8x4xf32, #tpu.memory_space<vmem>>, vector<1x8x8x4xf32>
    %5 = vector.shape_cast %4 : vector<1x8x8x4xf32> to vector<8x8x4xf32>
    %6 = arith.truncf %1 : vector<8x8x4xf32> to vector<8x8x4xbf16>
    %7 = arith.truncf %3 : vector<8x8x4xf32> to vector<8x8x4xbf16>
    "tpu.trace_start"() <{level = 10 : i32, message = "hqd,hkd->hqk"}> : () -> ()
    %cst = arith.constant dense<0.000000e+00> : vector<8x8x8xf32>
    %8 = tpu.matmul %6, %7, %cst {dimension_numbers = #tpu.dot_dimension_numbers<[2], [2], [1], [1], [0, 0, 0, 1, 1, 1], [0], [0]>} : vector<8x8x4xbf16>, vector<8x8x4xbf16>, vector<8x8x8xf32> -> vector<8x8x8xf32>
    "tpu.trace_stop"() : () -> ()
    %cst_11 = arith.constant 5.000000e-01 : f32
    %9 = vector.broadcast %cst_11 : f32 to vector<8x8x8xf32>
    %10 = arith.mulf %8, %9 : vector<8x8x8xf32>
    %11 = tpu.iota {dimensions = array<i32: 1>} : vector<8x8x8xi32>
    %12 = tpu.iota {dimensions = array<i32: 2>} : vector<8x8x8xi32>
    %13 = arith.cmpi sge, %11, %12 : vector<8x8x8xi32>
    %cst_12 = arith.constant -1.000000e+09 : f32
    %14 = vector.broadcast %cst_12 : f32 to vector<8x8x8xf32>
    %15 = arith.select %13, %10, %14 : vector<8x8x8xi1>, vector<8x8x8xf32>
    %cst_13 = arith.constant dense<0xFF800000> : vector<8x8xf32>
    %16 = vector.multi_reduction <maximumf>, %15, %cst_13 [2] : vector<8x8x8xf32> to vector<8x8xf32>
    %17 = vector.shape_cast %16 : vector<8x8xf32> to vector<8x8x1xf32>
    %18 = vector.broadcast %17 : vector<8x8x1xf32> to vector<8x8x8xf32>
    %19 = arith.subf %15, %18 : vector<8x8x8xf32>
    %20 = math.exp %19 : vector<8x8x8xf32>
    %cst_14 = arith.constant dense<0.000000e+00> : vector<8x8xf32>
    %21 = vector.multi_reduction <add>, %20, %cst_14 [2] : vector<8x8x8xf32> to vector<8x8xf32>
    %22 = vector.shape_cast %21 : vector<8x8xf32> to vector<8x8x1xf32>
    %23 = tpu.reciprocal %22 {approx = true} : vector<8x8x1xf32> -> vector<8x8x1xf32>
    %24 = vector.broadcast %23 : vector<8x8x1xf32> to vector<8x8x8xf32>
    %25 = arith.mulf %20, %24 : vector<8x8x8xf32>
    %26 = arith.truncf %25 : vector<8x8x8xf32> to vector<8x8x8xbf16>
    %27 = arith.truncf %5 : vector<8x8x4xf32> to vector<8x8x4xbf16>
    "tpu.trace_start"() <{level = 10 : i32, message = "hqk,hkd->hqd"}> : () -> ()
    %cst_15 = arith.constant dense<0.000000e+00> : vector<8x8x4xf32>
    %28 = tpu.matmul %26, %27, %cst_15 {dimension_numbers = #tpu.dot_dimension_numbers<[2], [1], [1], [2], [0, 0, 0, 1, 1, 2], [0], [0]>} : vector<8x8x8xbf16>, vector<8x8x4xbf16>, vector<8x8x4xf32> -> vector<8x8x4xf32>
    "tpu.trace_stop"() : () -> ()
    %c0_16 = arith.constant 0 : index
    %c0_17 = arith.constant 0 : index
    %c0_18 = arith.constant 0 : index
    %c0_19 = arith.constant 0 : index
    %29 = vector.load %arg4[%c0_16, %c0_17, %c0_18, %c0_19] : memref<1x8x8x4xf32, #tpu.memory_space<vmem>>, vector<1x8x8x4xf32>
    %30 = vector.shape_cast %29 : vector<1x8x8x4xf32> to vector<8x8x4xf32>
    %31 = vector.shape_cast %28 : vector<8x8x4xf32> to vector<1x8x8x4xf32>
    tpu.vector_store %arg4[%c0_16, %c0_17, %c0_18, %c0_19], %31 {strides = array<i32>} : memref<1x8x8x4xf32, #tpu.memory_space<vmem>>, vector<1x8x8x4xf32>,
    return
  }
  func.func @transform_0(%arg0: i32) -> (i32, i32, i32, i32) {
    %c0_i32 = arith.constant 0 : i32
    %c0_i32_0 = arith.constant 0 : i32
    %c0_i32_1 = arith.constant 0 : i32
    %c0_i32_2 = arith.constant 0 : i32
    return %arg0, %c0_i32, %c0_i32_0, %c0_i32_1 : i32, i32, i32, i32
  }
  func.func @transform_1(%arg0: i32) -> (i32, i32, i32, i32) {
    %c0_i32 = arith.constant 0 : i32
    %c0_i32_0 = arith.constant 0 : i32
    %c0_i32_1 = arith.constant 0 : i32
    %c0_i32_2 = arith.constant 0 : i32
    return %arg0, %c0_i32, %c0_i32_0, %c0_i32_1 : i32, i32, i32, i32
  }
  func.func @transform_2(%arg0: i32) -> (i32, i32, i32, i32) {
    %c0_i32 = arith.constant 0 : i32
    %c0_i32_0 = arith.constant 0 : i32
    %c0_i32_1 = arith.constant 0 : i32
    %c0_i32_2 = arith.constant 0 : i32
    return %arg0, %c0_i32, %c0_i32_0, %c0_i32_1 : i32, i32, i32, i32
  }
  func.func @transform_3(%arg0: i32) -> (i32, i32, i32, i32) {
    %c0_i32 = arith.constant 0 : i32
    %c0_i32_0 = arith.constant 0 : i32
    %c0_i32_1 = arith.constant 0 : i32
    %c0_i32_2 = arith.constant 0 : i32
    return %arg0, %c0_i32, %c0_i32_0, %c0_i32_1 : i32, i32, i32, i32
  }
}

module attributes {stable_mosaic.version = 11 : i64} {
  func.func @_linear_kernel(%arg0: i32, %arg1: i32, %arg2: i32, %arg3: memref<16x32xf32, #tpu.memory_space<vmem>>, %arg4: memref<32x32xbf16, #tpu.memory_space<vmem>>, %arg5: memref<1x32xf32, #tpu.memory_space<vmem>>, %arg6: memref<16x32xf32, #tpu.memory_space<vmem>>, %arg7: memref<16x32xf32, #tpu.memory_space<vmem>>) attributes {dimension_semantics = [#tpu.dimension_semantics<parallel>, #tpu.dimension_semantics<parallel>, #tpu.dimension_semantics<arbitrary>], iteration_bounds = array<i64: 1, 1, 1>, scalar_prefetch = 0 : i64, scratch_operands = 1 : i64, tpu.core_type = #tpu.core_type<tc>, window_params = [{transform_indices = @transform_0, window_bounds = array<i64: 16, 32>}, {transform_indices = @transform_1, window_bounds = array<i64: 32, 32>}, {transform_indices = @transform_2, window_bounds = array<i64: 1, 32>}, {transform_indices = @transform_3, window_bounds = array<i64: 16, 32>}]} {
    %c0_i32 = arith.constant 0 : i32
    %0 = arith.cmpi eq, %arg2, %c0_i32 : i32
    %1 = arith.extui %0 : i1 to i32
    %c0_i32_0 = arith.constant 0 : i32
    %2 = arith.cmpi ne, %1, %c0_i32_0 : i32
    scf.if %2 {
      %cst_10 = arith.constant 0.000000e+00 : f32
      %13 = vector.broadcast %cst_10 : f32 to vector<16x32xf32>
      %c0_11 = arith.constant 0 : index
      %c0_12 = arith.constant 0 : index
      %14 = vector.load %arg7[%c0_11, %c0_12] : memref<16x32xf32, #tpu.memory_space<vmem>>, vector<16x32xf32>
      tpu.vector_store %arg7[%c0_11, %c0_12], %13 {strides = array<i32>} : memref<16x32xf32, #tpu.memory_space<vmem>>, vector<16x32xf32>,
    } else {
    }
    %c0 = arith.constant 0 : index
    %c0_1 = arith.constant 0 : index
    %3 = vector.load %arg7[%c0, %c0_1] : memref<16x32xf32, #tpu.memory_space<vmem>>, vector<16x32xf32>
    %c0_2 = arith.constant 0 : index
    %c0_3 = arith.constant 0 : index
    %4 = vector.load %arg3[%c0_2, %c0_3] : memref<16x32xf32, #tpu.memory_space<vmem>>, vector<16x32xf32>
    %5 = arith.truncf %4 : vector<16x32xf32> to vector<16x32xbf16>
    %c0_4 = arith.constant 0 : index
    %c0_5 = arith.constant 0 : index
    %6 = vector.load %arg4[%c0_4, %c0_5] : memref<32x32xbf16, #tpu.memory_space<vmem>>, vector<32x32xbf16>
    %cst = arith.constant dense<0.000000e+00> : vector<16x32xf32>
    %7 = tpu.matmul %5, %6, %cst {dimension_numbers = #tpu.dot_dimension_numbers<[1], [0], [0], [1], [0, 0, 1, 1], [], []>} : vector<16x32xbf16>, vector<32x32xbf16>, vector<16x32xf32> -> vector<16x32xf32>
    %8 = arith.addf %3, %7 : vector<16x32xf32>
    %c0_6 = arith.constant 0 : index
    %c0_7 = arith.constant 0 : index
    %9 = vector.load %arg7[%c0_6, %c0_7] : memref<16x32xf32, #tpu.memory_space<vmem>>, vector<16x32xf32>
    tpu.vector_store %arg7[%c0_6, %c0_7], %8 {strides = array<i32>} : memref<16x32xf32, #tpu.memory_space<vmem>>, vector<16x32xf32>,
    %c0_i32_8 = arith.constant 0 : i32
    %10 = arith.cmpi eq, %arg2, %c0_i32_8 : i32
    %11 = arith.extui %10 : i1 to i32
    %c0_i32_9 = arith.constant 0 : i32
    %12 = arith.cmpi ne, %11, %c0_i32_9 : i32
    scf.if %12 {
      %c0_10 = arith.constant 0 : index
      %c0_11 = arith.constant 0 : index
      %13 = vector.load %arg7[%c0_10, %c0_11] : memref<16x32xf32, #tpu.memory_space<vmem>>, vector<16x32xf32>
      %c0_12 = arith.constant 0 : index
      %c0_13 = arith.constant 0 : index
      %14 = vector.load %arg5[%c0_12, %c0_13] : memref<1x32xf32, #tpu.memory_space<vmem>>, vector<1x32xf32>
      %15 = vector.broadcast %14 : vector<1x32xf32> to vector<16x32xf32>
      %16 = arith.addf %13, %15 : vector<16x32xf32>
      %c0_14 = arith.constant 0 : index
      %c0_15 = arith.constant 0 : index
      %17 = vector.load %arg6[%c0_14, %c0_15] : memref<16x32xf32, #tpu.memory_space<vmem>>, vector<16x32xf32>
      tpu.vector_store %arg6[%c0_14, %c0_15], %16 {strides = array<i32>} : memref<16x32xf32, #tpu.memory_space<vmem>>, vector<16x32xf32>,
    } else {
    }
    return
  }
  func.func @transform_0(%arg0: i32, %arg1: i32, %arg2: i32) -> (i32, i32) {
    %c0_i32 = arith.constant 0 : i32
    return %arg0, %arg2 : i32, i32
  }
  func.func @transform_1(%arg0: i32, %arg1: i32, %arg2: i32) -> (i32, i32) {
    %c0_i32 = arith.constant 0 : i32
    return %arg2, %arg1 : i32, i32
  }
  func.func @transform_2(%arg0: i32, %arg1: i32, %arg2: i32) -> (i32, i32) {
    %c0_i32 = arith.constant 0 : i32
    %c0_i32_0 = arith.constant 0 : i32
    return %c0_i32, %arg1 : i32, i32
  }
  func.func @transform_3(%arg0: i32, %arg1: i32, %arg2: i32) -> (i32, i32) {
    %c0_i32 = arith.constant 0 : i32
    return %arg0, %arg1 : i32, i32
  }
}

module attributes {stable_mosaic.version = 11 : i64} {
  func.func @_linear_kernel(%arg0: i32, %arg1: i32, %arg2: i32, %arg3: memref<16x32xf32, #tpu.memory_space<vmem>>, %arg4: memref<32x128xbf16, #tpu.memory_space<vmem>>, %arg5: memref<1x128xf32, #tpu.memory_space<vmem>>, %arg6: memref<16x128xf32, #tpu.memory_space<vmem>>, %arg7: memref<16x128xf32, #tpu.memory_space<vmem>>) attributes {dimension_semantics = [#tpu.dimension_semantics<parallel>, #tpu.dimension_semantics<parallel>, #tpu.dimension_semantics<arbitrary>], iteration_bounds = array<i64: 1, 1, 1>, scalar_prefetch = 0 : i64, scratch_operands = 1 : i64, tpu.core_type = #tpu.core_type<tc>, window_params = [{transform_indices = @transform_0, window_bounds = array<i64: 16, 32>}, {transform_indices = @transform_1, window_bounds = array<i64: 32, 128>}, {transform_indices = @transform_2, window_bounds = array<i64: 1, 128>}, {transform_indices = @transform_3, window_bounds = array<i64: 16, 128>}]} {
    %c0_i32 = arith.constant 0 : i32
    %0 = arith.cmpi eq, %arg2, %c0_i32 : i32
    %1 = arith.extui %0 : i1 to i32
    %c0_i32_0 = arith.constant 0 : i32
    %2 = arith.cmpi ne, %1, %c0_i32_0 : i32
    scf.if %2 {
      %cst_10 = arith.constant 0.000000e+00 : f32
      %13 = vector.broadcast %cst_10 : f32 to vector<16x128xf32>
      %c0_11 = arith.constant 0 : index
      %c0_12 = arith.constant 0 : index
      %14 = vector.load %arg7[%c0_11, %c0_12] : memref<16x128xf32, #tpu.memory_space<vmem>>, vector<16x128xf32>
      tpu.vector_store %arg7[%c0_11, %c0_12], %13 {strides = array<i32>} : memref<16x128xf32, #tpu.memory_space<vmem>>, vector<16x128xf32>,
    } else {
    }
    %c0 = arith.constant 0 : index
    %c0_1 = arith.constant 0 : index
    %3 = vector.load %arg7[%c0, %c0_1] : memref<16x128xf32, #tpu.memory_space<vmem>>, vector<16x128xf32>
    %c0_2 = arith.constant 0 : index
    %c0_3 = arith.constant 0 : index
    %4 = vector.load %arg3[%c0_2, %c0_3] : memref<16x32xf32, #tpu.memory_space<vmem>>, vector<16x32xf32>
    %5 = arith.truncf %4 : vector<16x32xf32> to vector<16x32xbf16>
    %c0_4 = arith.constant 0 : index
    %c0_5 = arith.constant 0 : index
    %6 = vector.load %arg4[%c0_4, %c0_5] : memref<32x128xbf16, #tpu.memory_space<vmem>>, vector<32x128xbf16>
    %cst = arith.constant dense<0.000000e+00> : vector<16x128xf32>
    %7 = tpu.matmul %5, %6, %cst {dimension_numbers = #tpu.dot_dimension_numbers<[1], [0], [0], [1], [0, 0, 1, 1], [], []>} : vector<16x32xbf16>, vector<32x128xbf16>, vector<16x128xf32> -> vector<16x128xf32>
    %8 = arith.addf %3, %7 : vector<16x128xf32>
    %c0_6 = arith.constant 0 : index
    %c0_7 = arith.constant 0 : index
    %9 = vector.load %arg7[%c0_6, %c0_7] : memref<16x128xf32, #tpu.memory_space<vmem>>, vector<16x128xf32>
    tpu.vector_store %arg7[%c0_6, %c0_7], %8 {strides = array<i32>} : memref<16x128xf32, #tpu.memory_space<vmem>>, vector<16x128xf32>,
    %c0_i32_8 = arith.constant 0 : i32
    %10 = arith.cmpi eq, %arg2, %c0_i32_8 : i32
    %11 = arith.extui %10 : i1 to i32
    %c0_i32_9 = arith.constant 0 : i32
    %12 = arith.cmpi ne, %11, %c0_i32_9 : i32
    scf.if %12 {
      %c0_10 = arith.constant 0 : index
      %c0_11 = arith.constant 0 : index
      %13 = vector.load %arg7[%c0_10, %c0_11] : memref<16x128xf32, #tpu.memory_space<vmem>>, vector<16x128xf32>
      %c0_12 = arith.constant 0 : index
      %c0_13 = arith.constant 0 : index
      %14 = vector.load %arg5[%c0_12, %c0_13] : memref<1x128xf32, #tpu.memory_space<vmem>>, vector<1x128xf32>
      %15 = vector.broadcast %14 : vector<1x128xf32> to vector<16x128xf32>
      %16 = arith.addf %13, %15 : vector<16x128xf32>
      %cst_14 = arith.constant 0.000000e+00 : f32
      %17 = vector.broadcast %cst_14 : f32 to vector<16x128xf32>
      %18 = arith.maximumf %16, %17 : vector<16x128xf32>
      %c0_15 = arith.constant 0 : index
      %c0_16 = arith.constant 0 : index
      %19 = vector.load %arg6[%c0_15, %c0_16] : memref<16x128xf32, #tpu.memory_space<vmem>>, vector<16x128xf32>
      tpu.vector_store %arg6[%c0_15, %c0_16], %18 {strides = array<i32>} : memref<16x128xf32, #tpu.memory_space<vmem>>, vector<16x128xf32>,
    } else {
    }
    return
  }
  func.func @transform_0(%arg0: i32, %arg1: i32, %arg2: i32) -> (i32, i32) {
    %c0_i32 = arith.constant 0 : i32
    return %arg0, %arg2 : i32, i32
  }
  func.func @transform_1(%arg0: i32, %arg1: i32, %arg2: i32) -> (i32, i32) {
    %c0_i32 = arith.constant 0 : i32
    return %arg2, %arg1 : i32, i32
  }
  func.func @transform_2(%arg0: i32, %arg1: i32, %arg2: i32) -> (i32, i32) {
    %c0_i32 = arith.constant 0 : i32
    %c0_i32_0 = arith.constant 0 : i32
    return %c0_i32, %arg1 : i32, i32
  }
  func.func @transform_3(%arg0: i32, %arg1: i32, %arg2: i32) -> (i32, i32) {
    %c0_i32 = arith.constant 0 : i32
    return %arg0, %arg1 : i32, i32
  }
}

module attributes {stable_mosaic.version = 11 : i64} {
  func.func @_linear_kernel(%arg0: i32, %arg1: i32, %arg2: i32, %arg3: memref<16x128xf32, #tpu.memory_space<vmem>>, %arg4: memref<128x32xbf16, #tpu.memory_space<vmem>>, %arg5: memref<1x32xf32, #tpu.memory_space<vmem>>, %arg6: memref<16x32xf32, #tpu.memory_space<vmem>>, %arg7: memref<16x32xf32, #tpu.memory_space<vmem>>, %arg8: memref<16x32xf32, #tpu.memory_space<vmem>>) attributes {dimension_semantics = [#tpu.dimension_semantics<parallel>, #tpu.dimension_semantics<parallel>, #tpu.dimension_semantics<arbitrary>], iteration_bounds = array<i64: 1, 1, 1>, scalar_prefetch = 0 : i64, scratch_operands = 1 : i64, tpu.core_type = #tpu.core_type<tc>, window_params = [{transform_indices = @transform_0, window_bounds = array<i64: 16, 128>}, {transform_indices = @transform_1, window_bounds = array<i64: 128, 32>}, {transform_indices = @transform_2, window_bounds = array<i64: 1, 32>}, {transform_indices = @transform_3, window_bounds = array<i64: 16, 32>}, {transform_indices = @transform_4, window_bounds = array<i64: 16, 32>}]} {
    %c0_i32 = arith.constant 0 : i32
    %0 = arith.cmpi eq, %arg2, %c0_i32 : i32
    %1 = arith.extui %0 : i1 to i32
    %c0_i32_0 = arith.constant 0 : i32
    %2 = arith.cmpi ne, %1, %c0_i32_0 : i32
    scf.if %2 {
      %cst_10 = arith.constant 0.000000e+00 : f32
      %13 = vector.broadcast %cst_10 : f32 to vector<16x32xf32>
      %c0_11 = arith.constant 0 : index
      %c0_12 = arith.constant 0 : index
      %14 = vector.load %arg8[%c0_11, %c0_12] : memref<16x32xf32, #tpu.memory_space<vmem>>, vector<16x32xf32>
      tpu.vector_store %arg8[%c0_11, %c0_12], %13 {strides = array<i32>} : memref<16x32xf32, #tpu.memory_space<vmem>>, vector<16x32xf32>,
    } else {
    }
    %c0 = arith.constant 0 : index
    %c0_1 = arith.constant 0 : index
    %3 = vector.load %arg8[%c0, %c0_1] : memref<16x32xf32, #tpu.memory_space<vmem>>, vector<16x32xf32>
    %c0_2 = arith.constant 0 : index
    %c0_3 = arith.constant 0 : index
    %4 = vector.load %arg3[%c0_2, %c0_3] : memref<16x128xf32, #tpu.memory_space<vmem>>, vector<16x128xf32>
    %5 = arith.truncf %4 : vector<16x128xf32> to vector<16x128xbf16>
    %c0_4 = arith.constant 0 : index
    %c0_5 = arith.constant 0 : index
    %6 = vector.load %arg4[%c0_4, %c0_5] : memref<128x32xbf16, #tpu.memory_space<vmem>>, vector<128x32xbf16>
    %cst = arith.constant dense<0.000000e+00> : vector<16x32xf32>
    %7 = tpu.matmul %5, %6, %cst {dimension_numbers = #tpu.dot_dimension_numbers<[1], [0], [0], [1], [0, 0, 1, 1], [], []>} : vector<16x128xbf16>, vector<128x32xbf16>, vector<16x32xf32> -> vector<16x32xf32>
    %8 = arith.addf %3, %7 : vector<16x32xf32>
    %c0_6 = arith.constant 0 : index
    %c0_7 = arith.constant 0 : index
    %9 = vector.load %arg8[%c0_6, %c0_7] : memref<16x32xf32, #tpu.memory_space<vmem>>, vector<16x32xf32>
    tpu.vector_store %arg8[%c0_6, %c0_7], %8 {strides = array<i32>} : memref<16x32xf32, #tpu.memory_space<vmem>>, vector<16x32xf32>,
    %c0_i32_8 = arith.constant 0 : i32
    %10 = arith.cmpi eq, %arg2, %c0_i32_8 : i32
    %11 = arith.extui %10 : i1 to i32
    %c0_i32_9 = arith.constant 0 : i32
    %12 = arith.cmpi ne, %11, %c0_i32_9 : i32
    scf.if %12 {
      %c0_10 = arith.constant 0 : index
      %c0_11 = arith.constant 0 : index
      %13 = vector.load %arg8[%c0_10, %c0_11] : memref<16x32xf32, #tpu.memory_space<vmem>>, vector<16x32xf32>
      %c0_12 = arith.constant 0 : index
      %c0_13 = arith.constant 0 : index
      %14 = vector.load %arg5[%c0_12, %c0_13] : memref<1x32xf32, #tpu.memory_space<vmem>>, vector<1x32xf32>
      %15 = vector.broadcast %14 : vector<1x32xf32> to vector<16x32xf32>
      %16 = arith.addf %13, %15 : vector<16x32xf32>
      %c0_14 = arith.constant 0 : index
      %c0_15 = arith.constant 0 : index
      %17 = vector.load %arg6[%c0_14, %c0_15] : memref<16x32xf32, #tpu.memory_space<vmem>>, vector<16x32xf32>
      %18 = arith.addf %16, %17 : vector<16x32xf32>
      %c0_16 = arith.constant 0 : index
      %c0_17 = arith.constant 0 : index
      %19 = vector.load %arg7[%c0_16, %c0_17] : memref<16x32xf32, #tpu.memory_space<vmem>>, vector<16x32xf32>
      tpu.vector_store %arg7[%c0_16, %c0_17], %18 {strides = array<i32>} : memref<16x32xf32, #tpu.memory_space<vmem>>, vector<16x32xf32>,
    } else {
    }
    return
  }
  func.func @transform_0(%arg0: i32, %arg1: i32, %arg2: i32) -> (i32, i32) {
    %c0_i32 = arith.constant 0 : i32
    return %arg0, %arg2 : i32, i32
  }
  func.func @transform_1(%arg0: i32, %arg1: i32, %arg2: i32) -> (i32, i32) {
    %c0_i32 = arith.constant 0 : i32
    return %arg2, %arg1 : i32, i32
  }
  func.func @transform_2(%arg0: i32, %arg1: i32, %arg2: i32) -> (i32, i32) {
    %c0_i32 = arith.constant 0 : i32
    %c0_i32_0 = arith.constant 0 : i32
    return %c0_i32, %arg1 : i32, i32
  }
  func.func @transform_3(%arg0: i32, %arg1: i32, %arg2: i32) -> (i32, i32) {
    %c0_i32 = arith.constant 0 : i32
    return %arg0, %arg1 : i32, i32
  }
  func.func @transform_4(%arg0: i32, %arg1: i32, %arg2: i32) -> (i32, i32) {
    %c0_i32 = arith.constant 0 : i32
    return %arg0, %arg1 : i32, i32
  }
}

module attributes {stable_mosaic.version = 11 : i64} {
  func.func @_adaptive_head_kernel(%arg0: i32, %arg1: memref<16x32xf32, #tpu.memory_space<vmem>>, %arg2: memref<32x1024xbf16, #tpu.memory_space<vmem>>, %arg3: memref<16x1024xf32, #tpu.memory_space<vmem>>) attributes {dimension_semantics = [#tpu.dimension_semantics<parallel>], iteration_bounds = array<i64: 1>, scalar_prefetch = 0 : i64, scratch_operands = 0 : i64, tpu.core_type = #tpu.core_type<tc>, window_params = [{transform_indices = @transform_0, window_bounds = array<i64: 16, 32>}, {pipeline_mode = #tpu.pipeline_mode<synchronous>, transform_indices = @transform_1, window_bounds = array<i64: 32, 1024>}, {transform_indices = @transform_2, window_bounds = array<i64: 16, 1024>}]} {
    %c0 = arith.constant 0 : index
    %c0_0 = arith.constant 0 : index
    %0 = vector.load %arg1[%c0, %c0_0] : memref<16x32xf32, #tpu.memory_space<vmem>>, vector<16x32xf32>
    %1 = arith.truncf %0 : vector<16x32xf32> to vector<16x32xbf16>
    %c0_1 = arith.constant 0 : index
    %c0_2 = arith.constant 0 : index
    %2 = vector.load %arg2[%c0_1, %c0_2] : memref<32x1024xbf16, #tpu.memory_space<vmem>>, vector<32x1024xbf16>
    %cst = arith.constant dense<0.000000e+00> : vector<16x1024xf32>
    %3 = tpu.matmul %1, %2, %cst {dimension_numbers = #tpu.dot_dimension_numbers<[1], [0], [0], [1], [0, 0, 1, 1], [], []>} : vector<16x32xbf16>, vector<32x1024xbf16>, vector<16x1024xf32> -> vector<16x1024xf32>
    %4 = tpu.iota {dimensions = array<i32: 1>} : vector<16x1024xi32>
    %c1001_i32 = arith.constant 1001 : i32
    %5 = vector.broadcast %c1001_i32 : i32 to vector<16x1024xi32>
    %6 = arith.cmpi slt, %4, %5 : vector<16x1024xi32>
    %cst_3 = arith.constant -1.000000e+30 : f32
    %7 = vector.broadcast %cst_3 : f32 to vector<16x1024xf32>
    %8 = arith.select %6, %3, %7 : vector<16x1024xi1>, vector<16x1024xf32>
    %cst_4 = arith.constant dense<0xFF800000> : vector<16xf32>
    %9 = vector.multi_reduction <maximumf>, %8, %cst_4 [1] : vector<16x1024xf32> to vector<16xf32>
    %10 = vector.shape_cast %9 : vector<16xf32> to vector<16x1xf32>
    %11 = vector.broadcast %10 : vector<16x1xf32> to vector<16x1024xf32>
    %12 = arith.subf %8, %11 : vector<16x1024xf32>
    %13 = math.exp %12 : vector<16x1024xf32>
    %cst_5 = arith.constant dense<0.000000e+00> : vector<16xf32>
    %14 = vector.multi_reduction <add>, %13, %cst_5 [1] : vector<16x1024xf32> to vector<16xf32>
    %15 = vector.shape_cast %14 : vector<16xf32> to vector<16x1xf32>
    %16 = math.log %15 : vector<16x1xf32>
    %17 = vector.broadcast %16 : vector<16x1xf32> to vector<16x1024xf32>
    %18 = arith.subf %12, %17 : vector<16x1024xf32>
    %c0_6 = arith.constant 0 : index
    %c0_7 = arith.constant 0 : index
    %19 = vector.load %arg3[%c0_6, %c0_7] : memref<16x1024xf32, #tpu.memory_space<vmem>>, vector<16x1024xf32>
    tpu.vector_store %arg3[%c0_6, %c0_7], %18 {strides = array<i32>} : memref<16x1024xf32, #tpu.memory_space<vmem>>, vector<16x1024xf32>,
    return
  }
  func.func @transform_0(%arg0: i32) -> (i32, i32) {
    %c0_i32 = arith.constant 0 : i32
    %c0_i32_0 = arith.constant 0 : i32
    return %arg0, %c0_i32 : i32, i32
  }
  func.func @transform_1(%arg0: i32) -> (i32, i32) {
    %c0_i32 = arith.constant 0 : i32
    %c0_i32_0 = arith.constant 0 : i32
    %c0_i32_1 = arith.constant 0 : i32
    return %c0_i32, %c0_i32_0 : i32, i32
  }
  func.func @transform_2(%arg0: i32) -> (i32, i32) {
    %c0_i32 = arith.constant 0 : i32
    %c0_i32_0 = arith.constant 0 : i32
    return %arg0, %c0_i32 : i32, i32
  }
}

module attributes {stable_mosaic.version = 11 : i64} {
  func.func @_adaptive_tail_kernel(%arg0: i32, %arg1: memref<16x32xf32, #tpu.memory_space<vmem>>, %arg2: memref<32x8xbf16, #tpu.memory_space<vmem>>, %arg3: memref<8x512xbf16, #tpu.memory_space<vmem>>, %arg4: memref<16x1xf32, #tpu.memory_space<vmem>>, %arg5: memref<16x512xf32, #tpu.memory_space<vmem>>) attributes {dimension_semantics = [#tpu.dimension_semantics<parallel>], iteration_bounds = array<i64: 1>, scalar_prefetch = 0 : i64, scratch_operands = 0 : i64, tpu.core_type = #tpu.core_type<tc>, window_params = [{transform_indices = @transform_0, window_bounds = array<i64: 16, 32>}, {pipeline_mode = #tpu.pipeline_mode<synchronous>, transform_indices = @transform_1, window_bounds = array<i64: 32, 8>}, {pipeline_mode = #tpu.pipeline_mode<synchronous>, transform_indices = @transform_2, window_bounds = array<i64: 8, 512>}, {transform_indices = @transform_3, window_bounds = array<i64: 16, 1>}, {transform_indices = @transform_4, window_bounds = array<i64: 16, 512>}]} {
    %c0 = arith.constant 0 : index
    %c0_0 = arith.constant 0 : index
    %0 = vector.load %arg1[%c0, %c0_0] : memref<16x32xf32, #tpu.memory_space<vmem>>, vector<16x32xf32>
    %1 = arith.truncf %0 : vector<16x32xf32> to vector<16x32xbf16>
    %c0_1 = arith.constant 0 : index
    %c0_2 = arith.constant 0 : index
    %2 = vector.load %arg2[%c0_1, %c0_2] : memref<32x8xbf16, #tpu.memory_space<vmem>>, vector<32x8xbf16>
    %cst = arith.constant dense<0.000000e+00> : vector<16x8xf32>
    %3 = tpu.matmul %1, %2, %cst {dimension_numbers = #tpu.dot_dimension_numbers<[1], [0], [0], [1], [0, 0, 1, 1], [], []>} : vector<16x32xbf16>, vector<32x8xbf16>, vector<16x8xf32> -> vector<16x8xf32>
    %4 = arith.truncf %3 : vector<16x8xf32> to vector<16x8xbf16>
    %c0_3 = arith.constant 0 : index
    %c0_4 = arith.constant 0 : index
    %5 = vector.load %arg3[%c0_3, %c0_4] : memref<8x512xbf16, #tpu.memory_space<vmem>>, vector<8x512xbf16>
    %cst_5 = arith.constant dense<0.000000e+00> : vector<16x512xf32>
    %6 = tpu.matmul %4, %5, %cst_5 {dimension_numbers = #tpu.dot_dimension_numbers<[1], [0], [0], [1], [0, 0, 1, 1], [], []>} : vector<16x8xbf16>, vector<8x512xbf16>, vector<16x512xf32> -> vector<16x512xf32>
    %7 = tpu.iota {dimensions = array<i32: 1>} : vector<16x512xi32>
    %c500_i32 = arith.constant 500 : i32
    %8 = vector.broadcast %c500_i32 : i32 to vector<16x512xi32>
    %9 = arith.cmpi slt, %7, %8 : vector<16x512xi32>
    %cst_6 = arith.constant -1.000000e+30 : f32
    %10 = vector.broadcast %cst_6 : f32 to vector<16x512xf32>
    %11 = arith.select %9, %6, %10 : vector<16x512xi1>, vector<16x512xf32>
    %cst_7 = arith.constant dense<0xFF800000> : vector<16xf32>
    %12 = vector.multi_reduction <maximumf>, %11, %cst_7 [1] : vector<16x512xf32> to vector<16xf32>
    %13 = vector.shape_cast %12 : vector<16xf32> to vector<16x1xf32>
    %14 = vector.broadcast %13 : vector<16x1xf32> to vector<16x512xf32>
    %15 = arith.subf %11, %14 : vector<16x512xf32>
    %16 = math.exp %15 : vector<16x512xf32>
    %cst_8 = arith.constant dense<0.000000e+00> : vector<16xf32>
    %17 = vector.multi_reduction <add>, %16, %cst_8 [1] : vector<16x512xf32> to vector<16xf32>
    %18 = vector.shape_cast %17 : vector<16xf32> to vector<16x1xf32>
    %19 = math.log %18 : vector<16x1xf32>
    %20 = vector.broadcast %19 : vector<16x1xf32> to vector<16x512xf32>
    %21 = arith.subf %15, %20 : vector<16x512xf32>
    %c0_9 = arith.constant 0 : index
    %c0_10 = arith.constant 0 : index
    %22 = vector.load %arg4[%c0_9, %c0_10] : memref<16x1xf32, #tpu.memory_space<vmem>>, vector<16x1xf32>
    %23 = vector.broadcast %22 : vector<16x1xf32> to vector<16x512xf32>
    %24 = arith.addf %21, %23 : vector<16x512xf32>
    %c0_11 = arith.constant 0 : index
    %c0_12 = arith.constant 0 : index
    %25 = vector.load %arg5[%c0_11, %c0_12] : memref<16x512xf32, #tpu.memory_space<vmem>>, vector<16x512xf32>
    tpu.vector_store %arg5[%c0_11, %c0_12], %24 {strides = array<i32>} : memref<16x512xf32, #tpu.memory_space<vmem>>, vector<16x512xf32>,
    return
  }
  func.func @transform_0(%arg0: i32) -> (i32, i32) {
    %c0_i32 = arith.constant 0 : i32
    %c0_i32_0 = arith.constant 0 : i32
    return %arg0, %c0_i32 : i32, i32
  }
  func.func @transform_1(%arg0: i32) -> (i32, i32) {
    %c0_i32 = arith.constant 0 : i32
    %c0_i32_0 = arith.constant 0 : i32
    %c0_i32_1 = arith.constant 0 : i32
    return %c0_i32, %c0_i32_0 : i32, i32
  }
  func.func @transform_2(%arg0: i32) -> (i32, i32) {
    %c0_i32 = arith.constant 0 : i32
    %c0_i32_0 = arith.constant 0 : i32
    %c0_i32_1 = arith.constant 0 : i32
    return %c0_i32, %c0_i32_0 : i32, i32
  }
  func.func @transform_3(%arg0: i32) -> (i32, i32) {
    %c0_i32 = arith.constant 0 : i32
    %c0_i32_0 = arith.constant 0 : i32
    return %arg0, %c0_i32 : i32, i32
  }
  func.func @transform_4(%arg0: i32) -> (i32, i32) {
    %c0_i32 = arith.constant 0 : i32
    %c0_i32_0 = arith.constant 0 : i32
    return %arg0, %c0_i32 : i32, i32
  }
}

</mosaic_0001>

<bundles_post_ra>
// kernel: transformer_no_embed_forward.41
= control target key start
LH: loop header
LB: loop body
LE: loop exit
PB: predicated region body
PF: predicated region fallthrough
CT: control target
= control target key end

     0   :  { %vm19_vm0 = vcmask 785408   ;;  %v132_v0 = vmov 0.0   ;;  %vm133_vm1 = vmmov 0   ;;  %vm43_vm2 = vcmask 261120   ;;  %s181_s1 = inlined_call_operand.vmem [shape: bf16[32,96], index: 1, kind: input, shape index: {}]   ;;  %s182_s0 = inlined_call_operand.vmem [shape: f32[16,32], index: 0, kind: input, shape index: {}]   ;;  %s183_s2 = inlined_call_operand.vmem [shape: f32[1,96], index: 2, kind: input, shape index: {}]   ;;  %s184_s3 = inlined_call_operand.vmem [shape: f32[16,96], index: 3, kind: output, shape index: {}]  }
   0x1   :  { %120 = vmatprep.subr.bf16.mxu0 %v132_v0  ;;  %v130_v1 = vld [vmem:[%s181_s1 + $0x8] sm:$0xff]   ;;  %124 = vmatprep.mubr.msk.bf16.mxu0 %vm133_vm1, %v132_v0  ;;  %20 = vst.msk [vmem:[#allocation2] sm:$0xff] %vm19_vm0, %v132_v0  ;;  %21 = vst.msk [vmem:[#allocation2 + $0x8] sm:$0xff] %vm19_vm0, %v132_v0  ;;  %v131_v2 = vld [vmem:[%s181_s1] sm:$0xff]  }
   0x2   :  { %121 = vmatpush3.bf16.msra.mxu0 %v130_v1  ;;  %v24_v3 = vld [vmem:[%s182_s0] sm:$0xff]  ;;  %v25_v4 = vld [vmem:[%s182_s0 + $0x8] sm:$0xff] }
   0x3   :  { %122 = vmatprep.subr.bf16.mxu0 %v132_v0  ;;  %v26_v5 = vpack.c.bf16 %v25_v4, %v24_v3  ;;  %v116_v14 = vld [vmem:[%s183_s2] ss:$0 sm:$0xff] }
   0x6   :  { %123 = vmatpush3.bf16.msra.mxu0 %v131_v2 }
   0x8   :  { %v22_v6 = vld [vmem:[#allocation2] sm:$0xff]  ;;  %v23_v10 = vld [vmem:[#allocation2 + $0x8] sm:$0xff] }
   0x9   :  { %125 = vmatmul.mubr.msk.bf16.vlgmr.msra.gmra.mxu0 %vm43_vm2, %v26_v5 }
  0xc9   :  { %v81_v7 = vpop.f32.mrf.mxu0 }
  0xca   :  { %v88_v8 = vadd.f32 %v81_v7, %v22_v6 }
  0xcb   :  { %v126_v9 = vpop.f32.mrf.mxu0 }
  0xcc   :  { %91 = vst.msk [vmem:[#allocation2] sm:$0xff] %vm19_vm0, %v88_v8 }
  0xcd   :  { %v84_v11 = vpop.f32.mrf.mxu0 }
  0xce   :  { %v89_v12 = vadd.f32 %v84_v11, %v23_v10 }
  0xcf   :  { %v127_v13 = vpop.f32.mrf.mxu0 }
  0xd0   :  { %92 = vst.msk [vmem:[#allocation2 + $0x8] sm:$0xff] %vm19_vm0, %v89_v12 }
  0xd3   :  { %v96_v15 = vld [vmem:[#allocation2] sm:$0xff] }
  0xd4   :  { %v105_v16 = vadd.f32 %v116_v14, %v96_v15 }
  0xd6   :  { %107 = vst.msk [vmem:[%s184_s3] sm:$0xff] %vm19_vm0, %v105_v16 }
  0xd7   :  { %v97_v17 = vld [vmem:[#allocation2 + $0x8] sm:$0xff] }
  0xd8   :  { %v106_v18 = vadd.f32 %v116_v14, %v97_v17 }
  0xda   :  { %108 = vst.msk [vmem:[%s184_s3 + $0x8] sm:$0xff] %vm19_vm0, %v106_v18 }

// kernel: transformer_no_embed_forward.43
= control target key start
LH: loop header
LB: loop body
LE: loop exit
PB: predicated region body
PF: predicated region fallthrough
CT: control target
= control target key end

     0   :  { %vm22_vm0 = vcmask 261120   ;;  %v138_v0 = vmov 0.0   ;;  %vm139_vm1 = vmmov 0   ;;  %s199_s1 = inlined_call_operand.vmem [shape: bf16[32,32], index: 1, kind: input, shape index: {}]   ;;  %s200_s0 = inlined_call_operand.vmem [shape: f32[16,32], index: 0, kind: input, shape index: {}]   ;;  %s201_s2 = inlined_call_operand.vmem [shape: f32[1,32], index: 2, kind: input, shape index: {}]   ;;  %s202_s3 = inlined_call_operand.vmem [shape: f32[16,32], index: 3, kind: input, shape index: {}]   ;;  %s203_s4 = inlined_call_operand.vmem [shape: f32[16,32], index: 4, kind: output, shape index: {}]  }
   0x1   :  { %126 = vmatprep.subr.bf16.mxu0 %v138_v0  ;;  %v136_v1 = vld [vmem:[%s199_s1 + $0x8] sm:$0xff]   ;;  %130 = vmatprep.mubr.msk.bf16.mxu0 %vm139_vm1, %v138_v0  ;;  %23 = vst.msk [vmem:[#allocation2] sm:$0xff] %vm22_vm0, %v138_v0  ;;  %24 = vst.msk [vmem:[#allocation2 + $0x8] sm:$0xff] %vm22_vm0, %v138_v0  ;;  %v137_v2 = vld [vmem:[%s199_s1] sm:$0xff]  }
   0x2   :  { %127 = vmatpush3.bf16.msra.mxu0 %v136_v1  ;;  %v27_v3 = vld [vmem:[%s200_s0] sm:$0xff]  ;;  %v28_v4 = vld [vmem:[%s200_s0 + $0x8] sm:$0xff] }
   0x3   :  { %128 = vmatprep.subr.bf16.mxu0 %v138_v0  ;;  %v29_v5 = vpack.c.bf16 %v28_v4, %v27_v3  ;;  %v122_v14 = vld [vmem:[%s201_s2] ss:$0 sm:$0xff]  ;;  %v110_v20 = vld [vmem:[%s202_s3 + $0x8] sm:$0xff] }
   0x4   :  { %v109_v16 = vld [vmem:[%s202_s3] sm:$0xff] }
   0x6   :  { %129 = vmatpush3.bf16.msra.mxu0 %v137_v2 }
   0x8   :  { %v25_v6 = vld [vmem:[#allocation2] sm:$0xff]  ;;  %v26_v10 = vld [vmem:[#allocation2 + $0x8] sm:$0xff] }
   0x9   :  { %131 = vmatmul.mubr.msk.bf16.vlgmr.msra.gmra.mxu0 %vm22_vm0, %v29_v5 }
  0xc9   :  { %v84_v7 = vpop.f32.mrf.mxu0 }
  0xca   :  { %v91_v8 = vadd.f32 %v84_v7, %v25_v6 }
  0xcb   :  { %v132_v9 = vpop.f32.mrf.mxu0 }
  0xcc   :  { %93 = vst.msk [vmem:[#allocation2] sm:$0xff] %vm22_vm0, %v91_v8 }
  0xcd   :  { %v87_v11 = vpop.f32.mrf.mxu0 }
  0xce   :  { %v92_v12 = vadd.f32 %v87_v11, %v26_v10 }
  0xcf   :  { %v133_v13 = vpop.f32.mrf.mxu0 }
  0xd0   :  { %94 = vst.msk [vmem:[#allocation2 + $0x8] sm:$0xff] %vm22_vm0, %v92_v12 }
  0xd3   :  { %v98_v15 = vld [vmem:[#allocation2] sm:$0xff] }
  0xd4   :  { %v107_v17 = vadd.f32 %v122_v14, %v98_v15 }
  0xd6   :  { %v111_v18 = vadd.f32 %v109_v16, %v107_v17 }
  0xd7   :  { %v99_v19 = vld [vmem:[#allocation2 + $0x8] sm:$0xff] }
  0xd8   :  { %113 = vst.msk [vmem:[%s203_s4] sm:$0xff] %vm22_vm0, %v111_v18  ;;  %v108_v21 = vadd.f32 %v122_v14, %v99_v19 }
  0xda   :  { %v112_v22 = vadd.f32 %v110_v20, %v108_v21 }
  0xdc   :  { %114 = vst.msk [vmem:[%s203_s4 + $0x8] sm:$0xff] %vm22_vm0, %v112_v22 }

// kernel: transformer_no_embed_forward.42
= control target key start
LH: loop header
LB: loop body
LE: loop exit
PB: predicated region body
PF: predicated region fallthrough
CT: control target
= control target key end

     0   :  { %s1425_s12 = smov 0   ;;  %s1630_s0 = inlined_call_operand.vmem [shape: f32[2,8,8,4], index: 0, kind: input, shape index: {}]   ;;  %s1631_s1 = inlined_call_operand.vmem [shape: f32[2,8,8,4], index: 1, kind: input, shape index: {}]   ;;  %s1632_s2 = inlined_call_operand.vmem [shape: f32[2,8,8,4], index: 2, kind: input, shape index: {}]   ;;  %s1633_s3 = inlined_call_operand.vmem [shape: f32[2,8,8,4], index: 3, kind: output, shape index: {}]  }
   0x1 LB: > { %s1190_s13 = sadd.s32 4294967295, %s1401_s12   ;;  %p1194_p0 = scmp.ge.s32.totalorder %s1401_s12, 1  ;;  %s1401_s12 = sphi %s1425_s12, %s13_s12  }
   0x2   : > { %p157_p1 = scmp.lt.s32.totalorder %s1401_s12, 3 }
   0x4   : > { %p158_p2 = pnand %p1194_p0, %p157_p1 }
   0x5   : > { %p191_p3 = scmp.lt.s32.totalorder (!%p158_p2), %s1190_s13, 1 }
   0x6   : > { %161 = sbr.rel (%p158_p2) target bundleno = 761 (0x2f9), region = 32 }
   0xb   : > { %v1403_v0 = vmov 0.0   ;;  %s1635_s13 = smov (!%p191_p3, %s1190_s13), 1  ;;  %vm1404_vm0 = vmmov 0   ;;  %vm252_vm1 = vcmask 31744   ;;  %vm629_vm2 = vcmask 64512  }
   0xc   : > { %1257 = vmatprep.subr.bf16.mxu0 %v1403_v0  ;;  %1263 = vmatprep.subr.bf16.mxu1 %v1403_v0  ;;  %s1439_s14 = sshll.u32 %s1635_s13, 6  ;;  %vm737_vm3 = vcmask 1043456  }
   0xd   : > { %1259 = vmatprep.mubr.msk.bf16.mxu0 %vm1404_vm0, %v1403_v0  ;;  %1265 = vmatprep.mubr.msk.bf16.mxu1 %vm1404_vm0, %v1403_v0  ;;  %s1445_s17 = scalar_lea.vmem %s1631_s1, %s1439_s14  ;;  %s1453_s20 = scalar_lea.vmem %s1630_s0, %s1439_s14 }
   0xe   : > { %v220_v1 = vld [vmem:[%s1445_s17] sm:$0xff]  ;;  %v221_v2 = vld [vmem:[%s1445_s17 + $0x8] sm:$0xff]  ;;  %v222_v5 = vld [vmem:[%s1445_s17 + $0x10] sm:$0xff]  ;;  %s1545_s23 = scalar_lea.vmem %s1632_s2, %s1439_s14  ;;  %s1609_s26 = scalar_lea.vmem %s1633_s3, %s1439_s14 }
   0xf   : > { %v244_v3 = vpack.c.bf16 %v220_v1, %v220_v1  ;;  %v245_v4 = vpack.c.bf16 %v221_v2, %v221_v2  ;;  %v223_v6 = vld [vmem:[%s1445_s17 + $0x18] sm:$0xff]  ;;  %v212_v9 = vld [vmem:[%s1453_s20] sm:$0xff]  ;;  %v213_v10 = vld [vmem:[%s1453_s20 + $0x8] sm:$0xff]  ;;  %v246_v11 = vpack.c.bf16 %v222_v5, %v222_v5 }
  0x10   : > { %v247_v12 = vpack.c.bf16 %v223_v6, %v223_v6  ;;  %v236_v13 = vpack.c.bf16 %v212_v9, %v212_v9  ;;  %v237_v14 = vpack.c.bf16 %v213_v10, %v213_v10  ;;  %v224_v17 = vld [vmem:[%s1445_s17 + $0x20] sm:$0xff]  ;;  %v225_v18 = vld [vmem:[%s1445_s17 + $0x28] sm:$0xff]  ;;  %v214_v19 = vld [vmem:[%s1453_s20 + $0x10] sm:$0xff] }
  0x11   : > { %v257_v7 = vsel %vm252_vm1, %v244_v3, 0  ;;  %v303_v8 = vsel %vm252_vm1, %v245_v4, 0  ;;  %v349_v15 = vsel %vm252_vm1, %v246_v11, 0  ;;  %v215_v20 = vld [vmem:[%s1453_s20 + $0x18] sm:$0xff]  ;;  %v248_v21 = vpack.c.bf16 %v224_v17, %v224_v17  ;;  %v226_v27 = vld [vmem:[%s1445_s17 + $0x30] sm:$0xff]  ;;  %v216_v29 = vld [vmem:[%s1453_s20 + $0x20] sm:$0xff] }
  0x12   : > { %1258 = vmatpush3.bf16.xpose.msra.mxu0 %v257_v7  ;;  %1264 = vmatpush3.bf16.xpose.msra.mxu1 %v303_v8  ;;  %v395_v16 = vsel %vm252_vm1, %v247_v12, 0  ;;  %v249_v22 = vpack.c.bf16 %v225_v18, %v225_v18  ;;  %v238_v23 = vpack.c.bf16 %v214_v19, %v214_v19  ;;  %v239_v24 = vpack.c.bf16 %v215_v20, %v215_v20  ;;  %v227_v28 = vld [vmem:[%s1445_s17 + $0x38] sm:$0xff]  ;;  %v217_v30 = vld [vmem:[%s1453_s20 + $0x28] sm:$0xff]  ;;  %v218_v37 = vld [vmem:[%s1453_s20 + $0x30] sm:$0xff] }
  0x13   : > { %1269 = vmatprep.subr.bf16.mxu0 %v1403_v0  ;;  %1275 = vmatprep.subr.bf16.mxu1 %v1403_v0  ;;  %v441_v25 = vsel %vm252_vm1, %v248_v21, 0  ;;  %v250_v31 = vpack.c.bf16 %v226_v27, %v226_v27  ;;  %v251_v32 = vpack.c.bf16 %v227_v28, %v227_v28  ;;  %v240_v33 = vpack.c.bf16 %v216_v29, %v216_v29  ;;  %v219_v38 = vld [vmem:[%s1453_s20 + $0x38] sm:$0xff] }
  0x14   : > { %v487_v26 = vsel %vm252_vm1, %v249_v22, 0  ;;  %v241_v34 = vpack.c.bf16 %v217_v30, %v217_v30  ;;  %v242_v39 = vpack.c.bf16 %v218_v37, %v218_v37  ;;  %v243_v40 = vpack.c.bf16 %v219_v38, %v219_v38 }
  0x15   : > { %v533_v35 = vsel %vm252_vm1, %v250_v31, 0  ;;  %v579_v36 = vsel %vm252_vm1, %v251_v32, 0 }
  0x19   : > { %1260 = vmatmul.mubr.msk.bf16.vlgmr.msra.gmra.mxu0 %vm252_vm1, %v236_v13  ;;  %1266 = vmatmul.mubr.msk.bf16.vlgmr.msra.gmra.mxu1 %vm252_vm1, %v237_v14 }
  0x1a   : > { %1270 = vmatpush3.bf16.xpose.msra.mxu0 %v349_v15  ;;  %1276 = vmatpush3.bf16.xpose.msra.mxu1 %v395_v16 }
  0x1b   : > { %1271 = vmatprep.mubr.msk.bf16.mxu0 %vm1404_vm0, %v1403_v0  ;;  %1277 = vmatprep.mubr.msk.bf16.mxu1 %vm1404_vm0, %v1403_v0 }
  0x1c   : > { %1281 = vmatprep.subr.bf16.mxu0 %v1403_v0  ;;  %1287 = vmatprep.subr.bf16.mxu1 %v1403_v0 }
  0x21   : > { %1272 = vmatmul.mubr.msk.bf16.vlgmr.msra.gmra.mxu0 %vm252_vm1, %v238_v23  ;;  %1278 = vmatmul.mubr.msk.bf16.vlgmr.msra.gmra.mxu1 %vm252_vm1, %v239_v24 }
  0x22   : > { %1282 = vmatpush3.bf16.xpose.msra.mxu0 %v441_v25  ;;  %1288 = vmatpush3.bf16.xpose.msra.mxu1 %v487_v26 }
  0x23   : > { %1283 = vmatprep.mubr.msk.bf16.mxu0 %vm1404_vm0, %v1403_v0  ;;  %1289 = vmatprep.mubr.msk.bf16.mxu1 %vm1404_vm0, %v1403_v0 }
  0x24   : > { %1293 = vmatprep.subr.bf16.mxu0 %v1403_v0  ;;  %1299 = vmatprep.subr.bf16.mxu1 %v1403_v0 }
  0x29   : > { %1284 = vmatmul.mubr.msk.bf16.vlgmr.msra.gmra.mxu0 %vm252_vm1, %v240_v33  ;;  %1290 = vmatmul.mubr.msk.bf16.vlgmr.msra.gmra.mxu1 %vm252_vm1, %v241_v34 }
  0x2a   : > { %1294 = vmatpush3.bf16.xpose.msra.mxu0 %v533_v35  ;;  %1300 = vmatpush3.bf16.xpose.msra.mxu1 %v579_v36 }
  0x2b   : > { %1295 = vmatprep.mubr.msk.bf16.mxu0 %vm1404_vm0, %v1403_v0  ;;  %1301 = vmatprep.mubr.msk.bf16.mxu1 %vm1404_vm0, %v1403_v0 }
  0x2c   : > { %1305 = vmatprep.subr.bf16.mxu0 %v1403_v0  ;;  %1311 = vmatprep.subr.bf16.mxu1 %v1403_v0 }
  0x31   : > { %1296 = vmatmul.mubr.msk.bf16.vlgmr.msra.gmra.mxu0 %vm252_vm1, %v242_v39  ;;  %1302 = vmatmul.mubr.msk.bf16.vlgmr.msra.gmra.mxu1 %vm252_vm1, %v243_v40 }
  0x32   : > { %1307 = vmatprep.mubr.msk.bf16.mxu0 %vm1404_vm0, %v1403_v0  ;;  %1313 = vmatprep.mubr.msk.bf16.mxu1 %vm1404_vm0, %v1403_v0 }
  0xd9   : > { %v293_v41 = vpop.f32.mrf.mxu0  ;;  %v339_v42 = vpop.f32.mrf.mxu1 }
  0xda   : > { %v621_v43 = vmul.f32 0.5, %v293_v41  ;;  %v622_v44 = vmul.f32 0.5, %v339_v42 }
  0xdb   : > { %v1261_v45 = vpop.f32.mrf.mxu0  ;;  %v1267_v46 = vpop.f32.mrf.mxu1 }
  0xdc   : > { %v630_v47 = vsel %vm629_vm2, %v621_v43, -inf  ;;  %v633_v50 = vsel %vm629_vm2, %v622_v44, -inf }
  0xdd   : > { %v342_v48 = vpop.f32.mrf.mxu1  ;;  %631 = vmax.xlane.f32.xlu0 %v630_v47  ;;  %v296_v49 = vpop.f32.mrf.mxu0 }
  0xdf   : > { %v1262_v51 = vpop.f32.mrf.mxu0  ;;  %v1268_v52 = vpop.f32.mrf.mxu1 }
  0xe1   : > { %v431_v53 = vpop.f32.mrf.mxu1  ;;  %634 = vmax.xlane.f32.xlu0 %v633_v50  ;;  %v385_v54 = vpop.f32.mrf.mxu0 }
  0xe2   : > { %v624_v55 = vmul.f32 0.5, %v431_v53  ;;  %v623_v56 = vmul.f32 0.5, %v385_v54 }
  0xe3   : > { %v1273_v57 = vpop.f32.mrf.mxu0  ;;  %v1279_v58 = vpop.f32.mrf.mxu1 }
  0xe4   : > { %v636_v59 = vsel %vm629_vm2, %v623_v56, -inf  ;;  %v639_v62 = vsel %vm629_vm2, %v624_v55, -inf }
  0xe5   : > { %v434_v60 = vpop.f32.mrf.mxu1  ;;  %637 = vmax.xlane.f32.xlu1 %v636_v59  ;;  %v388_v61 = vpop.f32.mrf.mxu0 }
  0xe7   : > { %v1274_v63 = vpop.f32.mrf.mxu0  ;;  %v1280_v1 = vpop.f32.mrf.mxu1 }
  0xe8   : > { %v228_v63 = vld [vmem:[%s1545_s23] sm:$0xff]  ;;  %v229_v1 = vld [vmem:[%s1545_s23 + $0x8] sm:$0xff] }
  0xe9   : > { %v523_v2 = vpop.f32.mrf.mxu1  ;;  %640 = vmax.xlane.f32.xlu1 %v639_v62  ;;  %v477_v3 = vpop.f32.mrf.mxu0 }
  0xea   : > { %v626_v4 = vmul.f32 0.5, %v523_v2  ;;  %v625_v5 = vmul.f32 0.5, %v477_v3 }
  0xeb   : > { %v1285_v6 = vpop.f32.mrf.mxu0  ;;  %v1291_v7 = vpop.f32.mrf.mxu1 }
  0xec   : > { %v645_v8 = vsel %vm629_vm2, %v626_v4, -inf  ;;  %v642_v9 = vsel %vm629_vm2, %v625_v5, -inf }
  0xed   : > { %v526_v10 = vpop.f32.mrf.mxu1  ;;  %646 = vmax.xlane.f32.xlu1 %v645_v8  ;;  %643 = vmax.xlane.f32.xlu0 %v642_v9  ;;  %v480_v11 = vpop.f32.mrf.mxu0  ;;  %v230_v9 = vld [vmem:[%s1545_s23 + $0x10] sm:$0xff] }
  0xee   : > { %v728_v10 = vpack.c.bf16 %v230_v9, %v230_v9  ;;  %v231_v11 = vld [vmem:[%s1545_s23 + $0x18] sm:$0xff] }
  0xef   : > { %v1286_v12 = vpop.f32.mrf.mxu0  ;;  %v1292_v13 = vpop.f32.mrf.mxu1 }
  0xf0   : > { %v729_v12 = vpack.c.bf16 %v231_v11, %v231_v11  ;;  %v831_v13 = vsel %vm737_vm3, %v728_v10, 0 }
  0xf1   : > { %v569_v14 = vpop.f32.mrf.mxu0  ;;  %v615_v15 = vpop.f32.mrf.mxu1 }
  0xf2   : > { %v627_v16 = vmul.f32 0.5, %v569_v14  ;;  %v628_v17 = vmul.f32 0.5, %v615_v15  ;;  %v877_v14 = vsel %vm737_vm3, %v729_v12, 0  ;;  %v232_v15 = vld [vmem:[%s1545_s23 + $0x20] sm:$0xff] }
  0xf3   : > { %v1297_v18 = vpop.f32.mrf.mxu0  ;;  %v1303_v19 = vpop.f32.mrf.mxu1 }
  0xf4   : > { %v651_v20 = vsel %vm629_vm2, %v628_v17, -inf  ;;  %v648_v21 = vsel %vm629_vm2, %v627_v16, -inf }
  0xf5   : > { %v618_v22 = vpop.f32.mrf.mxu1  ;;  %652 = vmax.xlane.f32.xlu1 %v651_v20  ;;  %649 = vmax.xlane.f32.xlu0 %v648_v21  ;;  %v572_v23 = vpop.f32.mrf.mxu0  ;;  %v234_v21 = vld [vmem:[%s1545_s23 + $0x30] sm:$0xff] }
  0xf6   : > { %v732_v22 = vpack.c.bf16 %v234_v21, %v234_v21  ;;  %v235_v23 = vld [vmem:[%s1545_s23 + $0x38] sm:$0xff] }
  0xf7   : > { %v1298_v24 = vpop.f32.mrf.mxu0  ;;  %v1304_v25 = vpop.f32.mrf.mxu1 }
  0xf8   : > { %v1015_v24 = vsel %vm737_vm3, %v732_v22, 0  ;;  %v733_v25 = vpack.c.bf16 %v235_v23, %v235_v23 }
 0x166   : > { %v632_v26 = vpop.xlane.xlu0 %631 }
 0x167   : > { %v654_v27 = vsub.f32 %v621_v43, %v632_v26  ;;  %v1061_v26 = vsel %vm737_vm3, %v733_v25, 0 }
 0x169   : > { %v662_v28 = vmul.f32 1.442695, %v654_v27 }
 0x16a   : > { %v635_v29 = vpop.xlane.xlu0 %634 }
 0x16b   : > { %1363 = vpow2.f32 %v662_v28  ;;  %v655_v30 = vsub.f32 %v622_v44, %v635_v29 }
 0x16d   : > { %v664_v31 = vmul.f32 1.442695, %v655_v30 }
 0x16e   : > { %v638_v32 = vpop.xlane.xlu1 %637 }
 0x16f   : > { %1365 = vpow2.f32 %v664_v31  ;;  %v656_v33 = vsub.f32 %v623_v56, %v638_v32 }
 0x171   : > { %v666_v34 = vmul.f32 1.442695, %v656_v33 }
 0x172   : > { %v641_v35 = vpop.xlane.xlu1 %640 }
 0x173   : > { %1367 = vpow2.f32 %v666_v34  ;;  %v657_v36 = vsub.f32 %v624_v55, %v641_v35 }
 0x175   : > { %v668_v37 = vmul.f32 1.442695, %v657_v36 }
 0x176   : > { %v647_v38 = vpop.xlane.xlu1 %646  ;;  %v644_v39 = vpop.xlane.xlu0 %643 }
 0x177   : > { %1369 = vpow2.f32 %v668_v37  ;;  %v659_v40 = vsub.f32 %v626_v4, %v647_v38  ;;  %v658_v41 = vsub.f32 %v625_v5, %v644_v39  ;;  %v726_v4 = vpack.c.bf16 %v228_v63, %v228_v63 }
 0x178   : > { %v1517_v42 = vpop.eup %1363  ;;  %v727_v5 = vpack.c.bf16 %v229_v1, %v229_v1 }
 0x179   : > { %v672_v43 = vmul.f32 1.442695, %v659_v40  ;;  %v670_v45 = vmul.f32 1.442695, %v658_v41  ;;  %v678_v44 = vsel %vm629_vm2, %v1517_v42, 0.0  ;;  %v739_v7 = vsel %vm737_vm3, %v726_v4, 0 }
 0x17a   : > { %679 = vadd.xlane.f32.xlu0 %v678_v44  ;;  %v785_v8 = vsel %vm737_vm3, %v727_v5, 0  ;;  %1306 = vmatpush3.bf16.msra.mxu0 %v739_v7 }
 0x17b   : > { %1371 = vpow2.f32 %v672_v43  ;;  %1312 = vmatpush3.bf16.msra.mxu1 %v785_v8  ;;  %1317 = vmatprep.subr.bf16.mxu0 %v1403_v0 }
 0x17c   : > { %v1521_v46 = vpop.eup %1365  ;;  %1373 = vpow2.f32 %v670_v45  ;;  %1323 = vmatprep.subr.bf16.mxu1 %v1403_v0 }
 0x17d   : > { %v681_v47 = vsel %vm629_vm2, %v1521_v46, 0.0 }
 0x17e   : > { %682 = vadd.xlane.f32.xlu1 %v681_v47  ;;  %v653_v48 = vpop.xlane.xlu1 %652  ;;  %v650_v49 = vpop.xlane.xlu0 %649 }
 0x17f   : > { %v661_v50 = vsub.f32 %v628_v17, %v653_v48  ;;  %v660_v51 = vsub.f32 %v627_v16, %v650_v49  ;;  %v730_v16 = vpack.c.bf16 %v232_v15, %v232_v15  ;;  %v233_v17 = vld [vmem:[%s1545_s23 + $0x28] sm:$0xff] }
 0x180   : > { %v1525_v52 = vpop.eup %1367  ;;  %v731_v19 = vpack.c.bf16 %v233_v17, %v233_v17 }
 0x181   : > { %v676_v53 = vmul.f32 1.442695, %v661_v50  ;;  %v674_v54 = vmul.f32 1.442695, %v660_v51  ;;  %v684_v55 = vsel %vm629_vm2, %v1525_v52, 0.0  ;;  %v923_v18 = vsel %vm737_vm3, %v730_v16, 0 }
 0x182   : > { %685 = vadd.xlane.f32.xlu0 %v684_v55  ;;  %v969_v20 = vsel %vm737_vm3, %v731_v19, 0 }
 0x183   : > { %1375 = vpow2.f32 %v676_v53 }
 0x184   : > { %v1529_v56 = vpop.eup %1369  ;;  %1377 = vpow2.f32 %v674_v54 }
 0x185   : > { %v687_v57 = vsel %vm629_vm2, %v1529_v56, 0.0 }
 0x186   : > { %688 = vadd.xlane.f32.xlu1 %v687_v57 }
 0x188   : > { %v1533_v58 = vpop.eup %1371 }
 0x189   : > { %v1535_v59 = vpop.eup %1373  ;;  %v693_v60 = vsel %vm629_vm2, %v1533_v58, 0.0 }
 0x18a   : > { %694 = vadd.xlane.f32.xlu1 %v693_v60  ;;  %v690_v61 = vsel %vm629_vm2, %v1535_v59, 0.0 }
 0x18b   : > { %691 = vadd.xlane.f32.xlu0 %v690_v61 }
 0x190   : > { %v1547_v62 = vpop.eup %1375 }
 0x191   : > { %v1551_v2 = vpop.eup %1377  ;;  %v699_v3 = vsel %vm629_vm2, %v1547_v62, 0.0 }
 0x192   : > { %700 = vadd.xlane.f32.xlu1 %v699_v3  ;;  %v696_v6 = vsel %vm629_vm2, %v1551_v2, 0.0 }
 0x193   : > { %697 = vadd.xlane.f32.xlu0 %v696_v6 }
 0x203   : > { %v680_v27 = vpop.xlane.xlu0 %679 }
 0x204   : > { %1379 = vrcp.f32 %v680_v27 }
 0x207   : > { %v683_v28 = vpop.xlane.xlu1 %682 }
 0x208   : > { %1381 = vrcp.f32 %v683_v28 }
 0x20b   : > { %v686_v29 = vpop.xlane.xlu0 %685 }
 0x20c   : > { %1383 = vrcp.f32 %v686_v29 }
 0x20f   : > { %v689_v30 = vpop.xlane.xlu1 %688 }
 0x210   : > { %1385 = vrcp.f32 %v689_v30 }
 0x211   : > { %v1380_v31 = vpop.eup %1379 }
 0x212   : > { %v710_v32 = vmul.f32 %v1380_v31, %v1517_v42 }
 0x213   : > { %v695_v33 = vpop.xlane.xlu1 %694 }
 0x214   : > { %1387 = vrcp.f32 %v695_v33  ;;  %v692_v34 = vpop.xlane.xlu0 %691  ;;  %v718_v35 = vpack.c.bf16 %v710_v32, %v710_v32 }
 0x215   : > { %v1382_v36 = vpop.eup %1381  ;;  %1389 = vrcp.f32 %v692_v34 }
 0x216   : > { %1308 = vmatmul.mubr.msk.bf16.vlgmr.msra.gmra.mxu0 %vm629_vm2, %v718_v35  ;;  %v711_v37 = vmul.f32 %v1382_v36, %v1521_v46 }
 0x217   : > { %1318 = vmatpush3.bf16.msra.mxu0 %v831_v13  ;;  %1319 = vmatprep.mubr.msk.bf16.mxu0 %vm1404_vm0, %v1403_v0 }
 0x218   : > { %v719_v38 = vpack.c.bf16 %v711_v37, %v711_v37  ;;  %1329 = vmatprep.subr.bf16.mxu0 %v1403_v0 }
 0x219   : > { %v1384_v39 = vpop.eup %1383 }
 0x21a   : > { %1314 = vmatmul.mubr.msk.bf16.vlgmr.msra.gmra.mxu1 %vm629_vm2, %v719_v38  ;;  %v712_v40 = vmul.f32 %v1384_v39, %v1525_v52 }
 0x21b   : > { %1324 = vmatpush3.bf16.msra.mxu1 %v877_v14  ;;  %v701_v41 = vpop.xlane.xlu1 %700  ;;  %1325 = vmatprep.mubr.msk.bf16.mxu1 %vm1404_vm0, %v1403_v0 }
 0x21c   : > { %1391 = vrcp.f32 %v701_v41  ;;  %v698_v42 = vpop.xlane.xlu0 %697  ;;  %v720_v43 = vpack.c.bf16 %v712_v40, %v712_v40  ;;  %1335 = vmatprep.subr.bf16.mxu1 %v1403_v0 }
 0x21d   : > { %v1386_v45 = vpop.eup %1385  ;;  %1393 = vrcp.f32 %v698_v42 }
 0x21e   : > { %1320 = vmatmul.mubr.msk.bf16.vlgmr.msra.gmra.mxu0 %vm629_vm2, %v720_v43  ;;  %v713_v44 = vmul.f32 %v1386_v45, %v1529_v56 }
 0x21f   : > { %1330 = vmatpush3.bf16.msra.mxu0 %v923_v18  ;;  %1331 = vmatprep.mubr.msk.bf16.mxu0 %vm1404_vm0, %v1403_v0 }
 0x220   : > { %v721_v46 = vpack.c.bf16 %v713_v44, %v713_v44  ;;  %1341 = vmatprep.subr.bf16.mxu0 %v1403_v0 }
 0x221   : > { %v1388_v47 = vpop.eup %1387 }
 0x222   : > { %v1390_v48 = vpop.eup %1389  ;;  %1326 = vmatmul.mubr.msk.bf16.vlgmr.msra.gmra.mxu1 %vm629_vm2, %v721_v46  ;;  %v715_v50 = vmul.f32 %v1388_v47, %v1533_v58 }
 0x223   : > { %1336 = vmatpush3.bf16.msra.mxu1 %v969_v20  ;;  %v714_v49 = vmul.f32 %v1390_v48, %v1535_v59  ;;  %1337 = vmatprep.mubr.msk.bf16.mxu1 %vm1404_vm0, %v1403_v0 }
 0x224   : > { %1347 = vmatprep.subr.bf16.mxu1 %v1403_v0  ;;  %v723_v52 = vpack.c.bf16 %v715_v50, %v715_v50 }
 0x225   : > { %v722_v51 = vpack.c.bf16 %v714_v49, %v714_v49 }
 0x227   : > { %1332 = vmatmul.mubr.msk.bf16.vlgmr.msra.gmra.mxu0 %vm629_vm2, %v722_v51 }
 0x228   : > { %1342 = vmatpush3.bf16.msra.mxu0 %v1015_v24  ;;  %1343 = vmatprep.mubr.msk.bf16.mxu0 %vm1404_vm0, %v1403_v0 }
 0x229   : > { %v1392_v53 = vpop.eup %1391 }
 0x22a   : > { %v1394_v54 = vpop.eup %1393  ;;  %1338 = vmatmul.mubr.msk.bf16.vlgmr.msra.gmra.mxu1 %vm629_vm2, %v723_v52  ;;  %v717_v56 = vmul.f32 %v1392_v53, %v1547_v62 }
 0x22b   : > { %1348 = vmatpush3.bf16.msra.mxu1 %v1061_v26  ;;  %v716_v55 = vmul.f32 %v1394_v54, %v1551_v2  ;;  %1349 = vmatprep.mubr.msk.bf16.mxu1 %vm1404_vm0, %v1403_v0 }
 0x22c   : > { %v725_v58 = vpack.c.bf16 %v717_v56, %v717_v56 }
 0x22d   : > { %v724_v57 = vpack.c.bf16 %v716_v55, %v716_v55 }
 0x22f   : > { %1344 = vmatmul.mubr.msk.bf16.vlgmr.msra.gmra.mxu0 %vm629_vm2, %v724_v57 }
 0x232   : > { %1350 = vmatmul.mubr.msk.bf16.vlgmr.msra.gmra.mxu1 %vm629_vm2, %v725_v58 }
 0x2d6   : > { %v775_v59 = vpop.f32.mrf.mxu0 }
 0x2d7   : > { %1103 = vst.msk [vmem:[%s1609_s26] sm:$0xff] %vm252_vm1, %v775_v59 }
 0x2d8   : > { %v1309_v0 = vpop.f32.mrf.mxu0 }
 0x2da   : > { %v778_v60 = vpop.f32.mrf.mxu0  ;;  %v821_v61 = vpop.f32.mrf.mxu1 }
 0x2db   : > { %1104 = vst.msk [vmem:[%s1609_s26 + $0x8] sm:$0xff] %vm252_vm1, %v821_v61 }
 0x2dc   : > { %v1310_v62 = vpop.f32.mrf.mxu0  ;;  %v1315_v63 = vpop.f32.mrf.mxu1 }
 0x2de   : > { %v824_v1 = vpop.f32.mrf.mxu1  ;;  %v867_v2 = vpop.f32.mrf.mxu0 }
 0x2df   : > { %1105 = vst.msk [vmem:[%s1609_s26 + $0x10] sm:$0xff] %vm252_vm1, %v867_v2 }
 0x2e0   : > { %v1316_v3 = vpop.f32.mrf.mxu1  ;;  %v1321_v4 = vpop.f32.mrf.mxu0 }
 0x2e2   : > { %v870_v5 = vpop.f32.mrf.mxu0  ;;  %v913_v6 = vpop.f32.mrf.mxu1 }
 0x2e3   : > { %1106 = vst.msk [vmem:[%s1609_s26 + $0x18] sm:$0xff] %vm252_vm1, %v913_v6 }
 0x2e4   : > { %v1322_v7 = vpop.f32.mrf.mxu0  ;;  %v1327_v8 = vpop.f32.mrf.mxu1 }
 0x2e6   : > { %v916_v9 = vpop.f32.mrf.mxu1 }
 0x2e7   : > { %v959_v10 = vpop.f32.mrf.mxu0 }
 0x2e8   : > { %1107 = vst.msk [vmem:[%s1609_s26 + $0x20] sm:$0xff] %vm252_vm1, %v959_v10  ;;  %v1328_v11 = vpop.f32.mrf.mxu1 }
 0x2e9   : > { %v1333_v12 = vpop.f32.mrf.mxu0 }
 0x2ea   : > { %v1005_v13 = vpop.f32.mrf.mxu1 }
 0x2eb   : > { %v962_v14 = vpop.f32.mrf.mxu0  ;;  %1108 = vst.msk [vmem:[%s1609_s26 + $0x28] sm:$0xff] %vm252_vm1, %v1005_v13 }
 0x2ec   : > { %v1339_v15 = vpop.f32.mrf.mxu1 }
 0x2ed   : > { %v1334_v16 = vpop.f32.mrf.mxu0 }
 0x2ee   : > { %v1008_v17 = vpop.f32.mrf.mxu1 }
 0x2ef   : > { %v1051_v18 = vpop.f32.mrf.mxu0 }
 0x2f0   : > { %1109 = vst.msk [vmem:[%s1609_s26 + $0x30] sm:$0xff] %vm252_vm1, %v1051_v18  ;;  %v1340_v19 = vpop.f32.mrf.mxu1 }
 0x2f1   : > { %v1345_v20 = vpop.f32.mrf.mxu0 }
 0x2f2   : > { %v1097_v21 = vpop.f32.mrf.mxu1 }
 0x2f3   : > { %v1054_v22 = vpop.f32.mrf.mxu0  ;;  %1110 = vst.msk [vmem:[%s1609_s26 + $0x38] sm:$0xff] %vm252_vm1, %v1097_v21 }
 0x2f4   : > { %v1351_v23 = vpop.f32.mrf.mxu1 }
 0x2f5   : > { %v1346_v24 = vpop.f32.mrf.mxu0 }
 0x2f6   : > { %v1100_v25 = vpop.f32.mrf.mxu1 }
 0x2f8   : > { %v1352_v26 = vpop.f32.mrf.mxu1 }
 0x2f9 PF: > { %s13_s12 = sadd.s32 1, %s1401_s12  }
 0x2fa   : > { %p10_p4 = scmp.ge.s32.totalorder %s13_s12, 4  }
 0x2fc   :  { %12 = sbr.rel (!%p10_p4) target bundleno = 1 (0x1), region = 68 }

// kernel: transformer_no_embed_forward.44
= control target key start
LH: loop header
LB: loop body
LE: loop exit
PB: predicated region body
PF: predicated region fallthrough
CT: control target
= control target key end

     0   :  { %vm16_vm0 = vcmask 261120   ;;  %s118_s0 = inlined_call_operand.vmem [shape: f32[16,32], index: 0, kind: input, shape index: {}]   ;;  %s119_s1 = inlined_call_operand.vmem [shape: f32[1,32], index: 1, kind: input, shape index: {}]   ;;  %s120_s2 = inlined_call_operand.vmem [shape: f32[1,32], index: 2, kind: input, shape index: {}]   ;;  %s121_s3 = inlined_call_operand.vmem [shape: f32[16,32], index: 3, kind: output, shape index: {}]  }
   0x1   :  { %v14_v0 = vld [vmem:[%s118_s0] sm:$0xff]  ;;  %v15_v1 = vld [vmem:[%s118_s0 + $0x8] sm:$0xff] }
   0x2   :  { %v17_v2 = vsel %vm16_vm0, %v14_v0, 0.0  ;;  %v20_v3 = vsel %vm16_vm0, %v15_v1, 0.0  ;;  %v68_v21 = vld [vmem:[%s119_s1] ss:$0 sm:$0xff] }
   0x3   :  { %18 = vadd.xlane.f32.xlu0 %v17_v2  ;;  %v69_v23 = vld [vmem:[%s120_s2] ss:$0 sm:$0xff] }
   0x7   :  { %21 = vadd.xlane.f32.xlu0 %v20_v3 }
  0x8c   :  { %v19_v4 = vpop.xlane.xlu0 %18 }
  0x8d   :  { %v24_v5 = vmul.f32 0.03125, %v19_v4 }
  0x8f   :  { %v26_v6 = vsub.f32 %v14_v0, %v24_v5 }
  0x90   :  { %v22_v7 = vpop.xlane.xlu0 %21 }
  0x91   :  { %v25_v8 = vmul.f32 0.03125, %v22_v7  ;;  %v28_v9 = vmul.f32 %v26_v6, %v26_v6 }
  0x93   :  { %v27_v10 = vsub.f32 %v15_v1, %v25_v8  ;;  %v30_v11 = vsel %vm16_vm0, %v28_v9, 0.0 }
  0x94   :  { %31 = vadd.xlane.f32.xlu1 %v30_v11 }
  0x95   :  { %v29_v12 = vmul.f32 %v27_v10, %v27_v10 }
  0x97   :  { %v33_v13 = vsel %vm16_vm0, %v29_v12, 0.0 }
  0x98   :  { %34 = vadd.xlane.f32.xlu1 %v33_v13 }
 0x11d   :  { %v32_v14 = vpop.xlane.xlu1 %31 }
 0x11e   :  { %v36_v15 = vmul.f32 0.03125, %v32_v14 }
 0x120   :  { %v38_v16 = vadd.f32 1e-12, %v36_v15 }
 0x121   :  { %v35_v17 = vpop.xlane.xlu1 %34 }
 0x122   :  { %70 = vrsqrt.f32 %v38_v16  ;;  %v37_v18 = vmul.f32 0.03125, %v35_v17 }
 0x124   :  { %v39_v19 = vadd.f32 1e-12, %v37_v18 }
 0x126   :  { %72 = vrsqrt.f32 %v39_v19 }
 0x12f   :  { %v71_v20 = vpop.eup %70 }
 0x130   :  { %v42_v22 = vmul.f32 %v71_v20, %v26_v6 }
 0x132   :  { %v51_v24 = vmul.f32 %v68_v21, %v42_v22 }
 0x133   :  { %v73_v25 = vpop.eup %72 }
 0x134   :  { %v60_v26 = vadd.f32 %v69_v23, %v51_v24  ;;  %v43_v27 = vmul.f32 %v73_v25, %v27_v10 }
 0x136   :  { %62 = vst.msk [vmem:[%s121_s3] sm:$0xff] %vm16_vm0, %v60_v26  ;;  %v52_v28 = vmul.f32 %v68_v21, %v43_v27 }
 0x138   :  { %v61_v29 = vadd.f32 %v69_v23, %v52_v28 }
 0x13a   :  { %63 = vst.msk [vmem:[%s121_s3 + $0x8] sm:$0xff] %vm16_vm0, %v61_v29 }

// kernel: transformer_no_embed_forward.45
= control target key start
LH: loop header
LB: loop body
LE: loop exit
PB: predicated region body
PF: predicated region fallthrough
CT: control target
= control target key end

     0   :  { %s852_s12 = smov 0   ;;  %s854_s13 = smov 0   ;;  %s956_s0 = inlined_call_operand.vmem [shape: f32[16,32], index: 0, kind: input, shape index: {}]   ;;  %s957_s1 = inlined_call_operand.vmem [shape: bf16[32,3072], index: 1, kind: input, shape index: {}]   ;;  %s958_s2 = inlined_call_operand.vmem [shape: f32[1,3072], index: 2, kind: input, shape index: {}]   ;;  %s959_s3 = inlined_call_operand.vmem [shape: f32[16,3072], index: 3, kind: output, shape index: {}]  }
   0x1   :  { %s856_s14 = smov 0   ;;  %s858_s15 = smov 0  }
   0x2   :  { %s860_s16 = smov 0  }
   0x3 LB: > { %s28_s17 = sadd.s32 1, %s825_s15  ;;  %s693_s18 = sadd.s32 4294967295, %s829_s16   ;;  %s829_s16 = sphi %s860_s16, %s13_s16   ;;  %s825_s15 = sphi %s858_s15, %s964_s15   ;;  %s821_s14 = sphi %s856_s14, %s963_s14   ;;  %s817_s13 = sphi %s854_s13, %s962_s13   ;;  %s813_s12 = sphi %s852_s12, %s961_s12  }
   0x4   : > { %p30_p0 = scmp.ge.s32.totalorder %s28_s17, 6  ;;  %p76_p1 = scmp.ne.s32.totalorder %s817_s13, %s813_s12 }
   0x5   : > { %p77_p2 = scmp.eq.s32.totalorder %s829_s16, 0  ;;  %p134_p4 = scmp.eq.s32.totalorder %s693_s18, 5 }
   0x6   : > { %s966_s17 = smov (%p30_p0, %s28_s17), 0  ;;  %s69_s20 = sadd.s32 1, %s817_s13 }
   0x7   : > { %p78_p3 = por %p77_p2, %p76_p1  ;;  %s65_s19 = ssub.s32 %s825_s15, %s966_s17 }
   0x8   : > { %p67_p5 = scmp.eq.s32.totalorder %s65_s19, 0  ;;  %p887_p6 = por %p134_p4, %p76_p1 }
   0x9   : > { %p697_p7 = scmp.ge.s32.totalorder %s829_s16, 6 }
   0xa   : > { %s892_s22 = scalar_select %p67_p5, %s817_s13, %s69_s20  }
   0xb   : > { %168 = sbr.rel (%p697_p7) target bundleno = 24 (0x18), region = 20 }
  0x10   : > { %171 = sbr.rel (!%p78_p3) target bundleno = 24 (0x18), region = 24  ;;  %s173_s23 = sand.u32 (%p78_p3), 1, %s817_s13  }
  0x11   : > { %s720_s24 = sshll.u32 (%p78_p3), %s825_s15, 4  ;;  %s698_s25 = sshll.u32 (%p78_p3), %s173_s23, 6 }
  0x12   : > { %s181_s28 = scalar_lea.vmem (%p78_p3), %s957_s1, %s720_s24  ;;  %s175_s29 = scalar_lea.vmem (%p78_p3), [#allocation3], %s698_s25 }
  0x13   : > { %v194_v0 = vld [vmem:[%s181_s28] sm:$0xff] (%p78_p3)  ;;  %v196_v1 = vld [vmem:[%s181_s28 + $0x8] sm:$0xff] (%p78_p3) }
  0x14   : > { %v198_v2 = vld [vmem:[%s181_s28 + $0x60] sm:$0xff] (%p78_p3)  ;;  %195 = vst [vmem:[%s175_s29] sm:$0xff] (%p78_p3), %v194_v0  ;;  %197 = vst [vmem:[%s175_s29 + $0x8] sm:$0xff] (%p78_p3), %v196_v1  ;;  %v200_v3 = vld [vmem:[%s181_s28 + $0x68] sm:$0xff] (%p78_p3) }
  0x15   : > { %199 = vst [vmem:[%s175_s29 + $0x10] sm:$0xff] %v198_v2  ;;  %v202_v4 = vld [vmem:[%s181_s28 + $0xc0] sm:$0xff]  ;;  %v204_v5 = vld [vmem:[%s181_s28 + $0xc8] sm:$0xff]  ;;  %201 = vst [vmem:[%s175_s29 + $0x18] sm:$0xff] %v200_v3 }
  0x16   : > { %203 = vst [vmem:[%s175_s29 + $0x20] sm:$0xff] %v202_v4  ;;  %205 = vst [vmem:[%s175_s29 + $0x28] sm:$0xff] %v204_v5  ;;  %v206_v6 = vld [vmem:[%s181_s28 + $0x120] sm:$0xff]  ;;  %v208_v7 = vld [vmem:[%s181_s28 + $0x128] sm:$0xff] }
  0x17   : > { %207 = vst [vmem:[%s175_s29 + $0x30] sm:$0xff] %v206_v6  ;;  %209 = vst [vmem:[%s175_s29 + $0x38] sm:$0xff] %v208_v7 }
  0x18 PF: > { %p701_p8 = scmp.ge.s32.totalorder %s829_s16, 1  ;;  %p222_p9 = scmp.lt.s32.totalorder %s829_s16, 7 }
  0x1a   : > { %p223_p10 = pnand %p701_p8, %p222_p9 }
  0x1b   : > { %s229_s30 = sand.u32 (!%p223_p10), 1, %s813_s12   ;;  %s704_s10 = sshll.u32 (!%p223_p10), %s821_s14, 2 }
  0x1c   : > { %226 = sbr.rel (%p223_p10) target bundleno = 274 (0x112), region = 51  ;;  %s903_s4 = sshll.u32 (!%p223_p10), %s229_s30, 6 }
  0x1d   : > { %s231_s5 = scalar_lea.vmem (!%p223_p10), [#allocation3], %s903_s4  ;;  %p275_p11 = scmp.lt.s32.totalorder (!%p223_p10), %s704_s10, 23 }
  0x1e   : > { %s917_s19 = scalar_lea.vmem (!%p223_p10), [#allocation4], %s903_s4 }
  0x21   : > { %v831_v8 = vmov 0   ;;  %v763_v9 = vld [vmem:[%s231_s5 + $0x24] ss:$16 sps:$4 sm:$0xff]   ;;  %v765_v10 = vld [vmem:[%s231_s5 + $0x2c] ss:$16 sps:$4 sm:$0xff]   ;;  %vm353_vm0 = vcmask 261120   ;;  %v472_v20 = vlaneseq }
  0x22   : > { %389 = vmatprep.mubr.bf16.mxu0 %v831_v8  ;;  %432 = vmatprep.mubr.bf16.mxu1 %v831_v8  ;;  %v767_v11 = vld [vmem:[%s231_s5 + $0x20] ss:$16 sps:$4 sm:$0xff]   ;;  %v768_v12 = vld [vmem:[%s231_s5 + $0x28] ss:$16 sps:$4 sm:$0xff]   ;;  %v769_v15 = vld [vmem:[%s231_s5 + $0x4] ss:$16 sps:$4 sm:$0xff]  }
  0x23   : > { %369 = vmatprep.subr.bf16.mxu0 %v763_v9  ;;  %v302_v13 = vld [vmem:[%s956_s0] sm:$0xff]  ;;  %v303_v14 = vld [vmem:[%s956_s0 + $0x8] sm:$0xff]  ;;  %412 = vmatprep.subr.bf16.mxu1 %v765_v10  ;;  %s968_s10 = smov (!%p275_p11, %s704_s10), 23  ;;  %v473_v21 = vshrl.u32 %v472_v20, 7  ;;  %s721_s20 = sshll.u32 (%p887_p6), %s821_s14, 5 }
  0x24   : > { %370 = vmatpush1.bf16.msra.mxu0 %v767_v11  ;;  %413 = vmatpush1.bf16.msra.mxu1 %v768_v12  ;;  %v771_v16 = vld [vmem:[%s231_s5 + $0xc] ss:$16 sps:$4 sm:$0xff]   ;;  %v773_v17 = vld [vmem:[%s231_s5] ss:$16 sps:$4 sm:$0xff]   ;;  %v774_v18 = vld [vmem:[%s231_s5 + $0x8] ss:$16 sps:$4 sm:$0xff]   ;;  %v304_v19 = vpack.c.bf16 %v303_v14, %v302_v13  ;;  %s277_s18 = scalar_lea.vmem %s958_s2, %s968_s10  ;;  %s560_s25 = scalar_lea.vmem (%p887_p6), %s959_s3, %s721_s20 }
  0x25   : > { %371 = vmatprep.subr.bf16.mxu0 %v769_v15  ;;  %414 = vmatprep.subr.bf16.mxu1 %v771_v16  ;;  %v474_v22 = vsub.s32 0, %v473_v21  ;;  %v482_v23 = vsub.s32 2, %v473_v21  ;;  %v470_v24 = vld [vmem:[%s277_s18] sm:$0xf]  ;;  %v478_v25 = vsub.s32 1, %v473_v21  ;;  %v486_v26 = vsub.s32 3, %v473_v21 }
  0x27   : > { %v475_v27 = vrot.slane %v470_v24, %v474_v22  ;;  %v483_v28 = vrot.slane %v470_v24, %v482_v23  ;;  %v479_v31 = vrot.slane %v470_v24, %v478_v25  ;;  %v487_v32 = vrot.slane %v470_v24, %v486_v26 }
  0x28   : > { %372 = vmatpush1.bf16.msra.mxu0 %v773_v17  ;;  %415 = vmatpush1.bf16.msra.mxu1 %v774_v18 }
  0x2b   : > { %713 = vmatmul.mubr.msk.bf16.vlgmr.msra.gmra.mxu0 %vm353_vm0, %v304_v19  ;;  %714 = vmatmul.mubr.msk.bf16.vlgmr.msra.gmra.mxu1 %vm353_vm0, %v304_v19 }
  0xeb   : > { %v391_v29 = vpop.f32.mrf.mxu0  ;;  %v434_v30 = vpop.f32.mrf.mxu1 }
  0xec   : > { %v492_v33 = vadd.f32 %v475_v27, %v391_v29  ;;  %v494_v34 = vadd.f32 %v483_v28, %v434_v30 }
  0xed   : > { %v393_v35 = vpop.f32.mrf.mxu0  ;;  %v436_v36 = vpop.f32.mrf.mxu1 }
  0xee   : > { %v508_v37 = vmul.f32 0.70710677, %v492_v33  ;;  %v510_v38 = vmul.f32 0.70710677, %v494_v34  ;;  %v493_v39 = vadd.f32 %v479_v31, %v393_v35  ;;  %v495_v40 = vadd.f32 %v487_v32, %v436_v36 }
  0xef   : > { %v395_v41 = vpop.f32.mrf.mxu0  ;;  %v438_v42 = vpop.f32.mrf.mxu1  ;;  %v500_v57 = vmul.f32 0.5, %v492_v33  ;;  %v502_v59 = vmul.f32 0.5, %v494_v34 }
  0xf0   : > { %775 = verf.f32 %v508_v37  ;;  %v496_v43 = vadd.f32 %v475_v27, %v395_v41  ;;  %v498_v44 = vadd.f32 %v483_v28, %v438_v42  ;;  %v509_v45 = vmul.f32 0.70710677, %v493_v39 }
  0xf1   : > { %777 = verf.f32 %v510_v38  ;;  %v397_v46 = vpop.f32.mrf.mxu0  ;;  %v440_v47 = vpop.f32.mrf.mxu1  ;;  %v511_v48 = vmul.f32 0.70710677, %v495_v40  ;;  %v501_v1 = vmul.f32 0.5, %v493_v39  ;;  %v503_v4 = vmul.f32 0.5, %v495_v40 }
  0xf2   : > { %v512_v49 = vmul.f32 0.70710677, %v496_v43  ;;  %779 = verf.f32 %v509_v45  ;;  %v514_v50 = vmul.f32 0.70710677, %v498_v44  ;;  %v497_v51 = vadd.f32 %v479_v31, %v397_v46 }
  0xf3   : > { %v499_v52 = vadd.f32 %v487_v32, %v440_v47  ;;  %781 = verf.f32 %v511_v48  ;;  %v504_v8 = vmul.f32 0.5, %v496_v43  ;;  %v506_v12 = vmul.f32 0.5, %v498_v44 }
  0xf4   : > { %783 = verf.f32 %v512_v49  ;;  %v513_v53 = vmul.f32 0.70710677, %v497_v51  ;;  %v505_v16 = vmul.f32 0.5, %v497_v51 }
  0xf5   : > { %785 = verf.f32 %v514_v50  ;;  %v515_v54 = vmul.f32 0.70710677, %v499_v52  ;;  %v507_v19 = vmul.f32 0.5, %v499_v52 }
  0xf6   : > { %787 = verf.f32 %v513_v53 }
  0xf7   : > { %789 = verf.f32 %v515_v54 }
  0xfd   : > { %v776_v55 = vpop.eup %775 }
  0xfe   : > { %v778_v56 = vpop.eup %777  ;;  %v524_v58 = vadd.f32 1.0, %v776_v55 }
  0xff   : > { %v526_v60 = vadd.f32 1.0, %v778_v56  ;;  %v780_v61 = vpop.eup %779 }
 0x100   : > { %v532_v62 = vmul.f32 %v524_v58, %v500_v57  ;;  %v782_v63 = vpop.eup %781  ;;  %v525_v2 = vadd.f32 1.0, %v780_v61 }
 0x101   : > { %v534_v0 = vmul.f32 %v526_v60, %v502_v59  ;;  %v784_v3 = vpop.eup %783  ;;  %v527_v5 = vadd.f32 1.0, %v782_v63 }
 0x102   : > { %540 = vst [vmem:[%s917_s19] sm:$0xff] %v532_v62  ;;  %v786_v6 = vpop.eup %785  ;;  %v533_v7 = vmul.f32 %v525_v2, %v501_v1  ;;  %v528_v9 = vadd.f32 1.0, %v784_v3 }
 0x103   : > { %542 = vst [vmem:[%s917_s19 + $0x10] sm:$0xff] %v534_v0  ;;  %v788_v10 = vpop.eup %787  ;;  %v535_v11 = vmul.f32 %v527_v5, %v503_v4  ;;  %v530_v13 = vadd.f32 1.0, %v786_v6 }
 0x104   : > { %v790_v14 = vpop.eup %789  ;;  %541 = vst [vmem:[%s917_s19 + $0x8] sm:$0xff] %v533_v7  ;;  %v536_v15 = vmul.f32 %v528_v9, %v504_v8  ;;  %v529_v17 = vadd.f32 1.0, %v788_v10 }
 0x105   : > { %543 = vst [vmem:[%s917_s19 + $0x18] sm:$0xff] %v535_v11  ;;  %v538_v18 = vmul.f32 %v530_v13, %v506_v12  ;;  %v531_v20 = vadd.f32 1.0, %v790_v14  ;;  %554 = sbr.rel (!%p887_p6) target bundleno = 274 (0x112), region = 67 }
 0x106   : > { %544 = vst [vmem:[%s917_s19 + $0x20] sm:$0xff] %v536_v15  ;;  %v537_v21 = vmul.f32 %v529_v17, %v505_v16 }
 0x107   : > { %546 = vst [vmem:[%s917_s19 + $0x30] sm:$0xff] %v538_v18  ;;  %v539_v22 = vmul.f32 %v531_v20, %v507_v19 }
 0x108   : > { %545 = vst [vmem:[%s917_s19 + $0x28] sm:$0xff] %v537_v21 }
 0x109   : > { %547 = vst [vmem:[%s917_s19 + $0x38] sm:$0xff] %v539_v22  ;;  %v573_v23 = vld [vmem:[%s917_s19] sm:$0xff] (%p887_p6) }
 0x10a   : > { %v577_v25 = vld [vmem:[%s917_s19 + $0x10] sm:$0xff]  ;;  %574 = vst [vmem:[%s560_s25] sm:$0xff] %v573_v23 }
 0x10b   : > { %v575_v24 = vld [vmem:[%s917_s19 + $0x8] sm:$0xff]  ;;  %578 = vst [vmem:[%s560_s25 + $0x10] sm:$0xff] %v577_v25 }
 0x10c   : > { %v579_v26 = vld [vmem:[%s917_s19 + $0x18] sm:$0xff]  ;;  %576 = vst [vmem:[%s560_s25 + $0x8] sm:$0xff] %v575_v24 }
 0x10d   : > { %v581_v27 = vld [vmem:[%s917_s19 + $0x20] sm:$0xff]  ;;  %580 = vst [vmem:[%s560_s25 + $0x18] sm:$0xff] %v579_v26 }
 0x10e   : > { %582 = vst [vmem:[%s560_s25 + $0xc0] sm:$0xff] %v581_v27  ;;  %v585_v29 = vld [vmem:[%s917_s19 + $0x30] sm:$0xff] }
 0x10f   : > { %v583_v28 = vld [vmem:[%s917_s19 + $0x28] sm:$0xff]  ;;  %586 = vst [vmem:[%s560_s25 + $0xd0] sm:$0xff] %v585_v29 }
 0x110   : > { %584 = vst [vmem:[%s560_s25 + $0xc8] sm:$0xff] %v583_v28  ;;  %v587_v30 = vld [vmem:[%s917_s19 + $0x38] sm:$0xff] }
 0x111   : > { %588 = vst [vmem:[%s560_s25 + $0xd8] sm:$0xff] %v587_v30 }
 0x112 PF: > { %s13_s16 = sadd.s32 1, %s829_s16   ;;  %s961_s12 = smov %s817_s13 }
 0x113   : > { %p10_p12 = scmp.ge.s32.totalorder %s13_s16, 8   ;;  %s962_s13 = smov %s892_s22 }
 0x114   : > { %s963_s14 = smov %s825_s15  ;;  %s964_s15 = smov %s966_s17 }
 0x115   :  { %12 = sbr.rel (!%p10_p12) target bundleno = 3 (0x3), region = 127 }

// kernel: transformer_no_embed_forward.61
= control target key start
LH: loop header
LB: loop body
LE: loop exit
PB: predicated region body
PF: predicated region fallthrough
CT: control target
= control target key end

     0   :  { %vm19_vm0 = vcmask 523264   ;;  %v132_v0 = vmov 0.0   ;;  %vm133_vm1 = vmmov 0   ;;  %vm43_vm2 = vcmask 261120   ;;  %s181_s1 = inlined_call_operand.vmem [shape: bf16[32,64], index: 1, kind: input, shape index: {}]   ;;  %s182_s0 = inlined_call_operand.vmem [shape: f32[16,32], index: 0, kind: input, shape index: {}]   ;;  %s183_s2 = inlined_call_operand.vmem [shape: f32[1,64], index: 2, kind: input, shape index: {}]   ;;  %s184_s3 = inlined_call_operand.vmem [shape: f32[16,64], index: 3, kind: output, shape index: {}]  }
   0x1   :  { %120 = vmatprep.subr.bf16.mxu0 %v132_v0  ;;  %v130_v1 = vld [vmem:[%s181_s1 + $0x8] sm:$0xff]   ;;  %124 = vmatprep.mubr.msk.bf16.mxu0 %vm133_vm1, %v132_v0  ;;  %20 = vst.msk [vmem:[#allocation2] sm:$0xff] %vm19_vm0, %v132_v0  ;;  %21 = vst.msk [vmem:[#allocation2 + $0x8] sm:$0xff] %vm19_vm0, %v132_v0  ;;  %v131_v2 = vld [vmem:[%s181_s1] sm:$0xff]  }
   0x2   :  { %121 = vmatpush3.bf16.msra.mxu0 %v130_v1  ;;  %v24_v3 = vld [vmem:[%s182_s0] sm:$0xff]  ;;  %v25_v4 = vld [vmem:[%s182_s0 + $0x8] sm:$0xff] }
   0x3   :  { %122 = vmatprep.subr.bf16.mxu0 %v132_v0  ;;  %v26_v5 = vpack.c.bf16 %v25_v4, %v24_v3  ;;  %v116_v14 = vld [vmem:[%s183_s2] ss:$0 sm:$0xff] }
   0x6   :  { %123 = vmatpush3.bf16.msra.mxu0 %v131_v2 }
   0x8   :  { %v22_v6 = vld [vmem:[#allocation2] sm:$0xff]  ;;  %v23_v10 = vld [vmem:[#allocation2 + $0x8] sm:$0xff] }
   0x9   :  { %125 = vmatmul.mubr.msk.bf16.vlgmr.msra.gmra.mxu0 %vm43_vm2, %v26_v5 }
  0xc9   :  { %v81_v7 = vpop.f32.mrf.mxu0 }
  0xca   :  { %v88_v8 = vadd.f32 %v81_v7, %v22_v6 }
  0xcb   :  { %v126_v9 = vpop.f32.mrf.mxu0 }
  0xcc   :  { %91 = vst.msk [vmem:[#allocation2] sm:$0xff] %vm19_vm0, %v88_v8 }
  0xcd   :  { %v84_v11 = vpop.f32.mrf.mxu0 }
  0xce   :  { %v89_v12 = vadd.f32 %v84_v11, %v23_v10 }
  0xcf   :  { %v127_v13 = vpop.f32.mrf.mxu0 }
  0xd0   :  { %92 = vst.msk [vmem:[#allocation2 + $0x8] sm:$0xff] %vm19_vm0, %v89_v12 }
  0xd3   :  { %v96_v15 = vld [vmem:[#allocation2] sm:$0xff] }
  0xd4   :  { %v105_v16 = vadd.f32 %v116_v14, %v96_v15 }
  0xd6   :  { %107 = vst.msk [vmem:[%s184_s3] sm:$0xff] %vm19_vm0, %v105_v16 }
  0xd7   :  { %v97_v17 = vld [vmem:[#allocation2 + $0x8] sm:$0xff] }
  0xd8   :  { %v106_v18 = vadd.f32 %v116_v14, %v97_v17 }
  0xda   :  { %108 = vst.msk [vmem:[%s184_s3 + $0x8] sm:$0xff] %vm19_vm0, %v106_v18 }

// kernel: transformer_no_embed_forward.46
= control target key start
LH: loop header
LB: loop body
LE: loop exit
PB: predicated region body
PF: predicated region fallthrough
CT: control target
= control target key end

     0   :  { %s1097_s15 = smov 0   ;;  %s1099_s16 = smov 0   ;;  %s1227_s0 = inlined_call_operand.vmem [shape: f32[16,3072], index: 0, kind: input, shape index: {}]   ;;  %s1228_s1 = inlined_call_operand.vmem [shape: bf16[3072,32], index: 1, kind: input, shape index: {}]   ;;  %s1229_s2 = inlined_call_operand.vmem [shape: f32[1,32], index: 2, kind: input, shape index: {}]   ;;  %s1230_s3 = inlined_call_operand.vmem [shape: f32[16,32], index: 3, kind: input, shape index: {}]   ;;  %s1231_s4 = inlined_call_operand.vmem [shape: f32[16,32], index: 4, kind: output, shape index: {}]  }
   0x1   :  { %s1101_s17 = smov 0   ;;  %s1103_s18 = smov 0  }
   0x2   :  { %s1105_s19 = smov 0  }
   0x3 LB: > { %s26_s20 = sadd.s32 1, %s1065_s18  ;;  %p49_p1 = scmp.ne.s32.totalorder %s1057_s16, %s1053_s15  ;;  %s1069_s19 = sphi %s1105_s19, %s14_s19   ;;  %s1065_s18 = sphi %s1103_s18, %s1235_s18   ;;  %s1061_s17 = sphi %s1101_s17, %s1234_s17   ;;  %s1057_s16 = sphi %s1099_s16, %s1233_s16   ;;  %s1053_s15 = sphi %s1097_s15, %s1232_s15  }
   0x4   : > { %p27_p0 = scmp.ge.s32.totalorder %s26_s20, 6  ;;  %p50_p2 = scmp.eq.s32.totalorder %s1069_s19, 0 }
   0x5   : > { %s42_s22 = sadd.s32 1, %s1057_s16  ;;  %p866_p5 = scmp.ge.s32.totalorder %s1069_s19, 6 }
   0x6   : > { %s1237_s20 = smov (%p27_p0, %s26_s20), 0  ;;  %p51_p3 = por %p50_p2, %p49_p1 }
   0x7   : > { %s38_s21 = ssub.s32 %s1065_s18, %s1237_s20  ;;  %203 = sbr.rel (%p866_p5) target bundleno = 20 (0x14), region = 24 }
   0x8   : > { %p40_p4 = scmp.eq.s32.totalorder %s38_s21, 0 }
   0xa   : > { %s1132_s23 = scalar_select %p40_p4, %s1057_s16, %s42_s22  }
   0xc   : > { %206 = sbr.rel (!%p51_p3) target bundleno = 20 (0x14), region = 28  ;;  %s208_s24 = sand.u32 (%p51_p3), 1, %s1057_s16  }
   0xd   : > { %s913_s25 = sshll.u32 (%p51_p3), %s1065_s18, 5  ;;  %s867_s26 = sshll.u32 (%p51_p3), %s208_s24, 6 }
   0xe   : > { %s216_s29 = scalar_lea.vmem (%p51_p3), %s1227_s0, %s913_s25  ;;  %s210_s30 = scalar_lea.vmem (%p51_p3), [#allocation3], %s867_s26 }
   0xf   : > { %v229_v0 = vld [vmem:[%s216_s29] sm:$0xff] (%p51_p3)  ;;  %v231_v1 = vld [vmem:[%s216_s29 + $0x8] sm:$0xff] (%p51_p3)  ;;  %v233_v2 = vld [vmem:[%s216_s29 + $0x10] sm:$0xff] (%p51_p3) }
  0x10   : > { %230 = vst [vmem:[%s210_s30] sm:$0xff] (%p51_p3), %v229_v0  ;;  %232 = vst [vmem:[%s210_s30 + $0x8] sm:$0xff] (%p51_p3), %v231_v1  ;;  %v235_v3 = vld [vmem:[%s216_s29 + $0x18] sm:$0xff] (%p51_p3)  ;;  %v237_v4 = vld [vmem:[%s216_s29 + $0xc0] sm:$0xff] (%p51_p3) }
  0x11   : > { %234 = vst [vmem:[%s210_s30 + $0x10] sm:$0xff] %v233_v2  ;;  %v239_v5 = vld [vmem:[%s216_s29 + $0xc8] sm:$0xff]  ;;  %236 = vst [vmem:[%s210_s30 + $0x18] sm:$0xff] %v235_v3  ;;  %v241_v6 = vld [vmem:[%s216_s29 + $0xd0] sm:$0xff] }
  0x12   : > { %238 = vst [vmem:[%s210_s30 + $0x20] sm:$0xff] %v237_v4  ;;  %240 = vst [vmem:[%s210_s30 + $0x28] sm:$0xff] %v239_v5  ;;  %v243_v7 = vld [vmem:[%s216_s29 + $0xd8] sm:$0xff] }
  0x13   : > { %242 = vst [vmem:[%s210_s30 + $0x30] sm:$0xff] %v241_v6  ;;  %244 = vst [vmem:[%s210_s30 + $0x38] sm:$0xff] %v243_v7 }
  0x14 PF: > { %p870_p6 = scmp.ge.s32.totalorder %s1069_s19, 1  ;;  %p261_p7 = scmp.lt.s32.totalorder %s1069_s19, 7 }
  0x16   : > { %p262_p8 = pnand %p870_p6, %p261_p7 }
  0x17   : > { %s268_s5 = sand.u32 (!%p262_p8), 1, %s1053_s15   ;;  %s872_s6 = sshll.u32 (!%p262_p8), %s1061_s17, 6 }
  0x18   : > { %265 = sbr.rel (%p262_p8) target bundleno = 289 (0x121), region = 55  ;;  %s871_s7 = sshll.u32 (!%p262_p8), %s268_s5, 6 }
  0x19   : > { %p318_p9 = scmp.lt.s32.totalorder (!%p262_p8), %s872_s6, 383  ;;  %s1149_s12 = scalar_lea.vmem (!%p262_p8), [#allocation3], %s871_s7 }
  0x1a   : > { %p874_p10 = scmp.ne.s32.totalorder (!%p262_p8), %s1061_s17, 0 }
  0x1d   : > { %s1239_s6 = smov (!%p318_p9, %s872_s6), 383  ;;  %351 = sbr.rel (%p874_p10) target bundleno = 36 (0x24), region = 63 }
  0x1e   : > { %s873_s8 = sshll.u32 %s1239_s6, 2 }
  0x1f   : > { %s1147_s11 = scalar_lea.vmem %s1228_s1, %s873_s8 }
  0x22   : > { %vm352_vm0 = vcmask 261120   ;;  %v1071_v8 = vmov 0.0  }
  0x23   : > { %353 = vst.msk [vmem:[#allocation2] sm:$0xff] %vm352_vm0, %v1071_v8  ;;  %354 = vst.msk [vmem:[#allocation2 + $0x8] sm:$0xff] %vm352_vm0, %v1071_v8 }
  0x24 PF: > { %v999_v9 = vld [vmem:[%s1147_s11 + $0x78] sm:$0xff]   ;;  %v1003_v13 = vld [vmem:[%s1147_s11 + $0x70] sm:$0xff]   ;;  %v1007_v17 = vld [vmem:[%s1147_s11 + $0x68] sm:$0xff]   ;;  %vm709_vm1 = vcmask 261120   ;;  %p907_p11 = scmp.ne.s32.totalorder %s1061_s17, 5 }
  0x25   : > { %v1000_v10 = vld [vmem:[%s1147_s11 + $0xf8] sm:$0xff]   ;;  %914 = vmatprep.subr.bf16.mxu0 %v999_v9  ;;  %v1004_v14 = vld [vmem:[%s1147_s11 + $0xf0] sm:$0xff]   ;;  %v1008_v18 = vld [vmem:[%s1147_s11 + $0xe8] sm:$0xff]  }
  0x26   : > { %v1001_v11 = vld [vmem:[%s1147_s11 + $0x38] sm:$0xff]   ;;  %936 = vmatprep.subr.bf16.mxu1 %v1000_v10  ;;  %v1005_v15 = vld [vmem:[%s1147_s11 + $0x30] sm:$0xff]   ;;  %v1009_v19 = vld [vmem:[%s1147_s11 + $0x28] sm:$0xff]  }
  0x27   : > { %v1002_v12 = vld [vmem:[%s1147_s11 + $0xb8] sm:$0xff]   ;;  %915 = vmatpush3.bf16.msra.mxu0 %v1001_v11  ;;  %v1006_v16 = vld [vmem:[%s1147_s11 + $0xb0] sm:$0xff]   ;;  %v1010_v20 = vld [vmem:[%s1147_s11 + $0xa8] sm:$0xff]  }
  0x28   : > { %937 = vmatpush3.bf16.msra.mxu1 %v1002_v12  ;;  %916 = vmatprep.subr.bf16.mxu0 %v1003_v13  ;;  %v1011_v21 = vld [vmem:[%s1147_s11 + $0x60] sm:$0xff]   ;;  %v1015_v25 = vld [vmem:[%s1147_s11 + $0x58] sm:$0xff]   ;;  %v1019_v29 = vld [vmem:[%s1147_s11 + $0x50] sm:$0xff]  }
  0x29   : > { %938 = vmatprep.subr.bf16.mxu1 %v1004_v14  ;;  %v1012_v22 = vld [vmem:[%s1147_s11 + $0xe0] sm:$0xff]   ;;  %v1016_v26 = vld [vmem:[%s1147_s11 + $0xd8] sm:$0xff]   ;;  %v1020_v30 = vld [vmem:[%s1147_s11 + $0xd0] sm:$0xff]  }
  0x2a   : > { %v1013_v23 = vld [vmem:[%s1147_s11 + $0x20] sm:$0xff]   ;;  %v1017_v27 = vld [vmem:[%s1147_s11 + $0x18] sm:$0xff]   ;;  %v1021_v31 = vld [vmem:[%s1147_s11 + $0x10] sm:$0xff]  }
  0x2b   : > { %917 = vmatpush3.bf16.msra.mxu0 %v1005_v15  ;;  %v1014_v24 = vld [vmem:[%s1147_s11 + $0xa0] sm:$0xff]   ;;  %v1018_v28 = vld [vmem:[%s1147_s11 + $0x98] sm:$0xff]   ;;  %v1022_v32 = vld [vmem:[%s1147_s11 + $0x90] sm:$0xff]  }
  0x2c   : > { %939 = vmatpush3.bf16.msra.mxu1 %v1006_v16  ;;  %918 = vmatprep.subr.bf16.mxu0 %v1007_v17  ;;  %v1023_v33 = vld [vmem:[%s1147_s11 + $0x48] sm:$0xff]   ;;  %v1027_v37 = vld [vmem:[%s1147_s11 + $0x40] sm:$0xff]   ;;  %v358_v41 = vld [vmem:[%s1149_s12 + $0x8] sm:$0xff] }
  0x2d   : > { %940 = vmatprep.subr.bf16.mxu1 %v1008_v18  ;;  %v1024_v34 = vld [vmem:[%s1147_s11 + $0xc8] sm:$0xff]   ;;  %v1028_v38 = vld [vmem:[%s1147_s11 + $0xc0] sm:$0xff]   ;;  %v362_v42 = vld [vmem:[%s1149_s12 + $0x28] sm:$0xff] }
  0x2e   : > { %v1025_v35 = vld [vmem:[%s1147_s11 + $0x8] sm:$0xff]   ;;  %v1029_v39 = vld [vmem:[%s1147_s11] sm:$0xff]   ;;  %v366_v44 = vpack.c.bf16 %v362_v42, %v358_v41  ;;  %v357_v46 = vld [vmem:[%s1149_s12] sm:$0xff] }
  0x2f   : > { %919 = vmatpush3.bf16.msra.mxu0 %v1009_v19  ;;  %v1026_v36 = vld [vmem:[%s1147_s11 + $0x88] sm:$0xff]   ;;  %v1030_v40 = vld [vmem:[%s1147_s11 + $0x80] sm:$0xff]   ;;  %v361_v47 = vld [vmem:[%s1149_s12 + $0x20] sm:$0xff] }
  0x30   : > { %941 = vmatpush3.bf16.msra.mxu1 %v1010_v20  ;;  %920 = vmatprep.subr.bf16.mxu0 %v1011_v21  ;;  %v360_v43 = vld [vmem:[%s1149_s12 + $0x18] sm:$0xff]  ;;  %v365_v49 = vpack.c.bf16 %v361_v47, %v357_v46  ;;  %v359_v50 = vld [vmem:[%s1149_s12 + $0x10] sm:$0xff] }
  0x31   : > { %942 = vmatprep.subr.bf16.mxu1 %v1012_v22  ;;  %v364_v45 = vld [vmem:[%s1149_s12 + $0x38] sm:$0xff]  ;;  %v363_v51 = vld [vmem:[%s1149_s12 + $0x30] sm:$0xff]  ;;  %657 = vmatprep.mubr.bf16.mxu0 %v366_v44 }
  0x32   : > { %v368_v48 = vpack.c.bf16 %v364_v45, %v360_v43  ;;  %v367_v52 = vpack.c.bf16 %v363_v51, %v359_v50  ;;  %v355_v60 = vld [vmem:[#allocation2] sm:$0xff]  ;;  %v356_v4 = vld [vmem:[#allocation2 + $0x8] sm:$0xff] }
  0x33   : > { %921 = vmatpush3.bf16.msra.mxu0 %v1013_v23 }
  0x34   : > { %943 = vmatpush3.bf16.msra.mxu1 %v1014_v24  ;;  %922 = vmatprep.subr.bf16.mxu0 %v1015_v25 }
  0x35   : > { %944 = vmatprep.subr.bf16.mxu1 %v1016_v26  ;;  %698 = vmatprep.mubr.bf16.mxu1 %v368_v48 }
  0x37   : > { %923 = vmatpush3.bf16.msra.mxu0 %v1017_v27 }
  0x38   : > { %945 = vmatpush3.bf16.msra.mxu1 %v1018_v28  ;;  %924 = vmatprep.subr.bf16.mxu0 %v1019_v29 }
  0x39   : > { %946 = vmatprep.subr.bf16.mxu1 %v1020_v30 }
  0x3b   : > { %925 = vmatpush3.bf16.msra.mxu0 %v1021_v31 }
  0x3c   : > { %947 = vmatpush3.bf16.msra.mxu1 %v1022_v32  ;;  %926 = vmatprep.subr.bf16.mxu0 %v1023_v33 }
  0x3d   : > { %948 = vmatprep.subr.bf16.mxu1 %v1024_v34 }
  0x3f   : > { %927 = vmatpush3.bf16.msra.mxu0 %v1025_v35 }
  0x40   : > { %949 = vmatpush3.bf16.msra.mxu1 %v1026_v36  ;;  %928 = vmatprep.subr.bf16.mxu0 %v1027_v37 }
  0x41   : > { %950 = vmatprep.subr.bf16.mxu1 %v1028_v38 }
  0x43   : > { %929 = vmatpush3.bf16.msra.mxu0 %v1029_v39 }
  0x44   : > { %951 = vmatpush3.bf16.msra.mxu1 %v1030_v40 }
  0x46   : > { %658 = vmatmul.mubr.bf16.vlgmr.msra.gmra.mxu0 %v365_v49 }
  0x47   : > { %699 = vmatmul.mubr.bf16.vlgmr.msra.gmra.mxu1 %v367_v52 }
 0x106   : > { %v930_v53 = vpop.f32.mrf.mxu0 }
 0x107   : > { %v952_v54 = vpop.f32.mrf.mxu1 }
 0x108   : > { %v931_v55 = vpop.f32.mrf.mxu0 }
 0x109   : > { %v932_v56 = vadd.f32 %v931_v55, %v930_v53  ;;  %v953_v57 = vpop.f32.mrf.mxu1 }
 0x10a   : > { %v954_v58 = vadd.f32 %v953_v57, %v952_v54  ;;  %v933_v59 = vpop.f32.mrf.mxu0 }
 0x10b   : > { %v955_v61 = vpop.f32.mrf.mxu1 }
 0x10c   : > { %v701_v62 = vadd.f32 %v954_v58, %v932_v56  ;;  %v934_v63 = vpop.f32.mrf.mxu0 }
 0x10d   : > { %v935_v0 = vadd.f32 %v934_v63, %v933_v59  ;;  %v956_v1 = vpop.f32.mrf.mxu1 }
 0x10e   : > { %v707_v2 = vadd.f32 %v701_v62, %v355_v60  ;;  %v957_v3 = vadd.f32 %v956_v1, %v955_v61 }
 0x110   : > { %710 = vst.msk [vmem:[#allocation2] sm:$0xff] %vm709_vm1, %v707_v2  ;;  %v704_v5 = vadd.f32 %v957_v3, %v935_v0  ;;  %715 = sbr.rel (%p907_p11) target bundleno = 289 (0x121), region = 67 }
 0x112   : > { %v708_v6 = vadd.f32 %v704_v5, %v356_v4 }
 0x114   : > { %711 = vst.msk [vmem:[#allocation2 + $0x8] sm:$0xff] %vm709_vm1, %v708_v6 }
 0x115   : > { %v908_v8 = vld [vmem:[%s1229_s2] ss:$0 sm:$0xff]  ;;  %v728_v12 = vld [vmem:[%s1230_s3 + $0x8] sm:$0xff] }
 0x116   : > { %v727_v9 = vld [vmem:[%s1230_s3] sm:$0xff] }
 0x117   : > { %v716_v7 = vld [vmem:[#allocation2] sm:$0xff] }
 0x118   : > { %v725_v10 = vadd.f32 %v908_v8, %v716_v7 }
 0x11a   : > { %v729_v14 = vadd.f32 %v727_v9, %v725_v10 }
 0x11b   : > { %v717_v11 = vld [vmem:[#allocation2 + $0x8] sm:$0xff] }
 0x11c   : > { %v726_v13 = vadd.f32 %v908_v8, %v717_v11  ;;  %731 = vst.msk [vmem:[%s1231_s4] sm:$0xff] %vm709_vm1, %v729_v14 }
 0x11e   : > { %v730_v15 = vadd.f32 %v728_v12, %v726_v13 }
 0x120   : > { %732 = vst.msk [vmem:[%s1231_s4 + $0x8] sm:$0xff] %vm709_vm1, %v730_v15 }
 0x121 PF: > { %s14_s19 = sadd.s32 1, %s1069_s19   ;;  %s1232_s15 = smov %s1057_s16 }
 0x122   : > { %p11_p12 = scmp.ge.s32.totalorder %s14_s19, 8   ;;  %s1233_s16 = smov %s1132_s23 }
 0x123   : > { %s1234_s17 = smov %s1065_s18  ;;  %s1235_s18 = smov %s1237_s20 }
 0x124   :  { %13 = sbr.rel (!%p11_p12) target bundleno = 3 (0x3), region = 111 }

// kernel: transformer_no_embed_forward.55
= control target key start
LH: loop header
LB: loop body
LE: loop exit
PB: predicated region body
PF: predicated region fallthrough
CT: control target
= control target key end

     0   :  { %vm16_vm0 = vcmask 261120   ;;  %s118_s0 = inlined_call_operand.vmem [shape: f32[16,32], index: 0, kind: input, shape index: {}]   ;;  %s119_s1 = inlined_call_operand.vmem [shape: f32[1,32], index: 1, kind: input, shape index: {}]   ;;  %s120_s2 = inlined_call_operand.vmem [shape: f32[1,32], index: 2, kind: input, shape index: {}]   ;;  %s121_s3 = inlined_call_operand.vmem [shape: f32[16,32], index: 3, kind: output, shape index: {}]  }
   0x1   :  { %v14_v0 = vld [vmem:[%s118_s0] sm:$0xff]  ;;  %v15_v1 = vld [vmem:[%s118_s0 + $0x8] sm:$0xff] }
   0x2   :  { %v17_v2 = vsel %vm16_vm0, %v14_v0, 0.0  ;;  %v20_v3 = vsel %vm16_vm0, %v15_v1, 0.0  ;;  %v68_v21 = vld [vmem:[%s119_s1] ss:$0 sm:$0xff] }
   0x3   :  { %18 = vadd.xlane.f32.xlu0 %v17_v2  ;;  %v69_v23 = vld [vmem:[%s120_s2] ss:$0 sm:$0xff] }
   0x7   :  { %21 = vadd.xlane.f32.xlu0 %v20_v3 }
  0x8c   :  { %v19_v4 = vpop.xlane.xlu0 %18 }
  0x8d   :  { %v24_v5 = vmul.f32 0.03125, %v19_v4 }
  0x8f   :  { %v26_v6 = vsub.f32 %v14_v0, %v24_v5 }
  0x90   :  { %v22_v7 = vpop.xlane.xlu0 %21 }
  0x91   :  { %v25_v8 = vmul.f32 0.03125, %v22_v7  ;;  %v28_v9 = vmul.f32 %v26_v6, %v26_v6 }
  0x93   :  { %v27_v10 = vsub.f32 %v15_v1, %v25_v8  ;;  %v30_v11 = vsel %vm16_vm0, %v28_v9, 0.0 }
  0x94   :  { %31 = vadd.xlane.f32.xlu1 %v30_v11 }
  0x95   :  { %v29_v12 = vmul.f32 %v27_v10, %v27_v10 }
  0x97   :  { %v33_v13 = vsel %vm16_vm0, %v29_v12, 0.0 }
  0x98   :  { %34 = vadd.xlane.f32.xlu1 %v33_v13 }
 0x11d   :  { %v32_v14 = vpop.xlane.xlu1 %31 }
 0x11e   :  { %v36_v15 = vmul.f32 0.03125, %v32_v14 }
 0x120   :  { %v38_v16 = vadd.f32 1e-06, %v36_v15 }
 0x121   :  { %v35_v17 = vpop.xlane.xlu1 %34 }
 0x122   :  { %70 = vrsqrt.f32 %v38_v16  ;;  %v37_v18 = vmul.f32 0.03125, %v35_v17 }
 0x124   :  { %v39_v19 = vadd.f32 1e-06, %v37_v18 }
 0x126   :  { %72 = vrsqrt.f32 %v39_v19 }
 0x12f   :  { %v71_v20 = vpop.eup %70 }
 0x130   :  { %v42_v22 = vmul.f32 %v71_v20, %v26_v6 }
 0x132   :  { %v51_v24 = vmul.f32 %v68_v21, %v42_v22 }
 0x133   :  { %v73_v25 = vpop.eup %72 }
 0x134   :  { %v60_v26 = vadd.f32 %v69_v23, %v51_v24  ;;  %v43_v27 = vmul.f32 %v73_v25, %v27_v10 }
 0x136   :  { %62 = vst.msk [vmem:[%s121_s3] sm:$0xff] %vm16_vm0, %v60_v26  ;;  %v52_v28 = vmul.f32 %v68_v21, %v43_v27 }
 0x138   :  { %v61_v29 = vadd.f32 %v69_v23, %v52_v28 }
 0x13a   :  { %63 = vst.msk [vmem:[%s121_s3 + $0x8] sm:$0xff] %vm16_vm0, %v61_v29 }

// kernel: transformer_no_embed_forward.60
= control target key start
LH: loop header
LB: loop body
LE: loop exit
PB: predicated region body
PF: predicated region fallthrough
CT: control target
= control target key end

     0   :  { %vm19_vm0 = vcmask 261120   ;;  %v131_v0 = vmov 0.0   ;;  %vm132_vm1 = vmmov 0   ;;  %s181_s1 = inlined_call_operand.vmem [shape: bf16[32,32], index: 1, kind: input, shape index: {}]   ;;  %s182_s0 = inlined_call_operand.vmem [shape: f32[16,32], index: 0, kind: input, shape index: {}]   ;;  %s183_s2 = inlined_call_operand.vmem [shape: f32[1,32], index: 2, kind: input, shape index: {}]   ;;  %s184_s3 = inlined_call_operand.vmem [shape: f32[16,32], index: 3, kind: output, shape index: {}]  }
   0x1   :  { %119 = vmatprep.subr.bf16.mxu0 %v131_v0  ;;  %v129_v1 = vld [vmem:[%s181_s1 + $0x8] sm:$0xff]   ;;  %123 = vmatprep.mubr.msk.bf16.mxu0 %vm132_vm1, %v131_v0  ;;  %20 = vst.msk [vmem:[#allocation2] sm:$0xff] %vm19_vm0, %v131_v0  ;;  %21 = vst.msk [vmem:[#allocation2 + $0x8] sm:$0xff] %vm19_vm0, %v131_v0  ;;  %v130_v2 = vld [vmem:[%s181_s1] sm:$0xff]  }
   0x2   :  { %120 = vmatpush3.bf16.msra.mxu0 %v129_v1  ;;  %v24_v3 = vld [vmem:[%s182_s0] sm:$0xff]  ;;  %v25_v4 = vld [vmem:[%s182_s0 + $0x8] sm:$0xff] }
   0x3   :  { %121 = vmatprep.subr.bf16.mxu0 %v131_v0  ;;  %v26_v5 = vpack.c.bf16 %v25_v4, %v24_v3  ;;  %v115_v14 = vld [vmem:[%s183_s2] ss:$0 sm:$0xff] }
   0x6   :  { %122 = vmatpush3.bf16.msra.mxu0 %v130_v2 }
   0x8   :  { %v22_v6 = vld [vmem:[#allocation2] sm:$0xff]  ;;  %v23_v10 = vld [vmem:[#allocation2 + $0x8] sm:$0xff] }
   0x9   :  { %124 = vmatmul.mubr.msk.bf16.vlgmr.msra.gmra.mxu0 %vm19_vm0, %v26_v5 }
  0xc9   :  { %v81_v7 = vpop.f32.mrf.mxu0 }
  0xca   :  { %v88_v8 = vadd.f32 %v81_v7, %v22_v6 }
  0xcb   :  { %v125_v9 = vpop.f32.mrf.mxu0 }
  0xcc   :  { %90 = vst.msk [vmem:[#allocation2] sm:$0xff] %vm19_vm0, %v88_v8 }
  0xcd   :  { %v84_v11 = vpop.f32.mrf.mxu0 }
  0xce   :  { %v89_v12 = vadd.f32 %v84_v11, %v23_v10 }
  0xcf   :  { %v126_v13 = vpop.f32.mrf.mxu0 }
  0xd0   :  { %91 = vst.msk [vmem:[#allocation2 + $0x8] sm:$0xff] %vm19_vm0, %v89_v12 }
  0xd3   :  { %v95_v15 = vld [vmem:[#allocation2] sm:$0xff] }
  0xd4   :  { %v104_v16 = vadd.f32 %v115_v14, %v95_v15 }
  0xd6   :  { %106 = vst.msk [vmem:[%s184_s3] sm:$0xff] %vm19_vm0, %v104_v16 }
  0xd7   :  { %v96_v17 = vld [vmem:[#allocation2 + $0x8] sm:$0xff] }
  0xd8   :  { %v105_v18 = vadd.f32 %v115_v14, %v96_v17 }
  0xda   :  { %107 = vst.msk [vmem:[%s184_s3 + $0x8] sm:$0xff] %vm19_vm0, %v105_v18 }

// kernel: transformer_no_embed_forward.65
= control target key start
LH: loop header
LB: loop body
LE: loop exit
PB: predicated region body
PF: predicated region fallthrough
CT: control target
= control target key end

     0   :  { %v132_v0 = vmov 0.0   ;;  %vm133_vm0 = vmmov 0   ;;  %vm42_vm1 = vcmask 261120   ;;  %s175_s1 = inlined_call_operand.vmem [shape: bf16[32,128], index: 1, kind: input, shape index: {}]   ;;  %s176_s0 = inlined_call_operand.vmem [shape: f32[16,32], index: 0, kind: input, shape index: {}]   ;;  %s177_s2 = inlined_call_operand.vmem [shape: f32[1,128], index: 2, kind: input, shape index: {}]   ;;  %s178_s3 = inlined_call_operand.vmem [shape: f32[16,128], index: 3, kind: output, shape index: {}]  }
   0x1   :  { %120 = vmatprep.subr.bf16.mxu0 %v132_v0  ;;  %v130_v1 = vld [vmem:[%s175_s1 + $0x8] sm:$0xff]   ;;  %124 = vmatprep.mubr.msk.bf16.mxu0 %vm133_vm0, %v132_v0  ;;  %v131_v2 = vld [vmem:[%s175_s1] sm:$0xff]  }
   0x2   :  { %121 = vmatpush3.bf16.msra.mxu0 %v130_v1  ;;  %v23_v3 = vld [vmem:[%s176_s0] sm:$0xff]  ;;  %v24_v4 = vld [vmem:[%s176_s0 + $0x8] sm:$0xff] }
   0x3   :  { %122 = vmatprep.subr.bf16.mxu0 %v132_v0  ;;  %v25_v5 = vpack.c.bf16 %v24_v4, %v23_v3  ;;  %v116_v6 = vld [vmem:[%s177_s2] ss:$0 sm:$0xff] }
   0x6   :  { %123 = vmatpush3.bf16.msra.mxu0 %v131_v2 }
   0x9   :  { %125 = vmatmul.mubr.msk.bf16.vlgmr.msra.gmra.mxu0 %vm42_vm1, %v25_v5 }
  0xc9   :  { %v80_v7 = vpop.f32.mrf.mxu0 }
  0xca   :  { %v103_v8 = vadd.f32 %v116_v6, %v80_v7 }
  0xcb   :  { %v126_v9 = vpop.f32.mrf.mxu0 }
  0xcc   :  { %v105_v10 = vmax.f32 %v103_v8, 0.0 }
  0xcd   :  { %v83_v11 = vpop.f32.mrf.mxu0 }
  0xce   :  { %107 = vst [vmem:[%s178_s3] sm:$0xff] %v105_v10  ;;  %v104_v12 = vadd.f32 %v116_v6, %v83_v11 }
  0xcf   :  { %v127_v13 = vpop.f32.mrf.mxu0 }
  0xd0   :  { %v106_v14 = vmax.f32 %v104_v12, 0.0 }
  0xd2   :  { %108 = vst [vmem:[%s178_s3 + $0x8] sm:$0xff] %v106_v14 }

// kernel: transformer_no_embed_forward.57
= control target key start
LH: loop header
LB: loop body
LE: loop exit
PB: predicated region body
PF: predicated region fallthrough
CT: control target
= control target key end

     0   :  { %s1438_s12 = smov 0   ;;  %s1667_s0 = inlined_call_operand.vmem [shape: f32[2,8,8,4], index: 0, kind: input, shape index: {}]   ;;  %s1668_s1 = inlined_call_operand.vmem [shape: f32[2,8,8,4], index: 1, kind: input, shape index: {}]   ;;  %s1669_s2 = inlined_call_operand.vmem [shape: f32[2,8,8,4], index: 2, kind: input, shape index: {}]   ;;  %s1670_s3 = inlined_call_operand.vmem [shape: f32[2,8,8,4], index: 3, kind: output, shape index: {}]  }
   0x1 LB: > { %s1203_s13 = sadd.s32 4294967295, %s1414_s12   ;;  %p1207_p0 = scmp.ge.s32.totalorder %s1414_s12, 1  ;;  %s1414_s12 = sphi %s1438_s12, %s13_s12  }
   0x2   : > { %p157_p1 = scmp.lt.s32.totalorder %s1414_s12, 3 }
   0x4   : > { %p158_p2 = pnand %p1207_p0, %p157_p1 }
   0x5   : > { %p191_p3 = scmp.lt.s32.totalorder (!%p158_p2), %s1203_s13, 1 }
   0x6   : > { %161 = sbr.rel (%p158_p2) target bundleno = 762 (0x2fa), region = 32 }
   0xb   : > { %v1416_v0 = vmov 0.0   ;;  %s1674_s13 = smov (!%p191_p3, %s1203_s13), 1  ;;  %vm1417_vm0 = vmmov 0   ;;  %vm252_vm1 = vcmask 31744   ;;  %v629_v41 = vlaneseq }
   0xc   : > { %1270 = vmatprep.subr.bf16.mxu0 %v1416_v0  ;;  %1276 = vmatprep.subr.bf16.mxu1 %v1416_v0  ;;  %s1452_s14 = sshll.u32 %s1674_s13, 6  ;;  %vm642_vm3 = vcmask 64512   ;;  %vm750_vm4 = vcmask 1043456  }
   0xd   : > { %1272 = vmatprep.mubr.msk.bf16.mxu0 %vm1417_vm0, %v1416_v0  ;;  %1278 = vmatprep.mubr.msk.bf16.mxu1 %vm1417_vm0, %v1416_v0  ;;  %s1458_s17 = scalar_lea.vmem %s1668_s1, %s1452_s14  ;;  %s1466_s20 = scalar_lea.vmem %s1667_s0, %s1452_s14  ;;  %v630_v42 = vshrl.u32 %v629_v41, 7  ;;  %v632_v43 = vand.u32 127, %v629_v41 }
   0xe   : > { %v220_v1 = vld [vmem:[%s1458_s17] sm:$0xff]  ;;  %v221_v2 = vld [vmem:[%s1458_s17 + $0x8] sm:$0xff]  ;;  %v222_v5 = vld [vmem:[%s1458_s17 + $0x10] sm:$0xff]  ;;  %s1582_s23 = scalar_lea.vmem %s1669_s2, %s1452_s14  ;;  %s1646_s26 = scalar_lea.vmem %s1670_s3, %s1452_s14 }
   0xf   : > { %v244_v3 = vpack.c.bf16 %v220_v1, %v220_v1  ;;  %v245_v4 = vpack.c.bf16 %v221_v2, %v221_v2  ;;  %v223_v6 = vld [vmem:[%s1458_s17 + $0x18] sm:$0xff]  ;;  %v212_v9 = vld [vmem:[%s1466_s20] sm:$0xff]  ;;  %v213_v10 = vld [vmem:[%s1466_s20 + $0x8] sm:$0xff]  ;;  %v246_v11 = vpack.c.bf16 %v222_v5, %v222_v5  ;;  %vm1522_vm2 = vcmp.ge.s32.totalorder %v630_v42, %v632_v43 }
  0x10   : > { %v247_v12 = vpack.c.bf16 %v223_v6, %v223_v6  ;;  %v236_v13 = vpack.c.bf16 %v212_v9, %v212_v9  ;;  %v237_v14 = vpack.c.bf16 %v213_v10, %v213_v10  ;;  %v224_v17 = vld [vmem:[%s1458_s17 + $0x20] sm:$0xff]  ;;  %v225_v18 = vld [vmem:[%s1458_s17 + $0x28] sm:$0xff]  ;;  %v214_v19 = vld [vmem:[%s1466_s20 + $0x10] sm:$0xff] }
  0x11   : > { %v257_v7 = vsel %vm252_vm1, %v244_v3, 0  ;;  %v303_v8 = vsel %vm252_vm1, %v245_v4, 0  ;;  %v349_v15 = vsel %vm252_vm1, %v246_v11, 0  ;;  %v215_v20 = vld [vmem:[%s1466_s20 + $0x18] sm:$0xff]  ;;  %v248_v21 = vpack.c.bf16 %v224_v17, %v224_v17  ;;  %v226_v27 = vld [vmem:[%s1458_s17 + $0x30] sm:$0xff]  ;;  %v216_v29 = vld [vmem:[%s1466_s20 + $0x20] sm:$0xff] }
  0x12   : > { %1271 = vmatpush3.bf16.xpose.msra.mxu0 %v257_v7  ;;  %1277 = vmatpush3.bf16.xpose.msra.mxu1 %v303_v8  ;;  %v395_v16 = vsel %vm252_vm1, %v247_v12, 0  ;;  %v249_v22 = vpack.c.bf16 %v225_v18, %v225_v18  ;;  %v238_v23 = vpack.c.bf16 %v214_v19, %v214_v19  ;;  %v239_v24 = vpack.c.bf16 %v215_v20, %v215_v20  ;;  %v227_v28 = vld [vmem:[%s1458_s17 + $0x38] sm:$0xff]  ;;  %v217_v30 = vld [vmem:[%s1466_s20 + $0x28] sm:$0xff]  ;;  %v218_v37 = vld [vmem:[%s1466_s20 + $0x30] sm:$0xff] }
  0x13   : > { %1282 = vmatprep.subr.bf16.mxu0 %v1416_v0  ;;  %1288 = vmatprep.subr.bf16.mxu1 %v1416_v0  ;;  %v441_v25 = vsel %vm252_vm1, %v248_v21, 0  ;;  %v250_v31 = vpack.c.bf16 %v226_v27, %v226_v27  ;;  %v251_v32 = vpack.c.bf16 %v227_v28, %v227_v28  ;;  %v240_v33 = vpack.c.bf16 %v216_v29, %v216_v29  ;;  %v219_v38 = vld [vmem:[%s1466_s20 + $0x38] sm:$0xff] }
  0x14   : > { %v487_v26 = vsel %vm252_vm1, %v249_v22, 0  ;;  %v241_v34 = vpack.c.bf16 %v217_v30, %v217_v30  ;;  %v242_v39 = vpack.c.bf16 %v218_v37, %v218_v37  ;;  %v243_v40 = vpack.c.bf16 %v219_v38, %v219_v38 }
  0x15   : > { %v533_v35 = vsel %vm252_vm1, %v250_v31, 0  ;;  %v579_v36 = vsel %vm252_vm1, %v251_v32, 0 }
  0x19   : > { %1273 = vmatmul.mubr.msk.bf16.vlgmr.msra.gmra.mxu0 %vm252_vm1, %v236_v13  ;;  %1279 = vmatmul.mubr.msk.bf16.vlgmr.msra.gmra.mxu1 %vm252_vm1, %v237_v14 }
  0x1a   : > { %1283 = vmatpush3.bf16.xpose.msra.mxu0 %v349_v15  ;;  %1289 = vmatpush3.bf16.xpose.msra.mxu1 %v395_v16 }
  0x1b   : > { %1284 = vmatprep.mubr.msk.bf16.mxu0 %vm1417_vm0, %v1416_v0  ;;  %1290 = vmatprep.mubr.msk.bf16.mxu1 %vm1417_vm0, %v1416_v0 }
  0x1c   : > { %1294 = vmatprep.subr.bf16.mxu0 %v1416_v0  ;;  %1300 = vmatprep.subr.bf16.mxu1 %v1416_v0 }
  0x21   : > { %1285 = vmatmul.mubr.msk.bf16.vlgmr.msra.gmra.mxu0 %vm252_vm1, %v238_v23  ;;  %1291 = vmatmul.mubr.msk.bf16.vlgmr.msra.gmra.mxu1 %vm252_vm1, %v239_v24 }
  0x22   : > { %1295 = vmatpush3.bf16.xpose.msra.mxu0 %v441_v25  ;;  %1301 = vmatpush3.bf16.xpose.msra.mxu1 %v487_v26 }
  0x23   : > { %1296 = vmatprep.mubr.msk.bf16.mxu0 %vm1417_vm0, %v1416_v0  ;;  %1302 = vmatprep.mubr.msk.bf16.mxu1 %vm1417_vm0, %v1416_v0 }
  0x24   : > { %1306 = vmatprep.subr.bf16.mxu0 %v1416_v0  ;;  %1312 = vmatprep.subr.bf16.mxu1 %v1416_v0 }
  0x29   : > { %1297 = vmatmul.mubr.msk.bf16.vlgmr.msra.gmra.mxu0 %vm252_vm1, %v240_v33  ;;  %1303 = vmatmul.mubr.msk.bf16.vlgmr.msra.gmra.mxu1 %vm252_vm1, %v241_v34 }
  0x2a   : > { %1307 = vmatpush3.bf16.xpose.msra.mxu0 %v533_v35  ;;  %1313 = vmatpush3.bf16.xpose.msra.mxu1 %v579_v36 }
  0x2b   : > { %1308 = vmatprep.mubr.msk.bf16.mxu0 %vm1417_vm0, %v1416_v0  ;;  %1314 = vmatprep.mubr.msk.bf16.mxu1 %vm1417_vm0, %v1416_v0 }
  0x2c   : > { %1318 = vmatprep.subr.bf16.mxu0 %v1416_v0  ;;  %1324 = vmatprep.subr.bf16.mxu1 %v1416_v0 }
  0x31   : > { %1309 = vmatmul.mubr.msk.bf16.vlgmr.msra.gmra.mxu0 %vm252_vm1, %v242_v39  ;;  %1315 = vmatmul.mubr.msk.bf16.vlgmr.msra.gmra.mxu1 %vm252_vm1, %v243_v40 }
  0x32   : > { %1320 = vmatprep.mubr.msk.bf16.mxu0 %vm1417_vm0, %v1416_v0  ;;  %1326 = vmatprep.mubr.msk.bf16.mxu1 %vm1417_vm0, %v1416_v0 }
  0xd9   : > { %v293_v44 = vpop.f32.mrf.mxu0  ;;  %v339_v45 = vpop.f32.mrf.mxu1 }
  0xda   : > { %v621_v47 = vmul.f32 0.5, %v293_v44  ;;  %v622_v48 = vmul.f32 0.5, %v339_v45 }
  0xdb   : > { %v1274_v49 = vpop.f32.mrf.mxu0  ;;  %v1280_v50 = vpop.f32.mrf.mxu1 }
  0xdc   : > { %v634_v51 = vsel %vm1522_vm2, %v621_v47, -1e+09  ;;  %v1530_v52 = vsel %vm1522_vm2, %v622_v48, -1e+09 }
  0xdd   : > { %v296_v53 = vpop.f32.mrf.mxu0  ;;  %v342_v54 = vpop.f32.mrf.mxu1  ;;  %v643_v55 = vsel %vm642_vm3, %v634_v51, -inf  ;;  %v646_v58 = vsel %vm642_vm3, %v1530_v52, -inf }
  0xde   : > { %644 = vmax.xlane.f32.xlu0 %v643_v55 }
  0xdf   : > { %v1275_v56 = vpop.f32.mrf.mxu0  ;;  %v1281_v57 = vpop.f32.mrf.mxu1 }
  0xe1   : > { %v385_v59 = vpop.f32.mrf.mxu0  ;;  %v431_v60 = vpop.f32.mrf.mxu1 }
  0xe2   : > { %v623_v61 = vmul.f32 0.5, %v385_v59  ;;  %v624_v62 = vmul.f32 0.5, %v431_v60  ;;  %647 = vmax.xlane.f32.xlu0 %v646_v58 }
  0xe3   : > { %v1286_v63 = vpop.f32.mrf.mxu0  ;;  %v1292_v1 = vpop.f32.mrf.mxu1 }
  0xe4   : > { %v636_v2 = vsel %vm1522_vm2, %v623_v61, -1e+09  ;;  %v637_v3 = vsel %vm1522_vm2, %v624_v62, -1e+09 }
  0xe5   : > { %v388_v4 = vpop.f32.mrf.mxu0  ;;  %v434_v5 = vpop.f32.mrf.mxu1  ;;  %v649_v6 = vsel %vm642_vm3, %v636_v2, -inf  ;;  %v652_v9 = vsel %vm642_vm3, %v637_v3, -inf }
  0xe6   : > { %650 = vmax.xlane.f32.xlu1 %v649_v6 }
  0xe7   : > { %v1287_v7 = vpop.f32.mrf.mxu0  ;;  %v1293_v8 = vpop.f32.mrf.mxu1 }
  0xe9   : > { %v477_v10 = vpop.f32.mrf.mxu0  ;;  %v523_v11 = vpop.f32.mrf.mxu1 }
  0xea   : > { %v625_v12 = vmul.f32 0.5, %v477_v10  ;;  %v626_v13 = vmul.f32 0.5, %v523_v11  ;;  %653 = vmax.xlane.f32.xlu1 %v652_v9 }
  0xeb   : > { %v1298_v14 = vpop.f32.mrf.mxu0  ;;  %v1304_v15 = vpop.f32.mrf.mxu1 }
  0xec   : > { %v639_v16 = vsel %vm1522_vm2, %v626_v13, -1e+09  ;;  %v638_v17 = vsel %vm1522_vm2, %v625_v12, -1e+09  ;;  %v228_v12 = vld [vmem:[%s1582_s23] sm:$0xff]  ;;  %v229_v13 = vld [vmem:[%s1582_s23 + $0x8] sm:$0xff] }
  0xed   : > { %v480_v18 = vpop.f32.mrf.mxu0  ;;  %v526_v19 = vpop.f32.mrf.mxu1  ;;  %v658_v20 = vsel %vm642_vm3, %v639_v16, -inf  ;;  %v655_v21 = vsel %vm642_vm3, %v638_v17, -inf }
  0xee   : > { %659 = vmax.xlane.f32.xlu1 %v658_v20  ;;  %656 = vmax.xlane.f32.xlu0 %v655_v21  ;;  %v230_v21 = vld [vmem:[%s1582_s23 + $0x10] sm:$0xff] }
  0xef   : > { %v1299_v22 = vpop.f32.mrf.mxu0  ;;  %v1305_v23 = vpop.f32.mrf.mxu1 }
  0xf0   : > { %v741_v22 = vpack.c.bf16 %v230_v21, %v230_v21  ;;  %v231_v23 = vld [vmem:[%s1582_s23 + $0x18] sm:$0xff] }
  0xf1   : > { %v569_v24 = vpop.f32.mrf.mxu0  ;;  %v615_v25 = vpop.f32.mrf.mxu1 }
  0xf2   : > { %v627_v26 = vmul.f32 0.5, %v569_v24  ;;  %v628_v27 = vmul.f32 0.5, %v615_v25  ;;  %v742_v24 = vpack.c.bf16 %v231_v23, %v231_v23  ;;  %v844_v25 = vsel %vm750_vm4, %v741_v22, 0 }
  0xf3   : > { %v1310_v28 = vpop.f32.mrf.mxu0  ;;  %v1316_v29 = vpop.f32.mrf.mxu1 }
  0xf4   : > { %v641_v30 = vsel %vm1522_vm2, %v628_v27, -1e+09  ;;  %v640_v31 = vsel %vm1522_vm2, %v627_v26, -1e+09  ;;  %v890_v26 = vsel %vm750_vm4, %v742_v24, 0  ;;  %v232_v27 = vld [vmem:[%s1582_s23 + $0x20] sm:$0xff] }
  0xf5   : > { %v572_v32 = vpop.f32.mrf.mxu0  ;;  %v618_v33 = vpop.f32.mrf.mxu1  ;;  %v664_v34 = vsel %vm642_vm3, %v641_v30, -inf  ;;  %v661_v35 = vsel %vm642_vm3, %v640_v31, -inf  ;;  %v743_v28 = vpack.c.bf16 %v232_v27, %v232_v27  ;;  %v233_v29 = vld [vmem:[%s1582_s23 + $0x28] sm:$0xff] }
  0xf6   : > { %665 = vmax.xlane.f32.xlu1 %v664_v34  ;;  %662 = vmax.xlane.f32.xlu0 %v661_v35  ;;  %v234_v33 = vld [vmem:[%s1582_s23 + $0x30] sm:$0xff]  ;;  %v235_v35 = vld [vmem:[%s1582_s23 + $0x38] sm:$0xff] }
  0xf7   : > { %v1311_v36 = vpop.f32.mrf.mxu0  ;;  %v1317_v37 = vpop.f32.mrf.mxu1  ;;  %v745_v34 = vpack.c.bf16 %v234_v33, %v234_v33 }
  0xf8   : > { %v746_v37 = vpack.c.bf16 %v235_v35, %v235_v35 }
  0xf9   : > { %v1028_v36 = vsel %vm750_vm4, %v745_v34, 0 }
 0x167   : > { %v645_v38 = vpop.xlane.xlu0 %644 }
 0x168   : > { %v667_v39 = vsub.f32 %v634_v51, %v645_v38  ;;  %v1074_v38 = vsel %vm750_vm4, %v746_v37, 0 }
 0x16a   : > { %v675_v40 = vmul.f32 1.442695, %v667_v39 }
 0x16b   : > { %v648_v41 = vpop.xlane.xlu0 %647 }
 0x16c   : > { %1376 = vpow2.f32 %v675_v40  ;;  %v668_v42 = vsub.f32 %v1530_v52, %v648_v41 }
 0x16e   : > { %v677_v43 = vmul.f32 1.442695, %v668_v42 }
 0x16f   : > { %v651_v44 = vpop.xlane.xlu1 %650 }
 0x170   : > { %1378 = vpow2.f32 %v677_v43  ;;  %v669_v45 = vsub.f32 %v636_v2, %v651_v44 }
 0x172   : > { %v679_v46 = vmul.f32 1.442695, %v669_v45 }
 0x173   : > { %v654_v47 = vpop.xlane.xlu1 %653 }
 0x174   : > { %1380 = vpow2.f32 %v679_v46  ;;  %v670_v48 = vsub.f32 %v637_v3, %v654_v47 }
 0x176   : > { %v681_v49 = vmul.f32 1.442695, %v670_v48 }
 0x177   : > { %v660_v50 = vpop.xlane.xlu1 %659  ;;  %v657_v53 = vpop.xlane.xlu0 %656 }
 0x178   : > { %1382 = vpow2.f32 %v681_v49  ;;  %v672_v54 = vsub.f32 %v639_v16, %v660_v50  ;;  %v671_v55 = vsub.f32 %v638_v17, %v657_v53  ;;  %v739_v16 = vpack.c.bf16 %v228_v12, %v228_v12 }
 0x179   : > { %v1554_v51 = vpop.eup %1376  ;;  %v740_v17 = vpack.c.bf16 %v229_v13, %v229_v13 }
 0x17a   : > { %v685_v56 = vmul.f32 1.442695, %v672_v54  ;;  %v683_v57 = vmul.f32 1.442695, %v671_v55  ;;  %v691_v52 = vsel %vm642_vm3, %v1554_v51, 0.0  ;;  %v752_v19 = vsel %vm750_vm4, %v739_v16, 0 }
 0x17b   : > { %692 = vadd.xlane.f32.xlu0 %v691_v52  ;;  %v798_v20 = vsel %vm750_vm4, %v740_v17, 0  ;;  %1319 = vmatpush3.bf16.msra.mxu0 %v752_v19 }
 0x17c   : > { %1384 = vpow2.f32 %v685_v56  ;;  %1325 = vmatpush3.bf16.msra.mxu1 %v798_v20  ;;  %1330 = vmatprep.subr.bf16.mxu0 %v1416_v0 }
 0x17d   : > { %v1558_v58 = vpop.eup %1378  ;;  %1386 = vpow2.f32 %v683_v57  ;;  %1336 = vmatprep.subr.bf16.mxu1 %v1416_v0 }
 0x17e   : > { %v694_v59 = vsel %vm642_vm3, %v1558_v58, 0.0 }
 0x17f   : > { %695 = vadd.xlane.f32.xlu1 %v694_v59  ;;  %v666_v60 = vpop.xlane.xlu1 %665  ;;  %v663_v61 = vpop.xlane.xlu0 %662 }
 0x180   : > { %v674_v62 = vsub.f32 %v641_v30, %v666_v60  ;;  %v673_v63 = vsub.f32 %v640_v31, %v663_v61  ;;  %v936_v30 = vsel %vm750_vm4, %v743_v28, 0  ;;  %v744_v31 = vpack.c.bf16 %v233_v29, %v233_v29 }
 0x181   : > { %v1562_v1 = vpop.eup %1380 }
 0x182   : > { %v689_v2 = vmul.f32 1.442695, %v674_v62  ;;  %v687_v3 = vmul.f32 1.442695, %v673_v63  ;;  %v697_v4 = vsel %vm642_vm3, %v1562_v1, 0.0  ;;  %v982_v32 = vsel %vm750_vm4, %v744_v31, 0 }
 0x183   : > { %698 = vadd.xlane.f32.xlu0 %v697_v4 }
 0x184   : > { %1388 = vpow2.f32 %v689_v2 }
 0x185   : > { %v1566_v5 = vpop.eup %1382  ;;  %1390 = vpow2.f32 %v687_v3 }
 0x186   : > { %v700_v6 = vsel %vm642_vm3, %v1566_v5, 0.0 }
 0x187   : > { %701 = vadd.xlane.f32.xlu1 %v700_v6 }
 0x189   : > { %v1570_v7 = vpop.eup %1384 }
 0x18a   : > { %v1572_v8 = vpop.eup %1386  ;;  %v706_v9 = vsel %vm642_vm3, %v1570_v7, 0.0 }
 0x18b   : > { %707 = vadd.xlane.f32.xlu1 %v706_v9  ;;  %v703_v10 = vsel %vm642_vm3, %v1572_v8, 0.0 }
 0x18c   : > { %704 = vadd.xlane.f32.xlu0 %v703_v10 }
 0x191   : > { %v1584_v11 = vpop.eup %1388 }
 0x192   : > { %v1588_v14 = vpop.eup %1390  ;;  %v712_v15 = vsel %vm642_vm3, %v1584_v11, 0.0 }
 0x193   : > { %713 = vadd.xlane.f32.xlu1 %v712_v15  ;;  %v709_v18 = vsel %vm642_vm3, %v1588_v14, 0.0 }
 0x194   : > { %710 = vadd.xlane.f32.xlu0 %v709_v18 }
 0x204   : > { %v693_v39 = vpop.xlane.xlu0 %692 }
 0x205   : > { %1392 = vrcp.f32 %v693_v39 }
 0x208   : > { %v696_v40 = vpop.xlane.xlu1 %695 }
 0x209   : > { %1394 = vrcp.f32 %v696_v40 }
 0x20c   : > { %v699_v41 = vpop.xlane.xlu0 %698 }
 0x20d   : > { %1396 = vrcp.f32 %v699_v41 }
 0x210   : > { %v702_v42 = vpop.xlane.xlu1 %701 }
 0x211   : > { %1398 = vrcp.f32 %v702_v42 }
 0x212   : > { %v1393_v43 = vpop.eup %1392 }
 0x213   : > { %v723_v44 = vmul.f32 %v1393_v43, %v1554_v51 }
 0x214   : > { %v708_v45 = vpop.xlane.xlu1 %707 }
 0x215   : > { %1400 = vrcp.f32 %v708_v45  ;;  %v705_v46 = vpop.xlane.xlu0 %704  ;;  %v731_v47 = vpack.c.bf16 %v723_v44, %v723_v44 }
 0x216   : > { %v1395_v48 = vpop.eup %1394  ;;  %1402 = vrcp.f32 %v705_v46 }
 0x217   : > { %1321 = vmatmul.mubr.msk.bf16.vlgmr.msra.gmra.mxu0 %vm642_vm3, %v731_v47  ;;  %v724_v49 = vmul.f32 %v1395_v48, %v1558_v58 }
 0x218   : > { %1331 = vmatpush3.bf16.msra.mxu0 %v844_v25  ;;  %1332 = vmatprep.mubr.msk.bf16.mxu0 %vm1417_vm0, %v1416_v0 }
 0x219   : > { %v732_v50 = vpack.c.bf16 %v724_v49, %v724_v49  ;;  %1342 = vmatprep.subr.bf16.mxu0 %v1416_v0 }
 0x21a   : > { %v1397_v53 = vpop.eup %1396 }
 0x21b   : > { %1327 = vmatmul.mubr.msk.bf16.vlgmr.msra.gmra.mxu1 %vm642_vm3, %v732_v50  ;;  %v725_v54 = vmul.f32 %v1397_v53, %v1562_v1 }
 0x21c   : > { %1337 = vmatpush3.bf16.msra.mxu1 %v890_v26  ;;  %v714_v55 = vpop.xlane.xlu1 %713  ;;  %1338 = vmatprep.mubr.msk.bf16.mxu1 %vm1417_vm0, %v1416_v0 }
 0x21d   : > { %1404 = vrcp.f32 %v714_v55  ;;  %v711_v51 = vpop.xlane.xlu0 %710  ;;  %v733_v56 = vpack.c.bf16 %v725_v54, %v725_v54  ;;  %1348 = vmatprep.subr.bf16.mxu1 %v1416_v0 }
 0x21e   : > { %v1399_v57 = vpop.eup %1398  ;;  %1406 = vrcp.f32 %v711_v51 }
 0x21f   : > { %1333 = vmatmul.mubr.msk.bf16.vlgmr.msra.gmra.mxu0 %vm642_vm3, %v733_v56  ;;  %v726_v52 = vmul.f32 %v1399_v57, %v1566_v5 }
 0x220   : > { %1343 = vmatpush3.bf16.msra.mxu0 %v936_v30  ;;  %1344 = vmatprep.mubr.msk.bf16.mxu0 %vm1417_vm0, %v1416_v0 }
 0x221   : > { %v734_v58 = vpack.c.bf16 %v726_v52, %v726_v52  ;;  %1354 = vmatprep.subr.bf16.mxu0 %v1416_v0 }
 0x222   : > { %v1401_v59 = vpop.eup %1400 }
 0x223   : > { %v1403_v60 = vpop.eup %1402  ;;  %1339 = vmatmul.mubr.msk.bf16.vlgmr.msra.gmra.mxu1 %vm642_vm3, %v734_v58  ;;  %v728_v62 = vmul.f32 %v1401_v59, %v1570_v7 }
 0x224   : > { %1349 = vmatpush3.bf16.msra.mxu1 %v982_v32  ;;  %v727_v61 = vmul.f32 %v1403_v60, %v1572_v8  ;;  %1350 = vmatprep.mubr.msk.bf16.mxu1 %vm1417_vm0, %v1416_v0 }
 0x225   : > { %1360 = vmatprep.subr.bf16.mxu1 %v1416_v0  ;;  %v736_v1 = vpack.c.bf16 %v728_v62, %v728_v62 }
 0x226   : > { %v735_v63 = vpack.c.bf16 %v727_v61, %v727_v61 }
 0x228   : > { %1345 = vmatmul.mubr.msk.bf16.vlgmr.msra.gmra.mxu0 %vm642_vm3, %v735_v63 }
 0x229   : > { %1355 = vmatpush3.bf16.msra.mxu0 %v1028_v36  ;;  %1356 = vmatprep.mubr.msk.bf16.mxu0 %vm1417_vm0, %v1416_v0 }
 0x22a   : > { %v1405_v2 = vpop.eup %1404 }
 0x22b   : > { %v1407_v3 = vpop.eup %1406  ;;  %1351 = vmatmul.mubr.msk.bf16.vlgmr.msra.gmra.mxu1 %vm642_vm3, %v736_v1  ;;  %v730_v5 = vmul.f32 %v1405_v2, %v1584_v11 }
 0x22c   : > { %1361 = vmatpush3.bf16.msra.mxu1 %v1074_v38  ;;  %v729_v4 = vmul.f32 %v1407_v3, %v1588_v14  ;;  %1362 = vmatprep.mubr.msk.bf16.mxu1 %vm1417_vm0, %v1416_v0 }
 0x22d   : > { %v738_v7 = vpack.c.bf16 %v730_v5, %v730_v5 }
 0x22e   : > { %v737_v6 = vpack.c.bf16 %v729_v4, %v729_v4 }
 0x230   : > { %1357 = vmatmul.mubr.msk.bf16.vlgmr.msra.gmra.mxu0 %vm642_vm3, %v737_v6 }
 0x233   : > { %1363 = vmatmul.mubr.msk.bf16.vlgmr.msra.gmra.mxu1 %vm642_vm3, %v738_v7 }
 0x2d7   : > { %v788_v8 = vpop.f32.mrf.mxu0 }
 0x2d8   : > { %1116 = vst.msk [vmem:[%s1646_s26] sm:$0xff] %vm252_vm1, %v788_v8 }
 0x2d9   : > { %v1322_v0 = vpop.f32.mrf.mxu0 }
 0x2db   : > { %v791_v9 = vpop.f32.mrf.mxu0  ;;  %v834_v10 = vpop.f32.mrf.mxu1 }
 0x2dc   : > { %1117 = vst.msk [vmem:[%s1646_s26 + $0x8] sm:$0xff] %vm252_vm1, %v834_v10 }
 0x2dd   : > { %v1323_v11 = vpop.f32.mrf.mxu0  ;;  %v1328_v12 = vpop.f32.mrf.mxu1 }
 0x2df   : > { %v837_v13 = vpop.f32.mrf.mxu1  ;;  %v880_v14 = vpop.f32.mrf.mxu0 }
 0x2e0   : > { %1118 = vst.msk [vmem:[%s1646_s26 + $0x10] sm:$0xff] %vm252_vm1, %v880_v14 }
 0x2e1   : > { %v1329_v15 = vpop.f32.mrf.mxu1  ;;  %v1334_v16 = vpop.f32.mrf.mxu0 }
 0x2e3   : > { %v883_v17 = vpop.f32.mrf.mxu0  ;;  %v926_v18 = vpop.f32.mrf.mxu1 }
 0x2e4   : > { %1119 = vst.msk [vmem:[%s1646_s26 + $0x18] sm:$0xff] %vm252_vm1, %v926_v18 }
 0x2e5   : > { %v1335_v19 = vpop.f32.mrf.mxu0  ;;  %v1340_v20 = vpop.f32.mrf.mxu1 }
 0x2e7   : > { %v929_v21 = vpop.f32.mrf.mxu1 }
 0x2e8   : > { %v972_v22 = vpop.f32.mrf.mxu0 }
 0x2e9   : > { %1120 = vst.msk [vmem:[%s1646_s26 + $0x20] sm:$0xff] %vm252_vm1, %v972_v22  ;;  %v1341_v23 = vpop.f32.mrf.mxu1 }
 0x2ea   : > { %v1346_v24 = vpop.f32.mrf.mxu0 }
 0x2eb   : > { %v1018_v25 = vpop.f32.mrf.mxu1 }
 0x2ec   : > { %v975_v26 = vpop.f32.mrf.mxu0  ;;  %1121 = vst.msk [vmem:[%s1646_s26 + $0x28] sm:$0xff] %vm252_vm1, %v1018_v25 }
 0x2ed   : > { %v1352_v27 = vpop.f32.mrf.mxu1 }
 0x2ee   : > { %v1347_v28 = vpop.f32.mrf.mxu0 }
 0x2ef   : > { %v1021_v29 = vpop.f32.mrf.mxu1 }
 0x2f0   : > { %v1064_v30 = vpop.f32.mrf.mxu0 }
 0x2f1   : > { %1122 = vst.msk [vmem:[%s1646_s26 + $0x30] sm:$0xff] %vm252_vm1, %v1064_v30  ;;  %v1353_v31 = vpop.f32.mrf.mxu1 }
 0x2f2   : > { %v1358_v32 = vpop.f32.mrf.mxu0 }
 0x2f3   : > { %v1110_v33 = vpop.f32.mrf.mxu1 }
 0x2f4   : > { %v1067_v34 = vpop.f32.mrf.mxu0  ;;  %1123 = vst.msk [vmem:[%s1646_s26 + $0x38] sm:$0xff] %vm252_vm1, %v1110_v33 }
 0x2f5   : > { %v1364_v35 = vpop.f32.mrf.mxu1 }
 0x2f6   : > { %v1359_v36 = vpop.f32.mrf.mxu0 }
 0x2f7   : > { %v1113_v37 = vpop.f32.mrf.mxu1 }
 0x2f9   : > { %v1365_v38 = vpop.f32.mrf.mxu1 }
 0x2fa PF: > { %s13_s12 = sadd.s32 1, %s1414_s12  }
 0x2fb   : > { %p10_p4 = scmp.ge.s32.totalorder %s13_s12, 4  }
 0x2fd   :  { %12 = sbr.rel (!%p10_p4) target bundleno = 1 (0x1), region = 68 }

// kernel: transformer_no_embed_forward.66
= control target key start
LH: loop header
LB: loop body
LE: loop exit
PB: predicated region body
PF: predicated region fallthrough
CT: control target
= control target key end

     0   :  { %vm22_vm0 = vcmask 261120   ;;  %v212_v0 = vmov 0.0   ;;  %vm213_vm1 = vmmov 0   ;;  %s290_s1 = inlined_call_operand.vmem [shape: bf16[128,32], index: 1, kind: input, shape index: {}]   ;;  %s291_s0 = inlined_call_operand.vmem [shape: f32[16,128], index: 0, kind: input, shape index: {}]   ;;  %s292_s2 = inlined_call_operand.vmem [shape: f32[1,32], index: 2, kind: input, shape index: {}]   ;;  %s293_s3 = inlined_call_operand.vmem [shape: f32[16,32], index: 3, kind: input, shape index: {}]   ;;  %s294_s4 = inlined_call_operand.vmem [shape: f32[16,32], index: 4, kind: output, shape index: {}]  }
   0x1   :  { %182 = vmatprep.subr.bf16.mxu0 %v212_v0  ;;  %v204_v1 = vld [vmem:[%s290_s1 + $0x38] sm:$0xff]   ;;  %198 = vmatprep.mubr.msk.bf16.mxu0 %vm213_vm1, %v212_v0  ;;  %23 = vst.msk [vmem:[#allocation2] sm:$0xff] %vm22_vm0, %v212_v0  ;;  %24 = vst.msk [vmem:[#allocation2 + $0x8] sm:$0xff] %vm22_vm0, %v212_v0  ;;  %v205_v2 = vld [vmem:[%s290_s1 + $0x30] sm:$0xff]  }
   0x2   :  { %183 = vmatpush3.bf16.msra.mxu0 %v204_v1  ;;  %v206_v3 = vld [vmem:[%s290_s1 + $0x28] sm:$0xff]   ;;  %v207_v4 = vld [vmem:[%s290_s1 + $0x20] sm:$0xff]   ;;  %v208_v5 = vld [vmem:[%s290_s1 + $0x18] sm:$0xff]  }
   0x3   :  { %184 = vmatprep.subr.bf16.mxu0 %v212_v0  ;;  %v209_v6 = vld [vmem:[%s290_s1 + $0x10] sm:$0xff]   ;;  %v210_v7 = vld [vmem:[%s290_s1 + $0x8] sm:$0xff]   ;;  %v211_v8 = vld [vmem:[%s290_s1] sm:$0xff]  }
   0x4   :  { %v27_v9 = vld [vmem:[%s291_s0] sm:$0xff]  ;;  %v28_v10 = vld [vmem:[%s291_s0 + $0x8] sm:$0xff] }
   0x5   :  { %v29_v11 = vpack.c.bf16 %v28_v10, %v27_v9  ;;  %v172_v20 = vld [vmem:[%s292_s2] ss:$0 sm:$0xff]  ;;  %v155_v25 = vld [vmem:[%s293_s3 + $0x8] sm:$0xff] }
   0x6   :  { %185 = vmatpush3.bf16.msra.mxu0 %v205_v2  ;;  %v154_v22 = vld [vmem:[%s293_s3] sm:$0xff] }
   0x7   :  { %186 = vmatprep.subr.bf16.mxu0 %v212_v0 }
   0x8   :  { %v25_v12 = vld [vmem:[#allocation2] sm:$0xff]  ;;  %v26_v16 = vld [vmem:[#allocation2 + $0x8] sm:$0xff] }
   0xa   :  { %187 = vmatpush3.bf16.msra.mxu0 %v206_v3 }
   0xb   :  { %188 = vmatprep.subr.bf16.mxu0 %v212_v0 }
   0xe   :  { %189 = vmatpush3.bf16.msra.mxu0 %v207_v4 }
   0xf   :  { %190 = vmatprep.subr.bf16.mxu0 %v212_v0 }
  0x12   :  { %191 = vmatpush3.bf16.msra.mxu0 %v208_v5 }
  0x13   :  { %192 = vmatprep.subr.bf16.mxu0 %v212_v0 }
  0x16   :  { %193 = vmatpush3.bf16.msra.mxu0 %v209_v6 }
  0x17   :  { %194 = vmatprep.subr.bf16.mxu0 %v212_v0 }
  0x1a   :  { %195 = vmatpush3.bf16.msra.mxu0 %v210_v7 }
  0x1b   :  { %196 = vmatprep.subr.bf16.mxu0 %v212_v0 }
  0x1e   :  { %197 = vmatpush3.bf16.msra.mxu0 %v211_v8 }
  0x21   :  { %199 = vmatmul.mubr.bf16.vlgmr.msra.gmra.mxu0 %v29_v11 }
  0xe1   :  { %v128_v13 = vpop.f32.mrf.mxu0 }
  0xe2   :  { %v135_v14 = vadd.f32 %v128_v13, %v25_v12 }
  0xe3   :  { %v200_v15 = vpop.f32.mrf.mxu0 }
  0xe4   :  { %138 = vst.msk [vmem:[#allocation2] sm:$0xff] %vm22_vm0, %v135_v14 }
  0xe5   :  { %v131_v17 = vpop.f32.mrf.mxu0 }
  0xe6   :  { %v136_v18 = vadd.f32 %v131_v17, %v26_v16 }
  0xe7   :  { %v201_v19 = vpop.f32.mrf.mxu0 }
  0xe8   :  { %139 = vst.msk [vmem:[#allocation2 + $0x8] sm:$0xff] %vm22_vm0, %v136_v18 }
  0xeb   :  { %v143_v21 = vld [vmem:[#allocation2] sm:$0xff] }
  0xec   :  { %v152_v23 = vadd.f32 %v172_v20, %v143_v21 }
  0xee   :  { %v156_v24 = vadd.f32 %v154_v22, %v152_v23 }
  0xef   :  { %v144_v26 = vld [vmem:[#allocation2 + $0x8] sm:$0xff] }
  0xf0   :  { %158 = vst.msk [vmem:[%s294_s4] sm:$0xff] %vm22_vm0, %v156_v24  ;;  %v153_v27 = vadd.f32 %v172_v20, %v144_v26 }
  0xf2   :  { %v157_v28 = vadd.f32 %v155_v25, %v153_v27 }
  0xf4   :  { %159 = vst.msk [vmem:[%s294_s4 + $0x8] sm:$0xff] %vm22_vm0, %v157_v28 }

// kernel: transformer_no_embed_forward.80
= control target key start
LH: loop header
LB: loop body
LE: loop exit
PB: predicated region body
PF: predicated region fallthrough
CT: control target
= control target key end

     0   :  { %v501_v3 = vmov 0   ;;  %vm111_vm0 = vcmask 261120   ;;  %v287_v36 = vlaneseq  ;;  %s689_s1 = inlined_call_operand.vmem [shape: bf16[32,1024], index: 1, kind: input, shape index: {}]   ;;  %s690_s0 = inlined_call_operand.vmem [shape: f32[16,32], index: 0, kind: input, shape index: {}]   ;;  %s691_s2 = inlined_call_operand.vmem [shape: f32[16,1024], index: 2, kind: output, shape index: {}]  }
   0x1   :  { %v23_v0 = vld [vmem:[%s689_s1 + $0x40] sm:$0xff]  ;;  %v24_v2 = vld [vmem:[%s689_s1 + $0x48] sm:$0xff]  ;;  %147 = vmatprep.mubr.bf16.mxu0 %v501_v3  ;;  %190 = vmatprep.mubr.bf16.mxu1 %v501_v3  ;;  %v25_v16 = vld [vmem:[%s689_s1 + $0x50] sm:$0xff] }
   0x2   :  { %v27_v1 = vld [vmem:[%s689_s1 + $0x60] sm:$0xff]  ;;  %v28_v5 = vld [vmem:[%s689_s1 + $0x68] sm:$0xff]  ;;  %v29_v17 = vld [vmem:[%s689_s1 + $0x70] sm:$0xff]  ;;  %v288_v39 = vand.u32 127, %v287_v36 }
   0x3   :  { %v453_v4 = vcombine.high %v23_v0, %v27_v1  ;;  %v452_v6 = vcombine.low %v23_v0, %v27_v1  ;;  %v15_v7 = vld [vmem:[%s689_s1] sm:$0xff]  ;;  %v455_v9 = vcombine.high %v24_v2, %v28_v5  ;;  %v454_v10 = vcombine.low %v24_v2, %v28_v5  ;;  %v16_v12 = vld [vmem:[%s689_s1 + $0x8] sm:$0xff]  ;;  %v26_v20 = vld [vmem:[%s689_s1 + $0x58] sm:$0xff] }
   0x4   :  { %v19_v8 = vld [vmem:[%s689_s1 + $0x20] sm:$0xff]  ;;  %v20_v13 = vld [vmem:[%s689_s1 + $0x28] sm:$0xff]  ;;  %v30_v21 = vld [vmem:[%s689_s1 + $0x78] sm:$0xff]  ;;  %v457_v23 = vcombine.high %v25_v16, %v29_v17  ;;  %v456_v30 = vcombine.low %v25_v16, %v29_v17  ;;  %v295_v44 = vadd.s32 896, %v288_v39 }
   0x5   :  { %v445_v11 = vcombine.high %v15_v7, %v19_v8  ;;  %127 = vmatprep.subr.bf16.mxu0 %v453_v4  ;;  %v447_v14 = vcombine.high %v16_v12, %v20_v13  ;;  %v12_v15 = vld [vmem:[%s690_s0] sm:$0xff]  ;;  %170 = vmatprep.subr.bf16.mxu1 %v455_v9  ;;  %v444_v18 = vcombine.low %v15_v7, %v19_v8  ;;  %v13_v19 = vld [vmem:[%s690_s0 + $0x8] sm:$0xff]  ;;  %v17_v25 = vld [vmem:[%s689_s1 + $0x10] sm:$0xff] }
   0x6   :  { %128 = vmatpush1.bf16.msra.mxu0 %v452_v6  ;;  %171 = vmatpush1.bf16.msra.mxu1 %v454_v10  ;;  %v446_v22 = vcombine.low %v16_v12, %v20_v13  ;;  %v459_v24 = vcombine.high %v26_v20, %v30_v21  ;;  %v21_v26 = vld [vmem:[%s689_s1 + $0x30] sm:$0xff]  ;;  %v14_v27 = vpack.c.bf16 %v13_v19, %v12_v15  ;;  %v18_v28 = vld [vmem:[%s689_s1 + $0x18] sm:$0xff]  ;;  %vm303_vm1 = vcmp.lt.s32.totalorder %v295_v44, 1001 }
   0x7   :  { %129 = vmatprep.subr.bf16.mxu0 %v445_v11  ;;  %172 = vmatprep.subr.bf16.mxu1 %v447_v14  ;;  %v22_v29 = vld [vmem:[%s689_s1 + $0x38] sm:$0xff]  ;;  %v458_v31 = vcombine.low %v26_v20, %v30_v21  ;;  %v449_v32 = vcombine.high %v17_v25, %v21_v26  ;;  %v448_v34 = vcombine.low %v17_v25, %v21_v26 }
   0x8   :  { %v451_v33 = vcombine.high %v18_v28, %v22_v29  ;;  %v450_v35 = vcombine.low %v18_v28, %v22_v29 }
   0xa   :  { %130 = vmatpush1.bf16.msra.mxu0 %v444_v18  ;;  %173 = vmatpush1.bf16.msra.mxu1 %v446_v22 }
   0xb   :  { %213 = vmatprep.subr.bf16.mxu0 %v457_v23  ;;  %256 = vmatprep.subr.bf16.mxu1 %v459_v24 }
   0xd   :  { %460 = vmatmul.mubr.msk.bf16.vlgmr.msra.gmra.mxu0 %vm111_vm0, %v14_v27  ;;  %461 = vmatmul.mubr.msk.bf16.vlgmr.msra.gmra.mxu1 %vm111_vm0, %v14_v27 }
   0xe   :  { %214 = vmatpush1.bf16.msra.mxu0 %v456_v30  ;;  %257 = vmatpush1.bf16.msra.mxu1 %v458_v31 }
   0xf   :  { %215 = vmatprep.subr.bf16.mxu0 %v449_v32  ;;  %258 = vmatprep.subr.bf16.mxu1 %v451_v33 }
  0x10   :  { %233 = vmatprep.mubr.bf16.mxu0 %v501_v3  ;;  %276 = vmatprep.mubr.bf16.mxu1 %v501_v3 }
  0x12   :  { %216 = vmatpush1.bf16.msra.mxu0 %v448_v34  ;;  %259 = vmatpush1.bf16.msra.mxu1 %v450_v35 }
  0x15   :  { %462 = vmatmul.mubr.msk.bf16.vlgmr.msra.gmra.mxu0 %vm111_vm0, %v14_v27  ;;  %463 = vmatmul.mubr.msk.bf16.vlgmr.msra.gmra.mxu1 %vm111_vm0, %v14_v27 }
  0xcd   :  { %v149_v37 = vpop.f32.mrf.mxu0  ;;  %v192_v38 = vpop.f32.mrf.mxu1 }
  0xce   :  { %v320_v46 = vmax.f32 %v149_v37, %v192_v38 }
  0xcf   :  { %v151_v40 = vpop.f32.mrf.mxu0  ;;  %v194_v41 = vpop.f32.mrf.mxu1 }
  0xd0   :  { %v321_v49 = vmax.f32 %v151_v40, %v194_v41 }
  0xd1   :  { %v153_v42 = vpop.f32.mrf.mxu0  ;;  %v196_v43 = vpop.f32.mrf.mxu1 }
  0xd2   :  { %v329_v53 = vmax.f32 %v153_v42, %v196_v43 }
  0xd3   :  { %v155_v45 = vpop.f32.mrf.mxu0  ;;  %v198_v47 = vpop.f32.mrf.mxu1 }
  0xd4   :  { %v330_v58 = vmax.f32 %v155_v45, %v198_v47 }
  0xd5   :  { %v235_v48 = vpop.f32.mrf.mxu0  ;;  %v278_v51 = vpop.f32.mrf.mxu1 }
  0xd6   :  { %v322_v50 = vmax.f32 %v320_v46, %v235_v48 }
  0xd7   :  { %v237_v52 = vpop.f32.mrf.mxu0  ;;  %v280_v55 = vpop.f32.mrf.mxu1 }
  0xd8   :  { %v323_v54 = vmax.f32 %v321_v49, %v237_v52  ;;  %v311_v56 = vsel %vm303_vm1, %v280_v55, -1e+30  ;;  %v324_v59 = vmax.f32 %v322_v50, %v278_v51 }
  0xd9   :  { %v239_v57 = vpop.f32.mrf.mxu0  ;;  %v282_v62 = vpop.f32.mrf.mxu1 }
  0xda   :  { %v325_v60 = vmax.f32 %v323_v54, %v311_v56  ;;  %v331_v61 = vmax.f32 %v329_v53, %v239_v57 }
  0xdb   :  { %v241_v63 = vpop.f32.mrf.mxu0  ;;  %v284_v1 = vpop.f32.mrf.mxu1 }
  0xdc   :  { %v332_v0 = vmax.f32 %v330_v58, %v241_v63  ;;  %v326_v2 = vmax.f32 %v324_v59, %v325_v60  ;;  %v319_v3 = vsel %vm303_vm1, %v284_v1, -1e+30  ;;  %v333_v4 = vmax.f32 %v331_v61, %v282_v62 }
  0xde   :  { %v334_v5 = vmax.f32 %v332_v0, %v319_v3  ;;  %327 = vmax.xlane.f32.xlu0 %v326_v2 }
  0xe0   :  { %v335_v6 = vmax.f32 %v333_v4, %v334_v5 }
  0xe2   :  { %336 = vmax.xlane.f32.xlu0 %v335_v6 }
 0x167   :  { %v328_v7 = vpop.xlane.xlu0 %327 }
 0x168   :  { %v577_v8 = vsub.f32 %v149_v37, %v328_v7  ;;  %v579_v9 = vsub.f32 %v151_v40, %v328_v7  ;;  %v581_v10 = vsub.f32 %v192_v38, %v328_v7  ;;  %v583_v11 = vsub.f32 %v194_v41, %v328_v7 }
 0x169   :  { %v596_v20 = vsub.f32 %v235_v48, %v328_v7  ;;  %v604_v26 = vsub.f32 %v237_v52, %v328_v7  ;;  %v609_v29 = vsub.f32 %v278_v51, %v328_v7  ;;  %v615_v33 = vsub.f32 %v311_v56, %v328_v7 }
 0x16a   :  { %v354_v12 = vmul.f32 1.442695, %v577_v8  ;;  %v356_v13 = vmul.f32 1.442695, %v579_v9  ;;  %v358_v14 = vmul.f32 1.442695, %v581_v10 }
 0x16b   :  { %v337_v15 = vpop.xlane.xlu0 %336  ;;  %v360_v21 = vmul.f32 1.442695, %v583_v11  ;;  %v362_v30 = vmul.f32 1.442695, %v596_v20  ;;  %v364_v34 = vmul.f32 1.442695, %v604_v26 }
 0x16c   :  { %465 = vpow2.f32 %v354_v12  ;;  %v588_v16 = vsub.f32 %v153_v42, %v337_v15  ;;  %v590_v17 = vsub.f32 %v155_v45, %v337_v15  ;;  %v592_v18 = vsub.f32 %v196_v43, %v337_v15 }
 0x16d   :  { %467 = vpow2.f32 %v356_v13  ;;  %v594_v19 = vsub.f32 %v198_v47, %v337_v15  ;;  %v600_v23 = vsub.f32 %v239_v57, %v337_v15  ;;  %v606_v27 = vsub.f32 %v241_v63, %v337_v15 }
 0x16e   :  { %v370_v22 = vmul.f32 1.442695, %v588_v16  ;;  %469 = vpow2.f32 %v358_v14  ;;  %v372_v24 = vmul.f32 1.442695, %v590_v17  ;;  %v374_v25 = vmul.f32 1.442695, %v592_v18 }
 0x16f   :  { %v376_v28 = vmul.f32 1.442695, %v594_v19  ;;  %v612_v31 = vsub.f32 %v282_v62, %v337_v15  ;;  %v378_v32 = vmul.f32 1.442695, %v600_v23  ;;  %v380_v35 = vmul.f32 1.442695, %v606_v27 }
 0x170   :  { %471 = vpow2.f32 %v370_v22  ;;  %v619_v36 = vsub.f32 %v319_v3, %v337_v15  ;;  %v366_v37 = vmul.f32 1.442695, %v609_v29  ;;  %v368_v39 = vmul.f32 1.442695, %v615_v33 }
 0x171   :  { %473 = vpow2.f32 %v372_v24  ;;  %v382_v38 = vmul.f32 1.442695, %v612_v31 }
 0x172   :  { %475 = vpow2.f32 %v360_v21  ;;  %v384_v42 = vmul.f32 1.442695, %v619_v36 }
 0x173   :  { %477 = vpow2.f32 %v374_v25 }
 0x174   :  { %479 = vpow2.f32 %v376_v28 }
 0x175   :  { %481 = vpow2.f32 %v362_v30 }
 0x176   :  { %483 = vpow2.f32 %v378_v32 }
 0x177   :  { %485 = vpow2.f32 %v364_v34 }
 0x178   :  { %487 = vpow2.f32 %v380_v35 }
 0x179   :  { %v466_v40 = vpop.eup %465  ;;  %489 = vpow2.f32 %v366_v37 }
 0x17a   :  { %v468_v41 = vpop.eup %467  ;;  %491 = vpow2.f32 %v382_v38 }
 0x17b   :  { %v386_v43 = vadd.f32 %v468_v41, %v466_v40  ;;  %v470_v44 = vpop.eup %469  ;;  %493 = vpow2.f32 %v368_v39 }
 0x17c   :  { %495 = vpow2.f32 %v384_v42 }
 0x17d   :  { %v472_v45 = vpop.eup %471  ;;  %v387_v46 = vadd.f32 %v470_v44, %v386_v43 }
 0x17e   :  { %v474_v47 = vpop.eup %473 }
 0x17f   :  { %v476_v48 = vpop.eup %475  ;;  %v395_v49 = vadd.f32 %v474_v47, %v472_v45 }
 0x180   :  { %v478_v50 = vpop.eup %477  ;;  %v388_v51 = vadd.f32 %v476_v48, %v387_v46 }
 0x181   :  { %v396_v52 = vadd.f32 %v478_v50, %v395_v49  ;;  %v480_v53 = vpop.eup %479 }
 0x182   :  { %v482_v54 = vpop.eup %481 }
 0x183   :  { %v397_v55 = vadd.f32 %v480_v53, %v396_v52  ;;  %v484_v56 = vpop.eup %483  ;;  %v389_v57 = vadd.f32 %v482_v54, %v388_v51 }
 0x184   :  { %v486_v58 = vpop.eup %485 }
 0x185   :  { %v398_v59 = vadd.f32 %v484_v56, %v397_v55  ;;  %v488_v60 = vpop.eup %487  ;;  %v390_v61 = vadd.f32 %v486_v58, %v389_v57 }
 0x186   :  { %v490_v62 = vpop.eup %489 }
 0x187   :  { %v399_v63 = vadd.f32 %v488_v60, %v398_v59  ;;  %v492_v0 = vpop.eup %491  ;;  %v391_v1 = vadd.f32 %v490_v62, %v390_v61 }
 0x188   :  { %v494_v2 = vpop.eup %493 }
 0x189   :  { %v400_v3 = vadd.f32 %v492_v0, %v399_v63  ;;  %v392_v4 = vadd.f32 %v494_v2, %v391_v1  ;;  %v496_v5 = vpop.eup %495 }
 0x18b   :  { %393 = vadd.xlane.f32.xlu1 %v392_v4  ;;  %v401_v6 = vadd.f32 %v496_v5, %v400_v3 }
 0x18f   :  { %402 = vadd.xlane.f32.xlu1 %v401_v6 }
 0x214   :  { %v394_v7 = vpop.xlane.xlu1 %393 }
 0x215   :  { %497 = vlog2.f32 %v394_v7 }
 0x218   :  { %v403_v12 = vpop.xlane.xlu1 %402 }
 0x219   :  { %499 = vlog2.f32 %v403_v12 }
 0x222   :  { %v498_v13 = vpop.eup %497 }
 0x223   :  { %v405_v14 = vmul.f32 0.6931472, %v498_v13 }
 0x225   :  { %v408_v15 = vsub.f32 %v577_v8, %v405_v14  ;;  %v409_v21 = vsub.f32 %v579_v9, %v405_v14  ;;  %v410_v22 = vsub.f32 %v581_v10, %v405_v14  ;;  %v411_v24 = vsub.f32 %v583_v11, %v405_v14 }
 0x226   :  { %v500_v25 = vpop.eup %499  ;;  %v412_v28 = vsub.f32 %v596_v20, %v405_v14  ;;  %v413_v30 = vsub.f32 %v604_v26, %v405_v14  ;;  %v414_v32 = vsub.f32 %v609_v29, %v405_v14  ;;  %v415_v34 = vsub.f32 %v615_v33, %v405_v14 }
 0x227   :  { %424 = vst [vmem:[%s691_s2] sm:$0xff] %v408_v15  ;;  %425 = vst [vmem:[%s691_s2 + $0x8] sm:$0xff] %v409_v21  ;;  %v407_v8 = vmul.f32 0.6931472, %v500_v25 }
 0x228   :  { %426 = vst [vmem:[%s691_s2 + $0x10] sm:$0xff] %v410_v22  ;;  %427 = vst [vmem:[%s691_s2 + $0x18] sm:$0xff] %v411_v24 }
 0x229   :  { %428 = vst [vmem:[%s691_s2 + $0x20] sm:$0xff] %v412_v28  ;;  %429 = vst [vmem:[%s691_s2 + $0x28] sm:$0xff] %v413_v30  ;;  %v416_v9 = vsub.f32 %v588_v16, %v407_v8  ;;  %v417_v10 = vsub.f32 %v590_v17, %v407_v8  ;;  %v418_v11 = vsub.f32 %v592_v18, %v407_v8 }
 0x22a   :  { %430 = vst [vmem:[%s691_s2 + $0x30] sm:$0xff] %v414_v32  ;;  %431 = vst [vmem:[%s691_s2 + $0x38] sm:$0xff] %v415_v34  ;;  %v419_v20 = vsub.f32 %v594_v19, %v407_v8  ;;  %v420_v26 = vsub.f32 %v600_v23, %v407_v8  ;;  %v421_v29 = vsub.f32 %v606_v27, %v407_v8 }
 0x22b   :  { %v422_v33 = vsub.f32 %v612_v31, %v407_v8  ;;  %v423_v35 = vsub.f32 %v619_v36, %v407_v8  ;;  %432 = vst [vmem:[%s691_s2 + $0x40] sm:$0xff] %v416_v9  ;;  %433 = vst [vmem:[%s691_s2 + $0x48] sm:$0xff] %v417_v10 }
 0x22c   :  { %434 = vst [vmem:[%s691_s2 + $0x50] sm:$0xff] %v418_v11  ;;  %435 = vst [vmem:[%s691_s2 + $0x58] sm:$0xff] %v419_v20 }
 0x22d   :  { %436 = vst [vmem:[%s691_s2 + $0x60] sm:$0xff] %v420_v26  ;;  %437 = vst [vmem:[%s691_s2 + $0x68] sm:$0xff] %v421_v29 }
 0x22e   :  { %438 = vst [vmem:[%s691_s2 + $0x70] sm:$0xff] %v422_v33  ;;  %439 = vst [vmem:[%s691_s2 + $0x78] sm:$0xff] %v423_v35 }

// kernel: transformer_no_embed_forward.81
= control target key start
LH: loop header
LB: loop body
LE: loop exit
PB: predicated region body
PF: predicated region fallthrough
CT: control target
= control target key end

     0   :  { %v356_v0 = vmov 0.0   ;;  %vm357_vm0 = vmmov 0   ;;  %vm37_vm1 = vcmask 261120   ;;  %vm99_vm2 = vcmask 1043456   ;;  %s432_s1 = inlined_call_operand.vmem [shape: bf16[32,8], index: 1, kind: input, shape index: {}]   ;;  %s433_s0 = inlined_call_operand.vmem [shape: f32[16,32], index: 0, kind: input, shape index: {}]   ;;  %s434_s2 = inlined_call_operand.vmem [shape: bf16[8,512], index: 2, kind: input, shape index: {}]   ;;  %s435_s3 = inlined_call_operand.vmem [shape: f32[16,1], index: 3, kind: input, shape index: {}]   ;;  %s436_s4 = inlined_call_operand.vmem [shape: f32[16,512], index: 4, kind: output, shape index: {}]  }
   0x1   :  { %317 = vmatprep.subr.bf16.mxu0 %v356_v0  ;;  %v330_v1 = vld [vmem:[%s432_s1 + $0x8] sm:$0xff]   ;;  %321 = vmatprep.mubr.msk.bf16.mxu0 %vm357_vm0, %v356_v0  ;;  %v331_v2 = vld [vmem:[%s432_s1] sm:$0xff]   ;;  %v358_v12 = vmov 0   ;;  %vm95_vm3 = vcmask 64512   ;;  %v198_v20 = vlaneseq }
   0x2   :  { %318 = vmatpush3.bf16.msra.mxu0 %v330_v1  ;;  %v18_v3 = vld [vmem:[%s433_s0] sm:$0xff]  ;;  %v19_v4 = vld [vmem:[%s433_s0 + $0x8] sm:$0xff]  ;;  %144 = vmatprep.mubr.bf16.mxu1 %v358_v12 }
   0x3   :  { %319 = vmatprep.subr.bf16.mxu0 %v356_v0  ;;  %v20_v5 = vpack.c.bf16 %v19_v4, %v18_v3  ;;  %v83_v6 = vld [vmem:[%s434_s2] sm:$0xff]  ;;  %v84_v9 = vld [vmem:[%s434_s2 + $0x8] sm:$0xff]  ;;  %328 = vset.pattern.permute.xlu0 %v358_v12  ;;  %v199_v22 = vand.u32 127, %v198_v20 }
   0x4   :  { %v307_v7 = vcombine.high %v83_v6, %v83_v6  ;;  %v306_v8 = vcombine.low %v83_v6, %v83_v6  ;;  %v309_v10 = vcombine.high %v84_v9, %v84_v9  ;;  %v308_v13 = vcombine.low %v84_v9, %v84_v9  ;;  %329 = vset.pattern.permute.xlu1 %v358_v12  ;;  %v271_v39 = vld [vmem:[%s435_s3] sm:$0xff] }
   0x5   :  { %v202_v25 = vadd.s32 384, %v199_v22 }
   0x6   :  { %320 = vmatpush3.bf16.msra.mxu0 %v331_v2  ;;  %310 = vmatprep.subr.msk.bf16.mxu1 %vm99_vm2, %v307_v7  ;;  %v101_v11 = vsel %vm99_vm2, %v306_v8, 0  ;;  %v107_v14 = vsel %vm99_vm2, %v308_v13, 0  ;;  %v272_v8 = vld [vmem:[%s435_s3 + $0x8] sm:$0xff] }
   0x7   :  { %127 = vmatpush1.bf16.msra.mxu1 %v101_v11  ;;  %vm206_vm4 = vcmp.lt.s32.totalorder %v202_v25, 500 }
   0x8   :  { %312 = vmatprep.subr.msk.bf16.mxu1 %vm99_vm2, %v309_v10 }
   0x9   :  { %322 = vmatmul.mubr.msk.bf16.vlgmr.msra.gmra.mxu0 %vm37_vm1, %v20_v5 }
  0xc9   :  { %v75_v15 = vpop.f32.mrf.mxu0 }
  0xcb   :  { %v323_v16 = vpop.f32.mrf.mxu0 }
  0xcd   :  { %v78_v17 = vpop.f32.mrf.mxu0 }
  0xce   :  { %v82_v18 = vpack.c.bf16 %v78_v17, %v75_v15 }
  0xcf   :  { %v324_v19 = vpop.f32.mrf.mxu0 }
  0xd0   :  { %311 = vmatmul.mubr.msk.bf16.vlgmr.msra.gmra.mxu1 %vm95_vm3, %v82_v18 }
  0xd1   :  { %170 = vmatpush1.bf16.msra.mxu1 %v107_v14  ;;  %187 = vmatprep.mubr.bf16.mxu1 %v358_v12 }
  0xd8   :  { %313 = vmatmul.mubr.msk.bf16.vlgmr.msra.gmra.mxu1 %vm95_vm3, %v82_v18 }
 0x190   :  { %v146_v21 = vpop.f32.mrf.mxu1 }
 0x192   :  { %v148_v23 = vpop.f32.mrf.mxu1 }
 0x194   :  { %v150_v24 = vpop.f32.mrf.mxu1 }
 0x196   :  { %v152_v26 = vpop.f32.mrf.mxu1 }
 0x198   :  { %v189_v27 = vpop.f32.mrf.mxu1 }
 0x199   :  { %v215_v30 = vmax.f32 %v146_v21, %v189_v27 }
 0x19a   :  { %v191_v28 = vpop.f32.mrf.mxu1 }
 0x19b   :  { %v210_v29 = vsel %vm206_vm4, %v191_v28, -1e+30 }
 0x19c   :  { %v216_v31 = vmax.f32 %v148_v23, %v210_v29  ;;  %v193_v32 = vpop.f32.mrf.mxu1 }
 0x19d   :  { %v220_v36 = vmax.f32 %v150_v24, %v193_v32 }
 0x19e   :  { %v195_v33 = vpop.f32.mrf.mxu1  ;;  %v217_v34 = vmax.f32 %v215_v30, %v216_v31 }
 0x19f   :  { %v214_v35 = vsel %vm206_vm4, %v195_v33, -1e+30 }
 0x1a0   :  { %v221_v37 = vmax.f32 %v152_v26, %v214_v35  ;;  %218 = vmax.xlane.f32.xlu0 %v217_v34 }
 0x1a2   :  { %v222_v38 = vmax.f32 %v220_v36, %v221_v37 }
 0x1a4   :  { %223 = vmax.xlane.f32.xlu0 %v222_v38 }
 0x1ba   :  { %275 = vperm.xlu0 %328, %v271_v39  }
 0x229   :  { %v219_v40 = vpop.xlane.xlu0 %218 }
 0x22a   :  { %v225_v41 = vsub.f32 %v146_v21, %v219_v40  ;;  %v226_v42 = vsub.f32 %v148_v23, %v219_v40  ;;  %v227_v43 = vsub.f32 %v189_v27, %v219_v40  ;;  %v228_v44 = vsub.f32 %v210_v29, %v219_v40 }
 0x22c   :  { %v233_v45 = vmul.f32 1.442695, %v225_v41  ;;  %v235_v46 = vmul.f32 1.442695, %v226_v42  ;;  %v237_v47 = vmul.f32 1.442695, %v227_v43 }
 0x22d   :  { %v239_v48 = vmul.f32 1.442695, %v228_v44  ;;  %v224_v49 = vpop.xlane.xlu0 %223 }
 0x22e   :  { %336 = vpow2.f32 %v233_v45  ;;  %v229_v50 = vsub.f32 %v150_v24, %v224_v49  ;;  %v230_v51 = vsub.f32 %v152_v26, %v224_v49  ;;  %v231_v52 = vsub.f32 %v193_v32, %v224_v49 }
 0x22f   :  { %338 = vpow2.f32 %v235_v46  ;;  %v232_v53 = vsub.f32 %v214_v35, %v224_v49 }
 0x230   :  { %340 = vpow2.f32 %v237_v47  ;;  %v241_v54 = vmul.f32 1.442695, %v229_v50  ;;  %v243_v55 = vmul.f32 1.442695, %v230_v51  ;;  %v245_v56 = vmul.f32 1.442695, %v231_v52 }
 0x231   :  { %342 = vpow2.f32 %v239_v48  ;;  %v247_v57 = vmul.f32 1.442695, %v232_v53 }
 0x232   :  { %344 = vpow2.f32 %v241_v54 }
 0x233   :  { %346 = vpow2.f32 %v243_v55 }
 0x234   :  { %348 = vpow2.f32 %v245_v56 }
 0x235   :  { %350 = vpow2.f32 %v247_v57  ;;  %v276_v13 = vpop.permute.xlu0 %275 }
 0x23b   :  { %v337_v58 = vpop.eup %336 }
 0x23c   :  { %v339_v59 = vpop.eup %338 }
 0x23d   :  { %v341_v60 = vpop.eup %340  ;;  %v249_v61 = vadd.f32 %v339_v59, %v337_v58 }
 0x23e   :  { %v343_v62 = vpop.eup %342 }
 0x23f   :  { %v345_v63 = vpop.eup %344  ;;  %v250_v0 = vadd.f32 %v341_v60, %v249_v61 }
 0x240   :  { %v347_v1 = vpop.eup %346 }
 0x241   :  { %v251_v2 = vadd.f32 %v343_v62, %v250_v0  ;;  %v254_v3 = vadd.f32 %v347_v1, %v345_v63  ;;  %v349_v4 = vpop.eup %348 }
 0x242   :  { %v351_v6 = vpop.eup %350 }
 0x243   :  { %252 = vadd.xlane.f32.xlu1 %v251_v2  ;;  %v255_v5 = vadd.f32 %v349_v4, %v254_v3 }
 0x245   :  { %v256_v7 = vadd.f32 %v351_v6, %v255_v5 }
 0x247   :  { %257 = vadd.xlane.f32.xlu1 %v256_v7 }
 0x258   :  { %280 = vperm.xlu1 %329, %v272_v8  }
 0x2cc   :  { %v253_v9 = vpop.xlane.xlu1 %252 }
 0x2cd   :  { %352 = vlog2.f32 %v253_v9 }
 0x2d0   :  { %v258_v10 = vpop.xlane.xlu1 %257 }
 0x2d1   :  { %354 = vlog2.f32 %v258_v10 }
 0x2d4   :  { %v281_v24 = vpop.permute.xlu1 %280 }
 0x2da   :  { %v353_v11 = vpop.eup %352 }
 0x2db   :  { %v260_v12 = vmul.f32 0.6931472, %v353_v11 }
 0x2dd   :  { %v263_v14 = vsub.f32 %v225_v41, %v260_v12  ;;  %v264_v15 = vsub.f32 %v226_v42, %v260_v12  ;;  %v265_v16 = vsub.f32 %v227_v43, %v260_v12  ;;  %v266_v17 = vsub.f32 %v228_v44, %v260_v12 }
 0x2de   :  { %v355_v18 = vpop.eup %354 }
 0x2df   :  { %v262_v19 = vmul.f32 0.6931472, %v355_v18  ;;  %v283_v20 = vadd.f32 %v276_v13, %v263_v14  ;;  %v284_v21 = vadd.f32 %v276_v13, %v264_v15  ;;  %v285_v22 = vadd.f32 %v276_v13, %v265_v16 }
 0x2e0   :  { %v286_v23 = vadd.f32 %v276_v13, %v266_v17 }
 0x2e1   :  { %291 = vst [vmem:[%s436_s4] sm:$0xff] %v283_v20  ;;  %292 = vst [vmem:[%s436_s4 + $0x8] sm:$0xff] %v284_v21  ;;  %v267_v25 = vsub.f32 %v229_v50, %v262_v19  ;;  %v268_v26 = vsub.f32 %v230_v51, %v262_v19  ;;  %v269_v27 = vsub.f32 %v231_v52, %v262_v19 }
 0x2e2   :  { %293 = vst [vmem:[%s436_s4 + $0x10] sm:$0xff] %v285_v22  ;;  %v270_v28 = vsub.f32 %v232_v53, %v262_v19  ;;  %294 = vst [vmem:[%s436_s4 + $0x18] sm:$0xff] %v286_v23 }
 0x2e3   :  { %v287_v29 = vadd.f32 %v281_v24, %v267_v25  ;;  %v288_v30 = vadd.f32 %v281_v24, %v268_v26  ;;  %v289_v31 = vadd.f32 %v281_v24, %v269_v27 }
 0x2e4   :  { %v290_v32 = vadd.f32 %v281_v24, %v270_v28 }
 0x2e5   :  { %295 = vst [vmem:[%s436_s4 + $0x20] sm:$0xff] %v287_v29  ;;  %296 = vst [vmem:[%s436_s4 + $0x28] sm:$0xff] %v288_v30 }
 0x2e6   :  { %297 = vst [vmem:[%s436_s4 + $0x30] sm:$0xff] %v289_v31  ;;  %298 = vst [vmem:[%s436_s4 + $0x38] sm:$0xff] %v290_v32 }

</bundles_post_ra>
